<compile_context>
chip_gen: v5e
topology: v5e:2x2
jax: 0.10.0
libtpu: 0.0.40
codegen_flags: <defaults>
</compile_context>

<pallas_src>
import jax
import jax.numpy as jnp
from jax.experimental import pallas as pl
from jax.experimental.pallas import tpu as pltpu


# --------------------------------------------------------------------------
# Kernel
# --------------------------------------------------------------------------
def lstm_kernel(x_ref, w_ih_ref, w_hh_ref, b_ref, w_out_ref, b_out_ref,
                out_ref, h_scr, c_scr, hblk_scr):
    """One grid step processes TBLK timesteps of the recurrence.

    x_ref:     (TBLK, D)   f32  streamed input block
    w_ih_ref:  (D, 4H)     bf16 input->gates weights, gate order [i,f,o,g]
    w_hh_ref:  (H, 4H)     bf16 hidden->gates weights, gate order [i,f,o,g]
    b_ref:     (1, 4H)     f32  b_ih + b_hh, gate order [i,f,o,g]
    w_out_ref: (H, Op)     bf16 final linear weights (Op = O padded to 128)
    b_out_ref: (1, Op)     f32  final linear bias (zero padded)
    out_ref:   (TBLK, Op)  f32  predictions for this block (lane-dense)
    h_scr:     (1, H)      f32  hidden-state carry (persists across grid steps)
    c_scr:     (1, H)      f32  cell-state carry   (persists across grid steps)
    hblk_scr:  (8, H)      f32  hidden rows of the current 8-step sub-block
    """
    H = w_hh_ref.shape[0]
    tblk = x_ref.shape[0]
    nsub = tblk // 8                       # TBLK is a multiple of 8

    @pl.when(pl.program_id(0) == 0)
    def _():
        h_scr[...] = jnp.zeros_like(h_scr)
        c_scr[...] = jnp.zeros_like(c_scr)

    def sub_body(s, carry):
        h, c = carry                       # (1, H) f32 each
        base = pl.multiple_of(s * 8, 8)

        # Recompute x @ W_ih + b for this 8-row sub-block (K = D is tiny);
        # f32 accumulation on the MXU, so numerics match a full precompute.
        xb = (jnp.dot(x_ref[pl.ds(base, 8), :].astype(jnp.bfloat16),
                      w_ih_ref[...], preferred_element_type=jnp.float32)
              + b_ref[...])                                   # (8, 4H) f32

        for k in range(8):                                    # statically unrolled
            gates = xb[k:k + 1, :] + jnp.dot(
                h.astype(jnp.bfloat16), w_hh_ref[...],
                preferred_element_type=jnp.float32)           # (1, 4H) f32
            # Gate order [i, f, o, g]: one sigmoid issue + one tanh issue.
            sig = jax.nn.sigmoid(gates[:, :3 * H])            # i | f | o
            g_g = jnp.tanh(gates[:, 3 * H:])                  # g
            i_g = sig[:, 0 * H:1 * H]
            f_g = sig[:, 1 * H:2 * H]
            o_g = sig[:, 2 * H:3 * H]
            c = f_g * c + i_g * g_g
            h = o_g * jnp.tanh(c)
            # Per-row store: H % 128 == 0 -> lane-dense, unmasked (k static).
            hblk_scr[k:k + 1, :] = h

        # Project this 8-row block of hidden states to the output (MXU) and
        # write the lane-dense output slab directly; no (T,H) scratch needed.
        out_ref[pl.ds(base, 8), :] = (
            jnp.dot(hblk_scr[...].astype(jnp.bfloat16), w_out_ref[...],
                    preferred_element_type=jnp.float32)
            + b_out_ref[...])
        return (h, c)

    h, c = jax.lax.fori_loop(0, nsub, sub_body,
                             (h_scr[...], c_scr[...]), unroll=1)
    h_scr[...] = h
    c_scr[...] = c
    # NOTE: padded tail timesteps run through the recurrence; outputs for them
    # are sliced off outside and the final (h, c) is never returned, matching
    # the PyTorch module (which discards the final states).


# --------------------------------------------------------------------------
# Weight preparation (hoisted out of the per-call path)
# --------------------------------------------------------------------------
def _gate_perm(H):
    # PyTorch fused gate order is [i, f, g, o]; reorder to [i, f, o, g].
    return jnp.concatenate([jnp.arange(0, 2 * H),
                            jnp.arange(3 * H, 4 * H),
                            jnp.arange(2 * H, 3 * H)])


def _prepare_weights(params):
    """Pre-transposed, gate-reordered, bf16 weights + f32 fused bias."""
    H = params["w_hh"].shape[1]
    O = params["w_out"].shape[0]
    perm = _gate_perm(H)
    w_ih_t = params["w_ih"].T[:, perm].astype(jnp.bfloat16)          # (D, 4H)
    w_hh_t = params["w_hh"].T[:, perm].astype(jnp.bfloat16)          # (H, 4H)
    b = (params["b_ih"] + params["b_hh"])[perm].reshape(1, 4 * H)
    b = b.astype(jnp.float32)
    w_out_t = params["w_out"].T.astype(jnp.bfloat16)                 # (H, O)
    b_out = params["b_out"].reshape(1, O).astype(jnp.float32)
    return w_ih_t, w_hh_t, b, w_out_t, b_out


def prepare_params(params):
    """Call once; the result is reused across lstm_forward calls."""
    w_ih_t, w_hh_t, b, w_out_t, b_out = _prepare_weights(params)
    H = w_hh_t.shape[0]
    O = w_out_t.shape[1]
    O_pad = ((O + 127) // 128) * 128     # lane-dense output width
    w_out_p = jnp.zeros((H, O_pad), jnp.bfloat16).at[:, :O].set(w_out_t)
    b_out_p = jnp.zeros((1, O_pad), jnp.float32).at[:, :O].set(b_out)
    return {"w_ih": w_ih_t, "w_hh": w_hh_t, "b": b,
            "w_out": w_out_p, "b_out": b_out_p, "O": O}


def _chip_vmem_bytes():
    try:
        return int(pltpu.get_tpu_info().vmem_capacity_bytes)
    except Exception:
        return 64 << 20   # conservative (v7x per-TensorCore VMEM)


# --------------------------------------------------------------------------
# Forward wrapper
# --------------------------------------------------------------------------
def lstm_forward(x, prep):
    T, D = x.shape
    H = prep["w_hh"].shape[0]
    O = prep["O"]
    O_pad = prep["w_out"].shape[1]
    # TODO(synk): if H is not a multiple of 128, pad the 4H gate axis to a lane
    # multiple in prepare_params before slicing gates in the kernel.
    assert H % 128 == 0, "hidden size must be lane-aligned (multiple of 128)"

    # Time-block size: multiple of 8, capped so per-block residency stays tiny.
    TBLK = min(8 * ((T + 7) // 8), 64)
    n_blk = -(-T // TBLK)
    T_pad = n_blk * TBLK
    x_p = jnp.zeros((T_pad, D), jnp.float32).at[:T].set(x)

    # VMEM residency: double-buffered streamed blocks + pinned weights + scratch.
    weight_bytes = (D * 4 * H + H * 4 * H + H * O_pad) * 2 + (4 * H + O_pad) * 4
    stream_bytes = TBLK * D * 4 + TBLK * O_pad * 4
    scratch_bytes = (2 * H + 8 * H) * 4
    resident_bytes = 2 * (weight_bytes + stream_bytes) + scratch_bytes
    chip_vmem = _chip_vmem_bytes()
    vmem_limit = int(min(max(resident_bytes + (4 << 20), 16 << 20),
                         chip_vmem - (8 << 20)))

    grid_spec = pltpu.PrefetchScalarGridSpec(
        num_scalar_prefetch=0,
        grid=(n_blk,),
        in_specs=[
            pl.BlockSpec((TBLK, D), lambda i: (i, 0)),       # streamed x
            pl.BlockSpec((D, 4 * H), lambda i: (0, 0)),      # pinned weights
            pl.BlockSpec((H, 4 * H), lambda i: (0, 0)),
            pl.BlockSpec((1, 4 * H), lambda i: (0, 0)),
            pl.BlockSpec((H, O_pad), lambda i: (0, 0)),
            pl.BlockSpec((1, O_pad), lambda i: (0, 0)),
        ],
        out_specs=pl.BlockSpec((TBLK, O_pad), lambda i: (i, 0)),
        scratch_shapes=[
            pltpu.VMEM((1, H), jnp.float32),   # h carry (persists across grid)
            pltpu.VMEM((1, H), jnp.float32),   # c carry
            pltpu.VMEM((8, H), jnp.float32),   # hidden rows of one sub-block
        ],
    )

    out = pl.pallas_call(
        lstm_kernel,
        out_shape=jax.ShapeDtypeStruct((T_pad, O_pad), jnp.float32),
        grid_spec=grid_spec,
        compiler_params=pltpu.CompilerParams(
            dimension_semantics=("arbitrary",),   # recurrence: sequential axis
            vmem_limit_bytes=vmem_limit),
    )(x_p, prep["w_ih"], prep["w_hh"], prep["b"], prep["w_out"], prep["b_out"])

    return out[:T, :O]


# --------------------------------------------------------------------------
# References
# --------------------------------------------------------------------------
def lstm_reference_mixed(x, params):
    """Pure-JAX reference mirroring the kernel's mixed precision exactly."""
    H = params["w_hh"].shape[1]
    w_ih_t, w_hh_t, b, w_out_t, b_out = _prepare_weights(params)

    xproj = jnp.dot(x.astype(jnp.bfloat16), w_ih_t,
                    preferred_element_type=jnp.float32) + b

    def step(carry, xp_t):
        h, c = carry
        gates = xp_t[None, :] + jnp.dot(h.astype(jnp.bfloat16), w_hh_t,
                                        preferred_element_type=jnp.float32)
        sig = jax.nn.sigmoid(gates[:, :3 * H])
        g_g = jnp.tanh(gates[:, 3 * H:])
        c = sig[:, H:2 * H] * c + sig[:, :H] * g_g
        h = sig[:, 2 * H:3 * H] * jnp.tanh(c)
        return (h, c), h[0]

    h0 = jnp.zeros((1, H), jnp.float32)
    c0 = jnp.zeros((1, H), jnp.float32)
    _, hs = jax.lax.scan(step, (h0, c0), xproj)
    return jnp.dot(hs.astype(jnp.bfloat16), w_out_t,
                   preferred_element_type=jnp.float32) + b_out


def lstm_reference_f32(x, params):
    """Pure-f32 reference matching torch.nn.LSTM + Linear semantics."""
    H = params["w_hh"].shape[1]

    def step(carry, x_t):
        h, c = carry
        gates = (x_t @ params["w_ih"].T + params["b_ih"]
                 + h @ params["w_hh"].T + params["b_hh"])
        i_g = jax.nn.sigmoid(gates[0 * H:1 * H])
        f_g = jax.nn.sigmoid(gates[1 * H:2 * H])
        g_g = jnp.tanh(gates[2 * H:3 * H])
        o_g = jax.nn.sigmoid(gates[3 * H:4 * H])
        c_new = f_g * c + i_g * g_g
        h_new = o_g * jnp.tanh(c_new)
        return (h_new, c_new), h_new

    h0 = jnp.zeros((H,), jnp.float32)
    c0 = jnp.zeros((H,), jnp.float32)
    _, hs = jax.lax.scan(step, (h0, c0), x)
    return hs @ params["w_out"].T + params["b_out"]


def init_params(key, input_dim, hidden_units, output_size):
    """Deterministic init mirroring PyTorch shapes (uniform +-1/sqrt(H))."""
    ks = jax.random.split(key, 6)
    s = 1.0 / jnp.sqrt(hidden_units)
    return {
        "w_ih": jax.random.uniform(ks[0], (4 * hidden_units, input_dim),
                                   jnp.float32, -s, s),
        "w_hh": jax.random.uniform(ks[1], (4 * hidden_units, hidden_units),
                                   jnp.float32, -s, s),
        "b_ih": jax.random.uniform(ks[2], (4 * hidden_units,),
                                   jnp.float32, -s, s),
        "b_hh": jax.random.uniform(ks[3], (4 * hidden_units,),
                                   jnp.float32, -s, s),
        "w_out": jax.random.uniform(ks[4], (output_size, hidden_units),
                                    jnp.float32, -s, s),
        "b_out": jax.random.uniform(ks[5], (output_size,),
                                    jnp.float32, -s, s),
    }


if __name__ == "__main__":
    # Small shapes consistent with the module: input_dim=5, output_size=5,
    # hidden=128 (lane-aligned small stand-in for 512), num_layers=1, dropout=0.
    D, H, O = 5, 128, 5

    key = jax.random.PRNGKey(0)
    k_x1, k_x2, k_p = jax.random.split(key, 3)
    params = init_params(k_p, D, H, O)
    prep = prepare_params(params)          # weight prep hoisted out of the call

    # Case 1: seq len 8 (single grid block).
    T1 = 8
    x1 = jax.random.normal(k_x1, (T1, D), jnp.float32)
    out1 = jax.block_until_ready(lstm_forward(x1, prep))
    ref1_mixed = jax.block_until_ready(lstm_reference_mixed(x1, params))
    ref1_f32 = jax.block_until_ready(lstm_reference_f32(x1, params))
    assert out1.shape == (T1, O)
    assert jnp.allclose(out1, ref1_mixed, atol=1e-3, rtol=1e-3)
    assert jnp.allclose(out1, ref1_f32, atol=5e-2, rtol=5e-2)

    # Case 2: seq len 100 -> 2 grid blocks + tail padding; exercises the
    # h/c carry across grid steps and the streamed x/out BlockSpecs.
    T2 = 100
    x2 = jax.random.normal(k_x2, (T2, D), jnp.float32)
    out2 = jax.block_until_ready(lstm_forward(x2, prep))
    ref2_mixed = jax.block_until_ready(lstm_reference_mixed(x2, params))
    assert out2.shape == (T2, O)
    assert jnp.allclose(out2, ref2_mixed, atol=5e-3, rtol=5e-3)

    print("KERNEL_OK")
</pallas_src>

<mosaic_0001>
module attributes {stable_mosaic.version = 11 : i64} {
  func.func @lstm_kernel(%arg0: i32, %arg1: memref<8x5xf32, #tpu.memory_space<vmem>>, %arg2: memref<5x512xbf16, #tpu.memory_space<vmem>>, %arg3: memref<128x512xbf16, #tpu.memory_space<vmem>>, %arg4: memref<1x512xf32, #tpu.memory_space<vmem>>, %arg5: memref<128x128xbf16, #tpu.memory_space<vmem>>, %arg6: memref<1x128xf32, #tpu.memory_space<vmem>>, %arg7: memref<8x128xf32, #tpu.memory_space<vmem>>, %arg8: memref<1x128xf32, #tpu.memory_space<vmem>>, %arg9: memref<1x128xf32, #tpu.memory_space<vmem>>, %arg10: memref<8x128xf32, #tpu.memory_space<vmem>>) attributes {dimension_semantics = [#tpu.dimension_semantics<arbitrary>], iteration_bounds = array<i64: 1>, scalar_prefetch = 0 : i64, scratch_operands = 3 : i64, tpu.core_type = #tpu.core_type<tc>, window_params = [{transform_indices = @transform_0, window_bounds = array<i64: 8, 5>}, {pipeline_mode = #tpu.pipeline_mode<synchronous>, transform_indices = @transform_1, window_bounds = array<i64: 5, 512>}, {pipeline_mode = #tpu.pipeline_mode<synchronous>, transform_indices = @transform_2, window_bounds = array<i64: 128, 512>}, {pipeline_mode = #tpu.pipeline_mode<synchronous>, transform_indices = @transform_3, window_bounds = array<i64: 1, 512>}, {pipeline_mode = #tpu.pipeline_mode<synchronous>, transform_indices = @transform_4, window_bounds = array<i64: 128, 128>}, {pipeline_mode = #tpu.pipeline_mode<synchronous>, transform_indices = @transform_5, window_bounds = array<i64: 1, 128>}, {transform_indices = @transform_6, window_bounds = array<i64: 8, 128>}]} {
    %c0_i32 = arith.constant 0 : i32
    %0 = arith.cmpi eq, %arg0, %c0_i32 : i32
    %1 = arith.extui %0 : i1 to i32
    %c0_i32_0 = arith.constant 0 : i32
    %2 = arith.cmpi ne, %1, %c0_i32_0 : i32
    scf.if %2 {
      %cst_63 = arith.constant 0.000000e+00 : f32
      %202 = vector.broadcast %cst_63 : f32 to vector<1x128xf32>
      %c0_64 = arith.constant 0 : index
      %c0_65 = arith.constant 0 : index
      %203 = vector.load %arg8[%c0_64, %c0_65] : memref<1x128xf32, #tpu.memory_space<vmem>>, vector<1x128xf32>
      tpu.vector_store %arg8[%c0_64, %c0_65], %202 {strides = array<i32>} : memref<1x128xf32, #tpu.memory_space<vmem>>, vector<1x128xf32>,
      %cst_66 = arith.constant 0.000000e+00 : f32
      %204 = vector.broadcast %cst_66 : f32 to vector<1x128xf32>
      %c0_67 = arith.constant 0 : index
      %c0_68 = arith.constant 0 : index
      %205 = vector.load %arg9[%c0_67, %c0_68] : memref<1x128xf32, #tpu.memory_space<vmem>>, vector<1x128xf32>
      tpu.vector_store %arg9[%c0_67, %c0_68], %204 {strides = array<i32>} : memref<1x128xf32, #tpu.memory_space<vmem>>, vector<1x128xf32>,
    } else {
    }
    %c0 = arith.constant 0 : index
    %c0_1 = arith.constant 0 : index
    %3 = vector.load %arg8[%c0, %c0_1] : memref<1x128xf32, #tpu.memory_space<vmem>>, vector<1x128xf32>
    %c0_2 = arith.constant 0 : index
    %c0_3 = arith.constant 0 : index
    %4 = vector.load %arg9[%c0_2, %c0_3] : memref<1x128xf32, #tpu.memory_space<vmem>>, vector<1x128xf32>
    %c0_i32_4 = arith.constant 0 : i32
    %c8_i32 = arith.constant 8 : i32
    %5 = arith.muli %c0_i32_4, %c8_i32 : i32
    %6 = tpu.assume_multiple %5, 8 : i32
    %7 = arith.index_cast %6 : i32 to index
    %c0_5 = arith.constant 0 : index
    %8 = vector.load %arg1[%7, %c0_5] : memref<8x5xf32, #tpu.memory_space<vmem>>, vector<8x5xf32>
    %9 = arith.truncf %8 : vector<8x5xf32> to vector<8x5xbf16>
    %c0_6 = arith.constant 0 : index
    %c0_7 = arith.constant 0 : index
    %10 = vector.load %arg2[%c0_6, %c0_7] : memref<5x512xbf16, #tpu.memory_space<vmem>>, vector<5x512xbf16>
    %cst = arith.constant dense<0.000000e+00> : vector<8x512xf32>
    %11 = tpu.matmul %9, %10, %cst {dimension_numbers = #tpu.dot_dimension_numbers<[1], [0], [0], [1], [0, 0, 1, 1], [], []>} : vector<8x5xbf16>, vector<5x512xbf16>, vector<8x512xf32> -> vector<8x512xf32>
    %c0_8 = arith.constant 0 : index
    %c0_9 = arith.constant 0 : index
    %12 = vector.load %arg4[%c0_8, %c0_9] : memref<1x512xf32, #tpu.memory_space<vmem>>, vector<1x512xf32>
    %13 = vector.broadcast %12 : vector<1x512xf32> to vector<8x512xf32>
    %14 = arith.addf %11, %13 : vector<8x512xf32>
    %15 = vector.extract_strided_slice %14 {offsets = [0, 0], sizes = [1, 512], strides = [1, 1]} : vector<8x512xf32> to vector<1x512xf32>
    %16 = arith.truncf %3 : vector<1x128xf32> to vector<1x128xbf16>
    %c0_10 = arith.constant 0 : index
    %c0_11 = arith.constant 0 : index
    %17 = vector.load %arg3[%c0_10, %c0_11] : memref<128x512xbf16, #tpu.memory_space<vmem>>, vector<128x512xbf16>
    %cst_12 = arith.constant dense<0.000000e+00> : vector<1x512xf32>
    %18 = tpu.matmul %16, %17, %cst_12 {dimension_numbers = #tpu.dot_dimension_numbers<[1], [0], [0], [1], [0, 0, 1, 1], [], []>} : vector<1x128xbf16>, vector<128x512xbf16>, vector<1x512xf32> -> vector<1x512xf32>
    %19 = arith.addf %15, %18 : vector<1x512xf32>
    %20 = vector.extract_strided_slice %19 {offsets = [0, 0], sizes = [1, 384], strides = [1, 1]} : vector<1x512xf32> to vector<1x384xf32>
    %21 = arith.negf %20 : vector<1x384xf32>
    %22 = math.exp %21 : vector<1x384xf32>
    %cst_13 = arith.constant 1.000000e+00 : f32
    %23 = vector.broadcast %cst_13 : f32 to vector<1x384xf32>
    %24 = arith.addf %23, %22 : vector<1x384xf32>
    %25 = arith.divf %23, %24 : vector<1x384xf32>
    %26 = vector.extract_strided_slice %19 {offsets = [0, 384], sizes = [1, 128], strides = [1, 1]} : vector<1x512xf32> to vector<1x128xf32>
    %27 = math.tanh %26 : vector<1x128xf32>
    %28 = vector.extract_strided_slice %25 {offsets = [0, 0], sizes = [1, 128], strides = [1, 1]} : vector<1x384xf32> to vector<1x128xf32>
    %29 = vector.extract_strided_slice %25 {offsets = [0, 128], sizes = [1, 128], strides = [1, 1]} : vector<1x384xf32> to vector<1x128xf32>
    %30 = vector.extract_strided_slice %25 {offsets = [0, 256], sizes = [1, 128], strides = [1, 1]} : vector<1x384xf32> to vector<1x128xf32>
    %31 = arith.mulf %29, %4 : vector<1x128xf32>
    %32 = arith.mulf %28, %27 : vector<1x128xf32>
    %33 = arith.addf %31, %32 : vector<1x128xf32>
    %34 = math.tanh %33 : vector<1x128xf32>
    %35 = arith.mulf %30, %34 : vector<1x128xf32>
    %c0_14 = arith.constant 0 : index
    %c0_15 = arith.constant 0 : index
    %36 = vector.load %arg10[%c0_14, %c0_15] : memref<8x128xf32, #tpu.memory_space<vmem>>, vector<1x128xf32>
    tpu.vector_store %arg10[%c0_14, %c0_15], %35 {strides = array<i32>} : memref<8x128xf32, #tpu.memory_space<vmem>>, vector<1x128xf32>,
    %37 = vector.extract_strided_slice %14 {offsets = [1, 0], sizes = [1, 512], strides = [1, 1]} : vector<8x512xf32> to vector<1x512xf32>
    %38 = arith.truncf %35 : vector<1x128xf32> to vector<1x128xbf16>
    %c0_16 = arith.constant 0 : index
    %c0_17 = arith.constant 0 : index
    %39 = vector.load %arg3[%c0_16, %c0_17] : memref<128x512xbf16, #tpu.memory_space<vmem>>, vector<128x512xbf16>
    %cst_18 = arith.constant dense<0.000000e+00> : vector<1x512xf32>
    %40 = tpu.matmul %38, %39, %cst_18 {dimension_numbers = #tpu.dot_dimension_numbers<[1], [0], [0], [1], [0, 0, 1, 1], [], []>} : vector<1x128xbf16>, vector<128x512xbf16>, vector<1x512xf32> -> vector<1x512xf32>
    %41 = arith.addf %37, %40 : vector<1x512xf32>
    %42 = vector.extract_strided_slice %41 {offsets = [0, 0], sizes = [1, 384], strides = [1, 1]} : vector<1x512xf32> to vector<1x384xf32>
    %43 = arith.negf %42 : vector<1x384xf32>
    %44 = math.exp %43 : vector<1x384xf32>
    %cst_19 = arith.constant 1.000000e+00 : f32
    %45 = vector.broadcast %cst_19 : f32 to vector<1x384xf32>
    %46 = arith.addf %45, %44 : vector<1x384xf32>
    %47 = arith.divf %45, %46 : vector<1x384xf32>
    %48 = vector.extract_strided_slice %41 {offsets = [0, 384], sizes = [1, 128], strides = [1, 1]} : vector<1x512xf32> to vector<1x128xf32>
    %49 = math.tanh %48 : vector<1x128xf32>
    %50 = vector.extract_strided_slice %47 {offsets = [0, 0], sizes = [1, 128], strides = [1, 1]} : vector<1x384xf32> to vector<1x128xf32>
    %51 = vector.extract_strided_slice %47 {offsets = [0, 128], sizes = [1, 128], strides = [1, 1]} : vector<1x384xf32> to vector<1x128xf32>
    %52 = vector.extract_strided_slice %47 {offsets = [0, 256], sizes = [1, 128], strides = [1, 1]} : vector<1x384xf32> to vector<1x128xf32>
    %53 = arith.mulf %51, %33 : vector<1x128xf32>
    %54 = arith.mulf %50, %49 : vector<1x128xf32>
    %55 = arith.addf %53, %54 : vector<1x128xf32>
    %56 = math.tanh %55 : vector<1x128xf32>
    %57 = arith.mulf %52, %56 : vector<1x128xf32>
    %c1 = arith.constant 1 : index
    %c0_20 = arith.constant 0 : index
    %58 = vector.load %arg10[%c1, %c0_20] : memref<8x128xf32, #tpu.memory_space<vmem>>, vector<1x128xf32>
    tpu.vector_store %arg10[%c1, %c0_20], %57 {strides = array<i32>} : memref<8x128xf32, #tpu.memory_space<vmem>>, vector<1x128xf32>,
    %59 = vector.extract_strided_slice %14 {offsets = [2, 0], sizes = [1, 512], strides = [1, 1]} : vector<8x512xf32> to vector<1x512xf32>
    %60 = arith.truncf %57 : vector<1x128xf32> to vector<1x128xbf16>
    %c0_21 = arith.constant 0 : index
    %c0_22 = arith.constant 0 : index
    %61 = vector.load %arg3[%c0_21, %c0_22] : memref<128x512xbf16, #tpu.memory_space<vmem>>, vector<128x512xbf16>
    %cst_23 = arith.constant dense<0.000000e+00> : vector<1x512xf32>
    %62 = tpu.matmul %60, %61, %cst_23 {dimension_numbers = #tpu.dot_dimension_numbers<[1], [0], [0], [1], [0, 0, 1, 1], [], []>} : vector<1x128xbf16>, vector<128x512xbf16>, vector<1x512xf32> -> vector<1x512xf32>
    %63 = arith.addf %59, %62 : vector<1x512xf32>
    %64 = vector.extract_strided_slice %63 {offsets = [0, 0], sizes = [1, 384], strides = [1, 1]} : vector<1x512xf32> to vector<1x384xf32>
    %65 = arith.negf %64 : vector<1x384xf32>
    %66 = math.exp %65 : vector<1x384xf32>
    %cst_24 = arith.constant 1.000000e+00 : f32
    %67 = vector.broadcast %cst_24 : f32 to vector<1x384xf32>
    %68 = arith.addf %67, %66 : vector<1x384xf32>
    %69 = arith.divf %67, %68 : vector<1x384xf32>
    %70 = vector.extract_strided_slice %63 {offsets = [0, 384], sizes = [1, 128], strides = [1, 1]} : vector<1x512xf32> to vector<1x128xf32>
    %71 = math.tanh %70 : vector<1x128xf32>
    %72 = vector.extract_strided_slice %69 {offsets = [0, 0], sizes = [1, 128], strides = [1, 1]} : vector<1x384xf32> to vector<1x128xf32>
    %73 = vector.extract_strided_slice %69 {offsets = [0, 128], sizes = [1, 128], strides = [1, 1]} : vector<1x384xf32> to vector<1x128xf32>
    %74 = vector.extract_strided_slice %69 {offsets = [0, 256], sizes = [1, 128], strides = [1, 1]} : vector<1x384xf32> to vector<1x128xf32>
    %75 = arith.mulf %73, %55 : vector<1x128xf32>
    %76 = arith.mulf %72, %71 : vector<1x128xf32>
    %77 = arith.addf %75, %76 : vector<1x128xf32>
    %78 = math.tanh %77 : vector<1x128xf32>
    %79 = arith.mulf %74, %78 : vector<1x128xf32>
    %c2 = arith.constant 2 : index
    %c0_25 = arith.constant 0 : index
    %80 = vector.load %arg10[%c2, %c0_25] : memref<8x128xf32, #tpu.memory_space<vmem>>, vector<1x128xf32>
    tpu.vector_store %arg10[%c2, %c0_25], %79 {strides = array<i32>} : memref<8x128xf32, #tpu.memory_space<vmem>>, vector<1x128xf32>,
    %81 = vector.extract_strided_slice %14 {offsets = [3, 0], sizes = [1, 512], strides = [1, 1]} : vector<8x512xf32> to vector<1x512xf32>
    %82 = arith.truncf %79 : vector<1x128xf32> to vector<1x128xbf16>
    %c0_26 = arith.constant 0 : index
    %c0_27 = arith.constant 0 : index
    %83 = vector.load %arg3[%c0_26, %c0_27] : memref<128x512xbf16, #tpu.memory_space<vmem>>, vector<128x512xbf16>
    %cst_28 = arith.constant dense<0.000000e+00> : vector<1x512xf32>
    %84 = tpu.matmul %82, %83, %cst_28 {dimension_numbers = #tpu.dot_dimension_numbers<[1], [0], [0], [1], [0, 0, 1, 1], [], []>} : vector<1x128xbf16>, vector<128x512xbf16>, vector<1x512xf32> -> vector<1x512xf32>
    %85 = arith.addf %81, %84 : vector<1x512xf32>
    %86 = vector.extract_strided_slice %85 {offsets = [0, 0], sizes = [1, 384], strides = [1, 1]} : vector<1x512xf32> to vector<1x384xf32>
    %87 = arith.negf %86 : vector<1x384xf32>
    %88 = math.exp %87 : vector<1x384xf32>
    %cst_29 = arith.constant 1.000000e+00 : f32
    %89 = vector.broadcast %cst_29 : f32 to vector<1x384xf32>
    %90 = arith.addf %89, %88 : vector<1x384xf32>
    %91 = arith.divf %89, %90 : vector<1x384xf32>
    %92 = vector.extract_strided_slice %85 {offsets = [0, 384], sizes = [1, 128], strides = [1, 1]} : vector<1x512xf32> to vector<1x128xf32>
    %93 = math.tanh %92 : vector<1x128xf32>
    %94 = vector.extract_strided_slice %91 {offsets = [0, 0], sizes = [1, 128], strides = [1, 1]} : vector<1x384xf32> to vector<1x128xf32>
    %95 = vector.extract_strided_slice %91 {offsets = [0, 128], sizes = [1, 128], strides = [1, 1]} : vector<1x384xf32> to vector<1x128xf32>
    %96 = vector.extract_strided_slice %91 {offsets = [0, 256], sizes = [1, 128], strides = [1, 1]} : vector<1x384xf32> to vector<1x128xf32>
    %97 = arith.mulf %95, %77 : vector<1x128xf32>
    %98 = arith.mulf %94, %93 : vector<1x128xf32>
    %99 = arith.addf %97, %98 : vector<1x128xf32>
    %100 = math.tanh %99 : vector<1x128xf32>
    %101 = arith.mulf %96, %100 : vector<1x128xf32>
    %c3 = arith.constant 3 : index
    %c0_30 = arith.constant 0 : index
    %102 = vector.load %arg10[%c3, %c0_30] : memref<8x128xf32, #tpu.memory_space<vmem>>, vector<1x128xf32>
    tpu.vector_store %arg10[%c3, %c0_30], %101 {strides = array<i32>} : memref<8x128xf32, #tpu.memory_space<vmem>>, vector<1x128xf32>,
    %103 = vector.extract_strided_slice %14 {offsets = [4, 0], sizes = [1, 512], strides = [1, 1]} : vector<8x512xf32> to vector<1x512xf32>
    %104 = arith.truncf %101 : vector<1x128xf32> to vector<1x128xbf16>
    %c0_31 = arith.constant 0 : index
    %c0_32 = arith.constant 0 : index
    %105 = vector.load %arg3[%c0_31, %c0_32] : memref<128x512xbf16, #tpu.memory_space<vmem>>, vector<128x512xbf16>
    %cst_33 = arith.constant dense<0.000000e+00> : vector<1x512xf32>
    %106 = tpu.matmul %104, %105, %cst_33 {dimension_numbers = #tpu.dot_dimension_numbers<[1], [0], [0], [1], [0, 0, 1, 1], [], []>} : vector<1x128xbf16>, vector<128x512xbf16>, vector<1x512xf32> -> vector<1x512xf32>
    %107 = arith.addf %103, %106 : vector<1x512xf32>
    %108 = vector.extract_strided_slice %107 {offsets = [0, 0], sizes = [1, 384], strides = [1, 1]} : vector<1x512xf32> to vector<1x384xf32>
    %109 = arith.negf %108 : vector<1x384xf32>
    %110 = math.exp %109 : vector<1x384xf32>
    %cst_34 = arith.constant 1.000000e+00 : f32
    %111 = vector.broadcast %cst_34 : f32 to vector<1x384xf32>
    %112 = arith.addf %111, %110 : vector<1x384xf32>
    %113 = arith.divf %111, %112 : vector<1x384xf32>
    %114 = vector.extract_strided_slice %107 {offsets = [0, 384], sizes = [1, 128], strides = [1, 1]} : vector<1x512xf32> to vector<1x128xf32>
    %115 = math.tanh %114 : vector<1x128xf32>
    %116 = vector.extract_strided_slice %113 {offsets = [0, 0], sizes = [1, 128], strides = [1, 1]} : vector<1x384xf32> to vector<1x128xf32>
    %117 = vector.extract_strided_slice %113 {offsets = [0, 128], sizes = [1, 128], strides = [1, 1]} : vector<1x384xf32> to vector<1x128xf32>
    %118 = vector.extract_strided_slice %113 {offsets = [0, 256], sizes = [1, 128], strides = [1, 1]} : vector<1x384xf32> to vector<1x128xf32>
    %119 = arith.mulf %117, %99 : vector<1x128xf32>
    %120 = arith.mulf %116, %115 : vector<1x128xf32>
    %121 = arith.addf %119, %120 : vector<1x128xf32>
    %122 = math.tanh %121 : vector<1x128xf32>
    %123 = arith.mulf %118, %122 : vector<1x128xf32>
    %c4 = arith.constant 4 : index
    %c0_35 = arith.constant 0 : index
    %124 = vector.load %arg10[%c4, %c0_35] : memref<8x128xf32, #tpu.memory_space<vmem>>, vector<1x128xf32>
    tpu.vector_store %arg10[%c4, %c0_35], %123 {strides = array<i32>} : memref<8x128xf32, #tpu.memory_space<vmem>>, vector<1x128xf32>,
    %125 = vector.extract_strided_slice %14 {offsets = [5, 0], sizes = [1, 512], strides = [1, 1]} : vector<8x512xf32> to vector<1x512xf32>
    %126 = arith.truncf %123 : vector<1x128xf32> to vector<1x128xbf16>
    %c0_36 = arith.constant 0 : index
    %c0_37 = arith.constant 0 : index
    %127 = vector.load %arg3[%c0_36, %c0_37] : memref<128x512xbf16, #tpu.memory_space<vmem>>, vector<128x512xbf16>
    %cst_38 = arith.constant dense<0.000000e+00> : vector<1x512xf32>
    %128 = tpu.matmul %126, %127, %cst_38 {dimension_numbers = #tpu.dot_dimension_numbers<[1], [0], [0], [1], [0, 0, 1, 1], [], []>} : vector<1x128xbf16>, vector<128x512xbf16>, vector<1x512xf32> -> vector<1x512xf32>
    %129 = arith.addf %125, %128 : vector<1x512xf32>
    %130 = vector.extract_strided_slice %129 {offsets = [0, 0], sizes = [1, 384], strides = [1, 1]} : vector<1x512xf32> to vector<1x384xf32>
    %131 = arith.negf %130 : vector<1x384xf32>
    %132 = math.exp %131 : vector<1x384xf32>
    %cst_39 = arith.constant 1.000000e+00 : f32
    %133 = vector.broadcast %cst_39 : f32 to vector<1x384xf32>
    %134 = arith.addf %133, %132 : vector<1x384xf32>
    %135 = arith.divf %133, %134 : vector<1x384xf32>
    %136 = vector.extract_strided_slice %129 {offsets = [0, 384], sizes = [1, 128], strides = [1, 1]} : vector<1x512xf32> to vector<1x128xf32>
    %137 = math.tanh %136 : vector<1x128xf32>
    %138 = vector.extract_strided_slice %135 {offsets = [0, 0], sizes = [1, 128], strides = [1, 1]} : vector<1x384xf32> to vector<1x128xf32>
    %139 = vector.extract_strided_slice %135 {offsets = [0, 128], sizes = [1, 128], strides = [1, 1]} : vector<1x384xf32> to vector<1x128xf32>
    %140 = vector.extract_strided_slice %135 {offsets = [0, 256], sizes = [1, 128], strides = [1, 1]} : vector<1x384xf32> to vector<1x128xf32>
    %141 = arith.mulf %139, %121 : vector<1x128xf32>
    %142 = arith.mulf %138, %137 : vector<1x128xf32>
    %143 = arith.addf %141, %142 : vector<1x128xf32>
    %144 = math.tanh %143 : vector<1x128xf32>
    %145 = arith.mulf %140, %144 : vector<1x128xf32>
    %c5 = arith.constant 5 : index
    %c0_40 = arith.constant 0 : index
    %146 = vector.load %arg10[%c5, %c0_40] : memref<8x128xf32, #tpu.memory_space<vmem>>, vector<1x128xf32>
    tpu.vector_store %arg10[%c5, %c0_40], %145 {strides = array<i32>} : memref<8x128xf32, #tpu.memory_space<vmem>>, vector<1x128xf32>,
    %147 = vector.extract_strided_slice %14 {offsets = [6, 0], sizes = [1, 512], strides = [1, 1]} : vector<8x512xf32> to vector<1x512xf32>
    %148 = arith.truncf %145 : vector<1x128xf32> to vector<1x128xbf16>
    %c0_41 = arith.constant 0 : index
    %c0_42 = arith.constant 0 : index
    %149 = vector.load %arg3[%c0_41, %c0_42] : memref<128x512xbf16, #tpu.memory_space<vmem>>, vector<128x512xbf16>
    %cst_43 = arith.constant dense<0.000000e+00> : vector<1x512xf32>
    %150 = tpu.matmul %148, %149, %cst_43 {dimension_numbers = #tpu.dot_dimension_numbers<[1], [0], [0], [1], [0, 0, 1, 1], [], []>} : vector<1x128xbf16>, vector<128x512xbf16>, vector<1x512xf32> -> vector<1x512xf32>
    %151 = arith.addf %147, %150 : vector<1x512xf32>
    %152 = vector.extract_strided_slice %151 {offsets = [0, 0], sizes = [1, 384], strides = [1, 1]} : vector<1x512xf32> to vector<1x384xf32>
    %153 = arith.negf %152 : vector<1x384xf32>
    %154 = math.exp %153 : vector<1x384xf32>
    %cst_44 = arith.constant 1.000000e+00 : f32
    %155 = vector.broadcast %cst_44 : f32 to vector<1x384xf32>
    %156 = arith.addf %155, %154 : vector<1x384xf32>
    %157 = arith.divf %155, %156 : vector<1x384xf32>
    %158 = vector.extract_strided_slice %151 {offsets = [0, 384], sizes = [1, 128], strides = [1, 1]} : vector<1x512xf32> to vector<1x128xf32>
    %159 = math.tanh %158 : vector<1x128xf32>
    %160 = vector.extract_strided_slice %157 {offsets = [0, 0], sizes = [1, 128], strides = [1, 1]} : vector<1x384xf32> to vector<1x128xf32>
    %161 = vector.extract_strided_slice %157 {offsets = [0, 128], sizes = [1, 128], strides = [1, 1]} : vector<1x384xf32> to vector<1x128xf32>
    %162 = vector.extract_strided_slice %157 {offsets = [0, 256], sizes = [1, 128], strides = [1, 1]} : vector<1x384xf32> to vector<1x128xf32>
    %163 = arith.mulf %161, %143 : vector<1x128xf32>
    %164 = arith.mulf %160, %159 : vector<1x128xf32>
    %165 = arith.addf %163, %164 : vector<1x128xf32>
    %166 = math.tanh %165 : vector<1x128xf32>
    %167 = arith.mulf %162, %166 : vector<1x128xf32>
    %c6 = arith.constant 6 : index
    %c0_45 = arith.constant 0 : index
    %168 = vector.load %arg10[%c6, %c0_45] : memref<8x128xf32, #tpu.memory_space<vmem>>, vector<1x128xf32>
    tpu.vector_store %arg10[%c6, %c0_45], %167 {strides = array<i32>} : memref<8x128xf32, #tpu.memory_space<vmem>>, vector<1x128xf32>,
    %169 = vector.extract_strided_slice %14 {offsets = [7, 0], sizes = [1, 512], strides = [1, 1]} : vector<8x512xf32> to vector<1x512xf32>
    %170 = arith.truncf %167 : vector<1x128xf32> to vector<1x128xbf16>
    %c0_46 = arith.constant 0 : index
    %c0_47 = arith.constant 0 : index
    %171 = vector.load %arg3[%c0_46, %c0_47] : memref<128x512xbf16, #tpu.memory_space<vmem>>, vector<128x512xbf16>
    %cst_48 = arith.constant dense<0.000000e+00> : vector<1x512xf32>
    %172 = tpu.matmul %170, %171, %cst_48 {dimension_numbers = #tpu.dot_dimension_numbers<[1], [0], [0], [1], [0, 0, 1, 1], [], []>} : vector<1x128xbf16>, vector<128x512xbf16>, vector<1x512xf32> -> vector<1x512xf32>
    %173 = arith.addf %169, %172 : vector<1x512xf32>
    %174 = vector.extract_strided_slice %173 {offsets = [0, 0], sizes = [1, 384], strides = [1, 1]} : vector<1x512xf32> to vector<1x384xf32>
    %175 = arith.negf %174 : vector<1x384xf32>
    %176 = math.exp %175 : vector<1x384xf32>
    %cst_49 = arith.constant 1.000000e+00 : f32
    %177 = vector.broadcast %cst_49 : f32 to vector<1x384xf32>
    %178 = arith.addf %177, %176 : vector<1x384xf32>
    %179 = arith.divf %177, %178 : vector<1x384xf32>
    %180 = vector.extract_strided_slice %173 {offsets = [0, 384], sizes = [1, 128], strides = [1, 1]} : vector<1x512xf32> to vector<1x128xf32>
    %181 = math.tanh %180 : vector<1x128xf32>
    %182 = vector.extract_strided_slice %179 {offsets = [0, 0], sizes = [1, 128], strides = [1, 1]} : vector<1x384xf32> to vector<1x128xf32>
    %183 = vector.extract_strided_slice %179 {offsets = [0, 128], sizes = [1, 128], strides = [1, 1]} : vector<1x384xf32> to vector<1x128xf32>
    %184 = vector.extract_strided_slice %179 {offsets = [0, 256], sizes = [1, 128], strides = [1, 1]} : vector<1x384xf32> to vector<1x128xf32>
    %185 = arith.mulf %183, %165 : vector<1x128xf32>
    %186 = arith.mulf %182, %181 : vector<1x128xf32>
    %187 = arith.addf %185, %186 : vector<1x128xf32>
    %188 = math.tanh %187 : vector<1x128xf32>
    %189 = arith.mulf %184, %188 : vector<1x128xf32>
    %c7 = arith.constant 7 : index
    %c0_50 = arith.constant 0 : index
    %190 = vector.load %arg10[%c7, %c0_50] : memref<8x128xf32, #tpu.memory_space<vmem>>, vector<1x128xf32>
    tpu.vector_store %arg10[%c7, %c0_50], %189 {strides = array<i32>} : memref<8x128xf32, #tpu.memory_space<vmem>>, vector<1x128xf32>,
    %c0_51 = arith.constant 0 : index
    %c0_52 = arith.constant 0 : index
    %191 = vector.load %arg10[%c0_51, %c0_52] : memref<8x128xf32, #tpu.memory_space<vmem>>, vector<8x128xf32>
    %192 = arith.truncf %191 : vector<8x128xf32> to vector<8x128xbf16>
    %c0_53 = arith.constant 0 : index
    %c0_54 = arith.constant 0 : index
    %193 = vector.load %arg5[%c0_53, %c0_54] : memref<128x128xbf16, #tpu.memory_space<vmem>>, vector<128x128xbf16>
    %cst_55 = arith.constant dense<0.000000e+00> : vector<8x128xf32>
    %194 = tpu.matmul %192, %193, %cst_55 {dimension_numbers = #tpu.dot_dimension_numbers<[1], [0], [0], [1], [0, 0, 1, 1], [], []>} : vector<8x128xbf16>, vector<128x128xbf16>, vector<8x128xf32> -> vector<8x128xf32>
    %c0_56 = arith.constant 0 : index
    %c0_57 = arith.constant 0 : index
    %195 = vector.load %arg6[%c0_56, %c0_57] : memref<1x128xf32, #tpu.memory_space<vmem>>, vector<1x128xf32>
    %196 = vector.broadcast %195 : vector<1x128xf32> to vector<8x128xf32>
    %197 = arith.addf %194, %196 : vector<8x128xf32>
    %198 = arith.index_cast %6 : i32 to index
    %c0_58 = arith.constant 0 : index
    %199 = vector.load %arg7[%198, %c0_58] : memref<8x128xf32, #tpu.memory_space<vmem>>, vector<8x128xf32>
    tpu.vector_store %arg7[%198, %c0_58], %197 {strides = array<i32>} : memref<8x128xf32, #tpu.memory_space<vmem>>, vector<8x128xf32>,
    %c1_i32 = arith.constant 1 : i32
    %c0_59 = arith.constant 0 : index
    %c0_60 = arith.constant 0 : index
    %200 = vector.load %arg8[%c0_59, %c0_60] : memref<1x128xf32, #tpu.memory_space<vmem>>, vector<1x128xf32>
    tpu.vector_store %arg8[%c0_59, %c0_60], %189 {strides = array<i32>} : memref<1x128xf32, #tpu.memory_space<vmem>>, vector<1x128xf32>,
    %c0_61 = arith.constant 0 : index
    %c0_62 = arith.constant 0 : index
    %201 = vector.load %arg9[%c0_61, %c0_62] : memref<1x128xf32, #tpu.memory_space<vmem>>, vector<1x128xf32>
    tpu.vector_store %arg9[%c0_61, %c0_62], %187 {strides = array<i32>} : memref<1x128xf32, #tpu.memory_space<vmem>>, vector<1x128xf32>,
    return
  }
  func.func @transform_0(%arg0: i32) -> (i32, i32) {
    %c0_i32 = arith.constant 0 : i32
    %c0_i32_0 = arith.constant 0 : i32
    return %arg0, %c0_i32 : i32, i32
  }
  func.func @transform_1(%arg0: i32) -> (i32, i32) {
    %c0_i32 = arith.constant 0 : i32
    %c0_i32_0 = arith.constant 0 : i32
    %c0_i32_1 = arith.constant 0 : i32
    return %c0_i32, %c0_i32_0 : i32, i32
  }
  func.func @transform_2(%arg0: i32) -> (i32, i32) {
    %c0_i32 = arith.constant 0 : i32
    %c0_i32_0 = arith.constant 0 : i32
    %c0_i32_1 = arith.constant 0 : i32
    return %c0_i32, %c0_i32_0 : i32, i32
  }
  func.func @transform_3(%arg0: i32) -> (i32, i32) {
    %c0_i32 = arith.constant 0 : i32
    %c0_i32_0 = arith.constant 0 : i32
    %c0_i32_1 = arith.constant 0 : i32
    return %c0_i32, %c0_i32_0 : i32, i32
  }
  func.func @transform_4(%arg0: i32) -> (i32, i32) {
    %c0_i32 = arith.constant 0 : i32
    %c0_i32_0 = arith.constant 0 : i32
    %c0_i32_1 = arith.constant 0 : i32
    return %c0_i32, %c0_i32_0 : i32, i32
  }
  func.func @transform_5(%arg0: i32) -> (i32, i32) {
    %c0_i32 = arith.constant 0 : i32
    %c0_i32_0 = arith.constant 0 : i32
    %c0_i32_1 = arith.constant 0 : i32
    return %c0_i32, %c0_i32_0 : i32, i32
  }
  func.func @transform_6(%arg0: i32) -> (i32, i32) {
    %c0_i32 = arith.constant 0 : i32
    %c0_i32_0 = arith.constant 0 : i32
    return %arg0, %c0_i32 : i32, i32
  }
}

</mosaic_0001>

<bundles_post_ra>
// kernel: tpu_custom_call.1
= control target key start
LH: loop header
LB: loop body
LE: loop exit
PB: predicated region body
PF: predicated region fallthrough
CT: control target
= control target key end

     0   :  { %11 = vsyncpa [#allocation6], 0  ;;  %s4771_s0 = inlined_call_operand.hbm [shape: f32[8,5], index: 0, kind: input, shape index: {}]   ;;  %s4772_s1 = inlined_call_operand.hbm [shape: bf16[5,512], index: 1, kind: input, shape index: {}]   ;;  %s4773_s2 = inlined_call_operand.hbm [shape: bf16[128,512], index: 2, kind: input, shape index: {}]   ;;  %s4774_s3 = inlined_call_operand.hbm [shape: f32[1,512], index: 3, kind: input, shape index: {}]   ;;  %s4775_s4 = inlined_call_operand.hbm [shape: bf16[128,128], index: 4, kind: input, shape index: {}]   ;;  %s4776_s5 = inlined_call_operand.vmem [shape: f32[1,128], index: 5, kind: input, shape index: {}]   ;;  %s4777_s6 = inlined_call_operand.hbm [shape: f32[8,128], index: 6, kind: output, shape index: {}]  }
   0x1   :  { %12 = vsyncpa [#allocation9], 0 }
   0x2   :  { %13 = vsyncpa [#allocation12], 0  ;;  %s31_s23 = sshll.u32 %s4772_s1, 4  ;;  %s32_s23 = int_to_ptr.hbm [resolvable:$true] %s31_s23 }
   0x3   :  { %14 = vsyncpa [#allocation7], 0  ;;  %s4579_s24 = smov [#allocation8]   ;;  %s55_s28 = sshll.u32 %s4774_s3, 4  ;;  %s56_s28 = int_to_ptr.hbm [resolvable:$true] %s55_s28 }
   0x4   :  { %s33_s25 = sshll.u32 %s4579_s24, 4  ;;  %s4580_s29 = smov [#allocation11]   ;;  %s34_s25 = int_to_ptr.vmem [resolvable:$true] %s33_s25 }
   0x5   :  { %36 = dma.hbm_to_vmem [thread:$0]  %s32_s23, 256, %s34_s25, [#allocation9]  }
   0x6   :  { %s57_s30 = sshll.u32 %s4580_s29, 4  ;;  %s20_s9 = sshll.u32 %s4771_s0, 4  ;;  %s58_s30 = int_to_ptr.vmem [resolvable:$true] %s57_s30  ;;  %s21_s9 = int_to_ptr.hbm [resolvable:$true] %s20_s9 }
   0x7   :  { %60 = dma.hbm_to_vmem [thread:$0]  %s56_s28, 64, %s58_s30, [#allocation12]  }
   0x8   :  { %s41_s11 = sshll.u32 %s4773_s2, 4  ;;  %s4581_s12 = smov [#allocation5]   ;;  %s42_s11 = int_to_ptr.hbm [resolvable:$true] %s41_s11 }
   0x9   :  { %s22_s13 = sshll.u32 %s4581_s12, 4  ;;  %s4582_s3 = smov [#allocation10]   ;;  %s23_s13 = int_to_ptr.vmem [resolvable:$true] %s22_s13 }
   0xa   :  { %25 = dma.hbm_to_vmem [thread:$0]  %s21_s9, 128, %s23_s13, [#allocation6]  }
   0xb   :  { %s43_s14 = sshll.u32 %s4582_s3, 4  ;;  %s4583_s15 = smov 256   ;;  %s44_s14 = int_to_ptr.vmem [resolvable:$true] %s43_s14 }
   0xc   :  { %s4584_s16 = smov 16   ;;  %s65_s18 = sshll.u32 %s4775_s4, 4  ;;  %s66_s18 = int_to_ptr.hbm [resolvable:$true] %s65_s18 }
   0xd   :  { %49 = dma.hbm_to_vmem [thread:$0]  %s42_s11, 4096, %s44_s14, [#allocation9], %s4583_s15, %s4583_s15, %s4584_s16  }
   0xe   :  { %s4585_s19 = smov [#allocation13]   ;;  %s4586_s2 = smov 64  }
   0xf   :  { %s67_s20 = sshll.u32 %s4585_s19, 4  ;;  %s4587_s21 = smov 4   ;;  %s68_s20 = int_to_ptr.vmem [resolvable:$true] %s67_s20 }
  0x10   :  { %73 = dma.hbm_to_vmem [thread:$0]  %s66_s18, 1024, %s68_s20, [#allocation12], %s4586_s2, %s4586_s2, %s4587_s21  }
  0x11   :  { %4571 = dma.done.wait [#allocation6], 128  }
  0x12   :  { %4572 = vsyncadd [#allocation6], 4294967168 }
  0x13   :  { %4573 = dma.done.wait [#allocation9], 4352  }
  0x14   :  { %4574 = vsyncadd [#allocation9], 4294962944 }
  0x15   :  { %4575 = dma.done.wait [#allocation12], 1088  }
  0x16   :  { %4576 = vsyncadd [#allocation12], 4294966208  ;;  %v4588_v0 = vmov 0.0   ;;  %vm133_vm0 = vcmask 1041408   ;;  %vm134_vm1 = vcmask 1042432   ;;  %v4589_v1 = vmov 65535  }
  0x17   :  { %101 = vst [vmem:[#allocation2] sm:$0x1] %v4588_v0  ;;  %v135_v2 = vsel %vm133_vm0, 4294967295, %v4589_v1  ;;  %v3056_v3 = vld [vmem:[#allocation10 + $0xe0] sm:$0xf]  ;;  %v105_v19 = vld [vmem:[#allocation5] sm:$0xff] }
  0x18   :  { %102 = vst [vmem:[#allocation3] sm:$0x1] %v4588_v0  ;;  %v4052_v4 = vld [vmem:[#allocation10 + $0xec] sm:$0xf0]  ;;  %v108_v8 = vld [vmem:[#allocation8 + $0x8] sm:$0x77]  ;;  %v4641_v33 = vpack.c.bf16 %v105_v19, %v105_v19 }
  0x19   :  { %v107_v5 = vld [vmem:[#allocation8] sm:$0x77]  ;;  %v3057_v6 = vor.u32 %v4052_v4, %v3056_v3  ;;  %v3040_v9 = vld [vmem:[#allocation10 + $0xc0] sm:$0xf]  ;;  %v136_v12 = vsel %vm134_vm1, %v135_v2, 0  ;;  %v123_v13 = vunpack.c.l.b16 %v108_v8  ;;  %v124_v16 = vunpack.c.h.b16 %v108_v8  ;;  %s4590_s23 = smov [#allocation14]  }
  0x1a   :  { %v121_v7 = vunpack.c.l.b16 %v107_v5  ;;  %v4048_v10 = vld [vmem:[#allocation10 + $0xcc] sm:$0xf0]  ;;  %v122_v11 = vunpack.c.h.b16 %v107_v5  ;;  %v3064_v14 = vld [vmem:[#allocation10 + $0xe8] sm:$0xf]  ;;  %v4053_v15 = vld [vmem:[#allocation10 + $0xf4] sm:$0xf0] }
  0x1b   :  { %394 = vmatpush.bf16.msra.mxu0 %v3057_v6  ;;  %v3041_v18 = vor.u32 %v4048_v10, %v3040_v9  ;;  %v3024_v21 = vld [vmem:[#allocation10 + $0xa0] sm:$0xf]  ;;  %v127_v22 = vpack.c.b16 %v123_v13, %v123_v13  ;;  %v128_v23 = vpack.c.b16 %v124_v16, %v124_v16  ;;  %v4044_v24 = vld [vmem:[#allocation10 + $0xac] sm:$0xf0]  ;;  %v4050_v25 = vld [vmem:[#allocation10 + $0xe4] sm:$0xf]  ;;  %v3065_v28 = vor.u32 %v4053_v15, %v3064_v14 }
  0x1c   :  { %v125_v17 = vpack.c.b16 %v121_v7, %v121_v7  ;;  %v126_v20 = vpack.c.b16 %v122_v11, %v122_v11  ;;  %v3058_v26 = vld [vmem:[#allocation10 + $0xf0] sm:$0xf0]  ;;  %vm129_vm2 = vcmask 39936   ;;  %v4051_v30 = vld [vmem:[#allocation10 + $0xec] sm:$0xf]  ;;  %v3025_v38 = vor.u32 %v4044_v24, %v3024_v21  ;;  %s2924_s24 = sshll.u32 %s4590_s23, 4  ;;  %s2925_s24 = int_to_ptr.vmem [resolvable:$true] %s2924_s24 }
  0x1d   :  { %v3066_v31 = vld [vmem:[#allocation10 + $0xf8] sm:$0xf0]  ;;  %v144_v32 = vand.u32 %v136_v12, %v127_v22  ;;  %v147_v34 = vand.u32 %v136_v12, %v128_v23  ;;  %v3048_v35 = vld [vmem:[#allocation10 + $0xc8] sm:$0xf]  ;;  %v4049_v36 = vld [vmem:[#allocation10 + $0xd4] sm:$0xf0]  ;;  %v3061_v39 = vor.u32 %v4050_v25, %v3058_v26 }
  0x1e   :  { %v138_v27 = vand.u32 %v136_v12, %v125_v17  ;;  %v141_v29 = vand.u32 %v136_v12, %v126_v20  ;;  %v3069_v37 = vor.u32 %v4051_v30, %v3066_v31  ;;  %v3008_v40 = vld [vmem:[#allocation10 + $0x80] sm:$0xf]  ;;  %v4040_v41 = vld [vmem:[#allocation10 + $0x8c] sm:$0xf0]  ;;  %v4047_v42 = vld [vmem:[#allocation10 + $0xcc] sm:$0xf]  ;;  %v3049_v46 = vor.u32 %v4049_v36, %v3048_v35 }
  0x1f   :  { %395 = vmatpush.bf16.msra.mxu0 %v3041_v18  ;;  %182 = vmatpush.bf16.msra.mxu2 %v144_v32  ;;  %v4046_v43 = vld [vmem:[#allocation10 + $0xc4] sm:$0xf]  ;;  %v3042_v44 = vld [vmem:[#allocation10 + $0xd0] sm:$0xf0]  ;;  %v3050_v45 = vld [vmem:[#allocation10 + $0xd8] sm:$0xf0]  ;;  %v3009_v50 = vor.u32 %v4040_v41, %v3008_v40 }
  0x20   :  { %156 = vmatpush.bf16.msra.mxu1 %v138_v27  ;;  %195 = vmatpush.bf16.msra.mxu3 %v147_v34  ;;  %v3032_v47 = vld [vmem:[#allocation10 + $0xa8] sm:$0xf]  ;;  %v4045_v48 = vld [vmem:[#allocation10 + $0xb4] sm:$0xf0]  ;;  %v3053_v49 = vor.u32 %v4047_v42, %v3050_v45  ;;  %v3045_v51 = vor.u32 %v4046_v43, %v3042_v44  ;;  %v2992_v52 = vld [vmem:[#allocation10 + $0x60] sm:$0xf] }
  0x21   :  { %v4043_v53 = vld [vmem:[#allocation10 + $0xac] sm:$0xf]  ;;  %v3034_v54 = vld [vmem:[#allocation10 + $0xb8] sm:$0xf0]  ;;  %v4036_v55 = vld [vmem:[#allocation10 + $0x6c] sm:$0xf0]  ;;  %v3033_v58 = vor.u32 %v4045_v48, %v3032_v47 }
  0x22   :  { %v4042_v56 = vld [vmem:[#allocation10 + $0xa4] sm:$0xf]  ;;  %v3026_v57 = vld [vmem:[#allocation10 + $0xb0] sm:$0xf0]  ;;  %2940 = vmatmul.msk.bf16.vlgmr.msra.gmra.mxu2 %vm129_vm2, %v4641_v33  ;;  %v3016_v59 = vld [vmem:[#allocation10 + $0x88] sm:$0xf]  ;;  %v3037_v61 = vor.u32 %v4043_v53, %v3034_v54  ;;  %v2993_v62 = vor.u32 %v4036_v55, %v2992_v52 }
  0x23   :  { %420 = vmatpush.bf16.msrb.mxu2 %v3065_v28  ;;  %2938 = vmatmul.msk.bf16.vlgmr.msra.gmra.mxu1 %vm129_vm2, %v4641_v33  ;;  %v4041_v60 = vld [vmem:[#allocation10 + $0x94] sm:$0xf0]  ;;  %v3029_v63 = vor.u32 %v4042_v56, %v3026_v57  ;;  %v2976_v0 = vld [vmem:[#allocation10 + $0x40] sm:$0xf]  ;;  %v4039_v1 = vld [vmem:[#allocation10 + $0x8c] sm:$0xf] }
  0x24   :  { %169 = vmatpush.bf16.msrb.mxu1 %v141_v29  ;;  %433 = vmatpush.bf16.msrb.mxu3 %v3069_v37  ;;  %v3018_v2 = vld [vmem:[#allocation10 + $0x98] sm:$0xf0]  ;;  %v4032_v3 = vld [vmem:[#allocation10 + $0x4c] sm:$0xf0]  ;;  %v4038_v4 = vld [vmem:[#allocation10 + $0x84] sm:$0xf]  ;;  %v3017_v6 = vor.u32 %v4041_v60, %v3016_v59 }
  0x25   :  { %396 = vmatpush.bf16.msra.mxu0 %v3025_v38  ;;  %2941 = vmatmul.msk.bf16.vlgmr.msra.gmra.mxu3 %vm129_vm2, %v4641_v33  ;;  %v3010_v5 = vld [vmem:[#allocation10 + $0x90] sm:$0xf0]  ;;  %v3000_v7 = vld [vmem:[#allocation10 + $0x68] sm:$0xf]  ;;  %v4037_v8 = vld [vmem:[#allocation10 + $0x74] sm:$0xf0]  ;;  %v3021_v9 = vor.u32 %v4039_v1, %v3018_v2  ;;  %v2977_v10 = vor.u32 %v4032_v3, %v2976_v0 }
  0x26   :  { %v3013_v11 = vor.u32 %v4038_v4, %v3010_v5  ;;  %v2960_v12 = vld [vmem:[#allocation10 + $0x20] sm:$0xf]  ;;  %v4035_v13 = vld [vmem:[#allocation10 + $0x6c] sm:$0xf]  ;;  %v3002_v14 = vld [vmem:[#allocation10 + $0x78] sm:$0xf0]  ;;  %v3001_v18 = vor.u32 %v4037_v8, %v3000_v7 }
  0x27   :  { %421 = vmatpush.bf16.msrb.mxu2 %v3049_v46  ;;  %v4028_v15 = vld [vmem:[#allocation10 + $0x2c] sm:$0xf0]  ;;  %v4034_v16 = vld [vmem:[#allocation10 + $0x64] sm:$0xf]  ;;  %v2994_v17 = vld [vmem:[#allocation10 + $0x70] sm:$0xf0]  ;;  %v3005_v21 = vor.u32 %v4035_v13, %v3002_v14 }
  0x28   :  { %407 = vmatpush.bf16.msra.mxu1 %v3061_v39  ;;  %434 = vmatpush.bf16.msrb.mxu3 %v3053_v49  ;;  %v2984_v19 = vld [vmem:[#allocation10 + $0x48] sm:$0xf]  ;;  %v4033_v20 = vld [vmem:[#allocation10 + $0x54] sm:$0xf0]  ;;  %v2944_v22 = vld [vmem:[#allocation10] sm:$0xf]  ;;  %v2961_v23 = vor.u32 %v4028_v15, %v2960_v12  ;;  %v2997_v24 = vor.u32 %v4034_v16, %v2994_v17 }
  0x29   :  { %397 = vmatpush.bf16.msra.mxu0 %v3009_v50  ;;  %v4031_v25 = vld [vmem:[#allocation10 + $0x4c] sm:$0xf]  ;;  %v2986_v26 = vld [vmem:[#allocation10 + $0x58] sm:$0xf0]  ;;  %v4024_v27 = vld [vmem:[#allocation10 + $0xc] sm:$0xf0]  ;;  %v2985_v30 = vor.u32 %v4033_v20, %v2984_v19 }
  0x2a   :  { %v4030_v28 = vld [vmem:[#allocation10 + $0x44] sm:$0xf]  ;;  %v2978_v29 = vld [vmem:[#allocation10 + $0x50] sm:$0xf0]  ;;  %v2968_v31 = vld [vmem:[#allocation10 + $0x28] sm:$0xf]  ;;  %v2989_v34 = vor.u32 %v4031_v25, %v2986_v26  ;;  %v2945_v35 = vor.u32 %v4024_v27, %v2944_v22 }
  0x2b   :  { %422 = vmatpush.bf16.msrb.mxu2 %v3033_v58  ;;  %v4029_v32 = vld [vmem:[#allocation10 + $0x34] sm:$0xf0]  ;;  %v2981_v36 = vor.u32 %v4030_v28, %v2978_v29  ;;  %v103_v37 = vld [vmem:[#allocation2] sm:$0x1]  ;;  %v4027_v38 = vld [vmem:[#allocation10 + $0x2c] sm:$0xf] }
  0x2c   :  { %408 = vmatpush.bf16.msra.mxu1 %v3045_v51  ;;  %435 = vmatpush.bf16.msrb.mxu3 %v3037_v61  ;;  %v2970_v39 = vld [vmem:[#allocation10 + $0x38] sm:$0xf0]  ;;  %v4026_v40 = vld [vmem:[#allocation10 + $0x24] sm:$0xf]  ;;  %v2962_v41 = vld [vmem:[#allocation10 + $0x30] sm:$0xf0]  ;;  %v2969_v42 = vor.u32 %v4029_v32, %v2968_v31  ;;  %v201_v43 = vpack.c.bf16 %v103_v37, %v103_v37 }
  0x2d   :  { %398 = vmatpush.bf16.msra.mxu0 %v2993_v62  ;;  %v2952_v44 = vld [vmem:[#allocation10 + $0x8] sm:$0xf]  ;;  %v4025_v45 = vld [vmem:[#allocation10 + $0x14] sm:$0xf0]  ;;  %v2965_v46 = vor.u32 %v4026_v40, %v2962_v41  ;;  %v4023_v47 = vld [vmem:[#allocation10 + $0xc] sm:$0xf] }
  0x2e   :  { %v2954_v48 = vld [vmem:[#allocation10 + $0x18] sm:$0xf0]  ;;  %v4022_v49 = vld [vmem:[#allocation10 + $0x4] sm:$0xf]  ;;  %v2946_v50 = vld [vmem:[#allocation10 + $0x10] sm:$0xf0]  ;;  %v2953_v51 = vor.u32 %v4025_v45, %v2952_v44 }
  0x2f   :  { %423 = vmatpush.bf16.msrb.mxu2 %v3017_v6  ;;  %v2957_v52 = vor.u32 %v4023_v47, %v2954_v48  ;;  %v2949_v53 = vor.u32 %v4022_v49, %v2946_v50  ;;  %v3187_v58 = vld [vmem:[#allocation10 + $0xe0] sm:$0xf]  ;;  %v4084_v59 = vld [vmem:[#allocation10 + $0xec] sm:$0xf0]  ;;  %v4082_v60 = vld [vmem:[#allocation10 + $0xe4] sm:$0xf] }
  0x30   :  { %409 = vmatpush.bf16.msra.mxu1 %v3029_v63  ;;  %436 = vmatpush.bf16.msrb.mxu3 %v3021_v9  ;;  %v3188_v61 = vor.u32 %v4084_v59, %v3187_v58  ;;  %v3189_v62 = vld [vmem:[#allocation10 + $0xf0] sm:$0xf0]  ;;  %v3195_v63 = vld [vmem:[#allocation10 + $0xe8] sm:$0xf]  ;;  %v4085_v0 = vld [vmem:[#allocation10 + $0xf4] sm:$0xf0] }
  0x31   :  { %399 = vmatpush.bf16.msra.mxu0 %v2977_v10  ;;  %v3192_v1 = vor.u32 %v4082_v60, %v3189_v62  ;;  %v3196_v2 = vor.u32 %v4085_v0, %v3195_v63  ;;  %v4083_v3 = vld [vmem:[#allocation10 + $0xec] sm:$0xf]  ;;  %v3197_v4 = vld [vmem:[#allocation10 + $0xf8] sm:$0xf0]  ;;  %v4655_v5 = vld [vmem:[#allocation11] sm:$0xf] }
  0x32   :  { %v3200_v8 = vor.u32 %v4083_v3, %v3197_v4  ;;  %v3171_v10 = vld [vmem:[#allocation10 + $0xc0] sm:$0xf]  ;;  %v4078_v12 = vld [vmem:[#allocation10 + $0xc4] sm:$0xf]  ;;  %v3173_v14 = vld [vmem:[#allocation10 + $0xd0] sm:$0xf0] }
  0x33   :  { %424 = vmatpush.bf16.msrb.mxu2 %v3001_v18  ;;  %2939 = vmatmul.msk.bf16.vlgmr.msrb.gmra.mxu1 %vm129_vm2, %v4641_v33  ;;  %v2973_v33 = vor.u32 %v4027_v38, %v2970_v39  ;;  %v3179_v15 = vld [vmem:[#allocation10 + $0xc8] sm:$0xf]  ;;  %v4081_v16 = vld [vmem:[#allocation10 + $0xd4] sm:$0xf0]  ;;  %v111_v17 = vperm.slane %v4655_v5, 0  ;;  %v3176_v18 = vor.u32 %v4078_v12, %v3173_v14  ;;  %s2926_s27 = sshll.u32 %s4777_s6, 4  ;;  %s2927_s27 = int_to_ptr.hbm [resolvable:$true] %s2926_s27 }
  0x34   :  { %410 = vmatpush.bf16.msra.mxu1 %v3013_v11  ;;  %437 = vmatpush.bf16.msrb.mxu3 %v3005_v21  ;;  %v4080_v11 = vld [vmem:[#allocation10 + $0xcc] sm:$0xf0]  ;;  %v3180_v19 = vor.u32 %v4081_v16, %v3179_v15  ;;  %v4079_v20 = vld [vmem:[#allocation10 + $0xcc] sm:$0xf]  ;;  %v3181_v21 = vld [vmem:[#allocation10 + $0xd8] sm:$0xf0] }
  0x35   :  { %400 = vmatpush.bf16.msra.mxu0 %v2961_v23  ;;  %v3172_v13 = vor.u32 %v4080_v11, %v3171_v10  ;;  %v3184_v22 = vor.u32 %v4079_v20, %v3181_v21  ;;  %v3155_v23 = vld [vmem:[#allocation10 + $0xa0] sm:$0xf]  ;;  %v4074_v25 = vld [vmem:[#allocation10 + $0xa4] sm:$0xf]  ;;  %v3157_v27 = vld [vmem:[#allocation10 + $0xb0] sm:$0xf0] }
  0x36   :  { %v3163_v28 = vld [vmem:[#allocation10 + $0xa8] sm:$0xf]  ;;  %v4077_v29 = vld [vmem:[#allocation10 + $0xb4] sm:$0xf0]  ;;  %v3160_v31 = vor.u32 %v4074_v25, %v3157_v27  ;;  %v3139_v41 = vld [vmem:[#allocation10 + $0x80] sm:$0xf] }
  0x37   :  { %425 = vmatpush.bf16.msrb.mxu2 %v2985_v30  ;;  %v3164_v32 = vor.u32 %v4077_v29, %v3163_v28  ;;  %v3141_v45 = vld [vmem:[#allocation10 + $0x90] sm:$0xf0]  ;;  %v4071_v50 = vld [vmem:[#allocation10 + $0x8c] sm:$0xf]  ;;  %v4066_v59 = vld [vmem:[#allocation10 + $0x64] sm:$0xf] }
  0x38   :  { %411 = vmatpush.bf16.msra.mxu1 %v2997_v24  ;;  %438 = vmatpush.bf16.msrb.mxu3 %v2989_v34  ;;  %v4076_v24 = vld [vmem:[#allocation10 + $0xac] sm:$0xf0]  ;;  %v4075_v34 = vld [vmem:[#allocation10 + $0xac] sm:$0xf]  ;;  %v3125_v60 = vld [vmem:[#allocation10 + $0x70] sm:$0xf0] }
  0x39   :  { %401 = vmatpush.bf16.msra.mxu0 %v2945_v35  ;;  %v3156_v26 = vor.u32 %v4076_v24, %v3155_v23  ;;  %v3165_v35 = vld [vmem:[#allocation10 + $0xb8] sm:$0xf0]  ;;  %v3128_v63 = vor.u32 %v4066_v59, %v3125_v60  ;;  %v4069_v0 = vld [vmem:[#allocation10 + $0x74] sm:$0xf0]  ;;  %v3107_v10 = vld [vmem:[#allocation10 + $0x40] sm:$0xf] }
  0x3a   :  { %v3168_v39 = vor.u32 %v4075_v34, %v3165_v35  ;;  %v4064_v11 = vld [vmem:[#allocation10 + $0x4c] sm:$0xf0]  ;;  %v4062_v12 = vld [vmem:[#allocation10 + $0x44] sm:$0xf]  ;;  %v3115_v14 = vld [vmem:[#allocation10 + $0x48] sm:$0xf] }
  0x3b   :  { %426 = vmatpush.bf16.msrb.mxu2 %v2969_v42  ;;  %v4072_v42 = vld [vmem:[#allocation10 + $0x8c] sm:$0xf0]  ;;  %v4065_v15 = vld [vmem:[#allocation10 + $0x54] sm:$0xf0]  ;;  %v4063_v21 = vld [vmem:[#allocation10 + $0x4c] sm:$0xf] }
  0x3c   :  { %412 = vmatpush.bf16.msra.mxu1 %v2981_v36  ;;  %402 = vmatmul.bf16.vlgmr.msra.gmra.mxu0 %v201_v43  ;;  %v112_v36 = vperm.slane %v4655_v5, 1  ;;  %v3140_v44 = vor.u32 %v4072_v42, %v3139_v41  ;;  %v3116_v20 = vor.u32 %v4065_v15, %v3115_v14  ;;  %v4060_v27 = vld [vmem:[#allocation10 + $0x2c] sm:$0xf0]  ;;  %v3099_v34 = vld [vmem:[#allocation10 + $0x28] sm:$0xf] }
  0x3d   :  { %439 = vmatpush.bf16.msrb.mxu3 %v2973_v33  ;;  %707 = vmatpush.bf16.msrb.mxu0 %v3188_v61  ;;  %v3147_v33 = vld [vmem:[#allocation10 + $0x88] sm:$0xf]  ;;  %v4061_v35 = vld [vmem:[#allocation10 + $0x34] sm:$0xf0] }
  0x3e   :  { %v3131_v61 = vld [vmem:[#allocation10 + $0x68] sm:$0xf] }
  0x3f   :  { %427 = vmatpush.bf16.msrb.mxu2 %v2953_v51  ;;  %v3149_v51 = vld [vmem:[#allocation10 + $0x98] sm:$0xf0] }
  0x40   :  { %413 = vmatpush.bf16.msra.mxu1 %v2965_v46  ;;  %v4073_v46 = vld [vmem:[#allocation10 + $0x94] sm:$0xf0] }
  0x41   :  { %440 = vmatpush.bf16.msrb.mxu3 %v2957_v52  ;;  %708 = vmatpush.bf16.msrb.mxu0 %v3172_v13  ;;  %v3148_v49 = vor.u32 %v4073_v46, %v3147_v33  ;;  %v3152_v52 = vor.u32 %v4071_v50, %v3149_v51  ;;  %v3108_v13 = vor.u32 %v4064_v11, %v3107_v10  ;;  %v4054_v33 = vld [vmem:[#allocation10 + $0x4] sm:$0xf]  ;;  %v3077_v46 = vld [vmem:[#allocation10 + $0x10] sm:$0xf0]  ;;  %v4055_v50 = vld [vmem:[#allocation10 + $0xc] sm:$0xf] }
  0x42   :  { %428 = vmatmul.bf16.vlgmr.msrb.gmra.mxu2 %v201_v43 }
  0x43   :  { %733 = vmatpush.bf16.msra.mxu2 %v3196_v2  ;;  %v3133_v2 = vld [vmem:[#allocation10 + $0x78] sm:$0xf0] }
  0x44   :  { %414 = vmatpush.bf16.msra.mxu1 %v2949_v53  ;;  %441 = vmatmul.bf16.vlgmr.msrb.gmra.mxu3 %v201_v43  ;;  %v113_v53 = vperm.slane %v4655_v5, 2 }
  0x45   :  { %746 = vmatpush.bf16.msra.mxu3 %v3200_v8  ;;  %709 = vmatpush.bf16.msrb.mxu0 %v3156_v26  ;;  %v3091_v26 = vld [vmem:[#allocation10 + $0x20] sm:$0xf] }
  0x47   :  { %415 = vmatmul.bf16.vlgmr.msra.gmra.mxu1 %v201_v43  ;;  %734 = vmatpush.bf16.msra.mxu2 %v3180_v19  ;;  %v4070_v43 = vld [vmem:[#allocation10 + $0x84] sm:$0xf] }
  0x48   :  { %720 = vmatpush.bf16.msrb.mxu1 %v3192_v1  ;;  %v3144_v48 = vor.u32 %v4070_v43, %v3141_v45  ;;  %v4067_v1 = vld [vmem:[#allocation10 + $0x6c] sm:$0xf]  ;;  %v3075_v43 = vld [vmem:[#allocation10] sm:$0xf] }
  0x49   :  { %747 = vmatpush.bf16.msra.mxu3 %v3184_v22  ;;  %710 = vmatpush.bf16.msrb.mxu0 %v3140_v44  ;;  %v3136_v8 = vor.u32 %v4067_v1, %v3133_v2  ;;  %v3117_v22 = vld [vmem:[#allocation10 + $0x58] sm:$0xf0]  ;;  %v4056_v44 = vld [vmem:[#allocation10 + $0xc] sm:$0xf0] }
  0x4a   :  { %v3120_v25 = vor.u32 %v4063_v21, %v3117_v22  ;;  %v3076_v45 = vor.u32 %v4056_v44, %v3075_v43  ;;  %v4116_v43 = vld [vmem:[#allocation10 + $0xec] sm:$0xf0]  ;;  %v4114_v44 = vld [vmem:[#allocation10 + $0xe4] sm:$0xf] }
  0x4b   :  { %735 = vmatpush.bf16.msra.mxu2 %v3164_v32  ;;  %v3093_v32 = vld [vmem:[#allocation10 + $0x30] sm:$0xf0] }
  0x4c   :  { %721 = vmatpush.bf16.msrb.mxu1 %v3176_v18 }
  0x4d   :  { %748 = vmatpush.bf16.msra.mxu3 %v3168_v39  ;;  %v3100_v39 = vor.u32 %v4061_v35, %v3099_v34 }
  0x4f   :  { %736 = vmatpush.bf16.msra.mxu2 %v3148_v49  ;;  %v4057_v49 = vld [vmem:[#allocation10 + $0x14] sm:$0xf0] }
  0x50   :  { %722 = vmatpush.bf16.msrb.mxu1 %v3160_v31  ;;  %v3092_v31 = vor.u32 %v4060_v27, %v3091_v26 }
  0x51   :  { %749 = vmatpush.bf16.msra.mxu3 %v3152_v52 }
  0x54   :  { %723 = vmatpush.bf16.msrb.mxu1 %v3144_v48  ;;  %v3083_v48 = vld [vmem:[#allocation10 + $0x8] sm:$0xf] }
  0x55   :  { %750 = vmatpush.bf16.msra.mxu3 %v3136_v8  ;;  %v3084_v52 = vor.u32 %v4057_v49, %v3083_v48 }
  0x58   :  { %724 = vmatpush.bf16.msrb.mxu1 %v3128_v63 }
  0x59   :  { %751 = vmatpush.bf16.msra.mxu3 %v3120_v25 }
  0xa0   :  { %v158_v54 = vpop.f32.mrf.mxu1 }
  0xa1   :  { %v4660_v30 = vadd.f32 %v158_v54, %v111_v17  ;;  %v3123_v54 = vld [vmem:[#allocation10 + $0x60] sm:$0xf] }
  0xa5   :  { %v4651_v56 = vpop.f32.mrf.mxu2 }
  0xa6   :  { %v4670_v17 = vadd.f32 %v4651_v56, %v113_v53  ;;  %v4058_v56 = vld [vmem:[#allocation10 + $0x24] sm:$0xf]  ;;  %v3085_v53 = vld [vmem:[#allocation10 + $0x18] sm:$0xf0] }
  0xa7   :  { %v3088_v60 = vor.u32 %v4055_v50, %v3085_v53  ;;  %v4115_v50 = vld [vmem:[#allocation10 + $0xec] sm:$0xf]  ;;  %v3302_v53 = vld [vmem:[#allocation10 + $0xc0] sm:$0xf] }
  0xa8   :  { %v160_v55 = vpop.f32.mrf.mxu1  ;;  %v4653_v57 = vpop.f32.mrf.mxu3 }
  0xa9   :  { %v4068_v55 = vld [vmem:[#allocation10 + $0x6c] sm:$0xf0] }
  0xaa   :  { %v3124_v58 = vor.u32 %v4068_v55, %v3123_v54  ;;  %v114_v55 = vperm.slane %v4655_v5, 3 }
  0xac   :  { %711 = vmatpush.bf16.msrb.mxu0 %v3124_v58  ;;  %v4679_v2 = vadd.f32 %v4653_v57, %v114_v55  ;;  %v4110_v55 = vld [vmem:[#allocation10 + $0xc4] sm:$0xf]  ;;  %v4107_v57 = vld [vmem:[#allocation10 + $0xac] sm:$0xf] }
  0xad   :  { %v186_v7 = vpop.f32.mrf.mxu2 }
  0xae   :  { %v3132_v7 = vor.u32 %v4069_v0, %v3131_v61 }
  0xb0   :  { %v4657_v6 = vpop.f32.mrf.mxu1  ;;  %v199_v9 = vpop.f32.mrf.mxu3  ;;  %737 = vmatpush.bf16.msra.mxu2 %v3132_v7  ;;  %712 = vmatpush.bf16.msrb.mxu0 %v3108_v13 }
  0xb1   :  { %v4666_v62 = vadd.f32 %v4657_v6, %v112_v36  ;;  %v3109_v6 = vld [vmem:[#allocation10 + $0x50] sm:$0xf0]  ;;  %v4059_v36 = vld [vmem:[#allocation10 + $0x2c] sm:$0xf] }
  0xb2   :  { %v3112_v19 = vor.u32 %v4062_v12, %v3109_v6 }
  0xb4   :  { %725 = vmatpush.bf16.msrb.mxu1 %v3112_v19  ;;  %738 = vmatpush.bf16.msra.mxu2 %v3116_v20 }
  0xb5   :  { %713 = vmatpush.bf16.msrb.mxu0 %v3092_v31 }
  0xb8   :  { %v173_v37 = vpop.f32.mrf.mxu1  ;;  %739 = vmatpush.bf16.msra.mxu2 %v3100_v39 }
  0xb9   :  { %v403_v38 = vpop.f32.mrf.mxu0  ;;  %714 = vmatpush.bf16.msrb.mxu0 %v3076_v45 }
  0xba   :  { %v446_v40 = vadd.f32 %v403_v38, %v4660_v30  ;;  %v3096_v38 = vor.u32 %v4058_v56, %v3093_v32 }
  0xbc   :  { %v3070_v47 = vmul.f32 -1.442695, %v446_v40  ;;  %v3101_v40 = vld [vmem:[#allocation10 + $0x38] sm:$0xf0]  ;;  %726 = vmatpush.bf16.msrb.mxu1 %v3096_v38  ;;  %740 = vmatpush.bf16.msra.mxu2 %v3084_v52 }
  0xbd   :  { %v3104_v42 = vor.u32 %v4059_v36, %v3101_v40 }
  0xbe   :  { %4299 = vpow2.f32 %v3070_v47  ;;  %v3080_v47 = vor.u32 %v4054_v33, %v3077_v46  ;;  %v3320_v33 = vld [vmem:[#allocation10 + $0xf0] sm:$0xf0]  ;;  %v3326_v46 = vld [vmem:[#allocation10 + $0xe8] sm:$0xf] }
  0xbf   :  { %752 = vmatpush.bf16.msra.mxu3 %v3104_v42  ;;  %v3318_v42 = vld [vmem:[#allocation10 + $0xe0] sm:$0xf]  ;;  %v3323_v48 = vor.u32 %v4114_v44, %v3320_v33  ;;  %v4101_v44 = vld [vmem:[#allocation10 + $0x74] sm:$0xf0]  ;;  %v3264_v33 = vld [vmem:[#allocation10 + $0x78] sm:$0xf0] }
  0xc0   :  { %727 = vmatpush.bf16.msrb.mxu1 %v3080_v47  ;;  %v3319_v45 = vor.u32 %v4116_v43, %v3318_v42  ;;  %v4117_v47 = vld [vmem:[#allocation10 + $0xf4] sm:$0xf0] }
  0xc1   :  { %v405_v3 = vpop.f32.mrf.mxu0  ;;  %v3327_v49 = vor.u32 %v4117_v47, %v3326_v46 }
  0xc2   :  { %1039 = vmatpush.bf16.msra.mxu0 %v3319_v45  ;;  %v4099_v45 = vld [vmem:[#allocation10 + $0x6c] sm:$0xf] }
  0xc3   :  { %753 = vmatpush.bf16.msra.mxu3 %v3088_v60  ;;  %1065 = vmatpush.bf16.msrb.mxu2 %v3327_v49  ;;  %v3310_v60 = vld [vmem:[#allocation10 + $0xc8] sm:$0xf]  ;;  %v3267_v47 = vor.u32 %v4099_v45, %v3264_v33 }
  0xc4   :  { %v416_v4 = vpop.f32.mrf.mxu1  ;;  %v4300_v16 = vpop.eup %4299  ;;  %1052 = vmatpush.bf16.msra.mxu1 %v3323_v48 }
  0xc5   :  { %v447_v9 = vadd.f32 %v416_v4, %v4666_v62  ;;  %v4672_v23 = vadd.f32 1.0, %v4300_v16  ;;  %v429_v24 = vpop.f32.mrf.mxu2 }
  0xc6   :  { %v448_v28 = vadd.f32 %v429_v24, %v4670_v17 }
  0xc7   :  { %v3071_v18 = vmul.f32 -1.442695, %v447_v9  ;;  %v442_v29 = vpop.f32.mrf.mxu3  ;;  %v473_v10 = vand.u32 2147483648, %v4672_v23  ;;  %vm467_vm4 = vweird.f32 %v4672_v23  ;;  %v471_v12 = vand.u32 2147483647, %v4672_v23 }
  0xc8   :  { %v3072_v37 = vmul.f32 -1.442695, %v448_v28  ;;  %v449_v7 = vadd.f32 %v442_v29, %v4679_v2 }
  0xc9   :  { %4301 = vpow2.f32 %v3071_v18  ;;  %v474_v19 = vor.u32 1.1754944e-38, %v473_v10  ;;  %vm472_vm8 = vcmp.eq.f32.partialorder %v471_v12, 8.507059e+37  ;;  %v3288_v10 = vld [vmem:[#allocation10 + $0xb0] sm:$0xf0]  ;;  %v4109_v12 = vld [vmem:[#allocation10 + $0xb4] sm:$0xf0] }
  0xca   :  { %4303 = vrcp.f32 %v4672_v23 }
  0xcb   :  { %4305 = vpow2.f32 %v3072_v37 }
  0xcc   :  { %v418_v41 = vpop.f32.mrf.mxu1 }
  0xcd   :  { %v431_v59 = vpop.f32.mrf.mxu2 }
  0xce   :  { %v3304_v59 = vld [vmem:[#allocation10 + $0xd0] sm:$0xf0] }
  0xcf   :  { %v4302_v51 = vpop.eup %4301  ;;  %v444_v63 = vpop.f32.mrf.mxu3 }
  0xd0   :  { %v4304_v54 = vpop.eup %4303  ;;  %v460_v58 = vadd.f32 1.0, %v4302_v51  ;;  %v3328_v51 = vld [vmem:[#allocation10 + $0xf8] sm:$0xf0]  ;;  %v3307_v63 = vor.u32 %v4110_v55, %v3304_v59 }
  0xd1   :  { %v463_v61 = vmul.f32 %v4304_v54, %v4672_v23  ;;  %v4306_v0 = vpop.eup %4305  ;;  %vm468_vm3 = vweird.f32 %v4304_v54  ;;  %v104_v23 = vld [vmem:[#allocation3] sm:$0x1]  ;;  %v3331_v52 = vor.u32 %v4115_v50, %v3328_v51  ;;  %v3238_v50 = vld [vmem:[#allocation10 + $0x40] sm:$0xf]  ;;  %v4096_v51 = vld [vmem:[#allocation10 + $0x4c] sm:$0xf0] }
  0xd2   :  { %4307 = vrcp.f32 %v460_v58  ;;  %v461_v3 = vadd.f32 1.0, %v4306_v0  ;;  %v488_v6 = vand.u32 2147483648, %v460_v58  ;;  %vm4685_vm5 = vmor %vm467_vm4, %vm468_vm3  ;;  %v486_v14 = vand.u32 2147483647, %v460_v58  ;;  %1053 = vmatpush.bf16.msra.mxu1 %v3307_v63  ;;  %v4095_v63 = vld [vmem:[#allocation10 + $0x4c] sm:$0xf] }
  0xd3   :  { %v464_v1 = vsub.f32 1.0, %v463_v61  ;;  %vm482_vm7 = vweird.f32 %v460_v58  ;;  %1078 = vmatpush.bf16.msrb.mxu3 %v3331_v52  ;;  %v4113_v61 = vld [vmem:[#allocation10 + $0xd4] sm:$0xf0]  ;;  %v4094_v52 = vld [vmem:[#allocation10 + $0x44] sm:$0xf] }
  0xd4   :  { %4309 = vrcp.f32 %v461_v3  ;;  %v489_v22 = vor.u32 1.1754944e-38, %v488_v6  ;;  %vm487_vm10 = vcmp.eq.f32.partialorder %v486_v14, 8.507059e+37  ;;  %v503_v34 = vand.u32 2147483648, %v461_v3  ;;  %v3296_v14 = vld [vmem:[#allocation10 + $0xb8] sm:$0xf0] }
  0xd5   :  { %v465_v4 = vmul.f32 %v4304_v54, %v464_v1  ;;  %4311 = vtanh.f32 %v449_v7  ;;  %vm497_vm12 = vweird.f32 %v461_v3  ;;  %v501_v35 = vand.u32 2147483647, %v461_v3  ;;  %v4111_v1 = vld [vmem:[#allocation10 + $0xcc] sm:$0xf]  ;;  %v4108_v7 = vld [vmem:[#allocation10 + $0xac] sm:$0xf0] }
  0xd6   :  { %v504_v37 = vor.u32 1.1754944e-38, %v503_v34  ;;  %v3311_v0 = vor.u32 %v4113_v61, %v3310_v60  ;;  %v3246_v60 = vld [vmem:[#allocation10 + $0x48] sm:$0xf]  ;;  %v4097_v61 = vld [vmem:[#allocation10 + $0x54] sm:$0xf0] }
  0xd7   :  { %v466_v9 = vadd.f32 %v4304_v54, %v465_v4  ;;  %vm502_vm14 = vcmp.eq.f32.partialorder %v501_v35, 8.507059e+37  ;;  %v3254_v35 = vld [vmem:[#allocation10 + $0x60] sm:$0xf] }
  0xd8   :  { %v4308_v5 = vpop.eup %4307  ;;  %1066 = vmatpush.bf16.msrb.mxu2 %v3311_v0 }
  0xd9   :  { %v478_v8 = vmul.f32 %v4308_v5, %v460_v58  ;;  %vm483_vm6 = vweird.f32 %v4308_v5  ;;  %v470_v18 = vsel %vm4685_vm5, %v4304_v54, %v466_v9  ;;  %v4112_v54 = vld [vmem:[#allocation10 + $0xcc] sm:$0xf0] }
  0xda   :  { %v4310_v13 = vpop.eup %4309  ;;  %vm484_vm9 = vmor %vm482_vm7, %vm483_vm6  ;;  %v475_v24 = vsel %vm472_vm8, %v474_v19, %v470_v18  ;;  %v3303_v58 = vor.u32 %v4112_v54, %v3302_v53  ;;  %v4104_v18 = vld [vmem:[#allocation10 + $0x8c] sm:$0xf0]  ;;  %v4102_v19 = vld [vmem:[#allocation10 + $0x84] sm:$0xf] }
  0xdb   :  { %v479_v11 = vsub.f32 1.0, %v478_v8  ;;  %v493_v16 = vmul.f32 %v4310_v13, %v461_v3  ;;  %v4312_v26 = vpop.eup %4311  ;;  %vm498_vm11 = vweird.f32 %v4310_v13  ;;  %v3312_v3 = vld [vmem:[#allocation10 + $0xd8] sm:$0xf0]  ;;  %v4106_v8 = vld [vmem:[#allocation10 + $0xa4] sm:$0xf] }
  0xdc   :  { %v509_v31 = vmul.f32 %v4312_v26, %v475_v24  ;;  %vm499_vm13 = vmor %vm497_vm12, %vm498_vm11  ;;  %1040 = vmatpush.bf16.msra.mxu0 %v3303_v58  ;;  %v3315_v4 = vor.u32 %v4111_v1, %v3312_v3  ;;  %v4103_v26 = vld [vmem:[#allocation10 + $0x8c] sm:$0xf]  ;;  %v3240_v53 = vld [vmem:[#allocation10 + $0x50] sm:$0xf0]  ;;  %v3239_v58 = vor.u32 %v4096_v51, %v3238_v50 }
  0xdd   :  { %v480_v15 = vmul.f32 %v4308_v5, %v479_v11  ;;  %v494_v20 = vsub.f32 1.0, %v493_v16  ;;  %v3294_v11 = vld [vmem:[#allocation10 + $0xa8] sm:$0xf]  ;;  %v3270_v16 = vld [vmem:[#allocation10 + $0x80] sm:$0xf]  ;;  %v3243_v59 = vor.u32 %v4094_v52, %v3240_v53 }
  0xde   :  { %1079 = vmatpush.bf16.msrb.mxu3 %v3315_v4  ;;  %v3295_v6 = vor.u32 %v4109_v12, %v3294_v11  ;;  %v3247_v4 = vor.u32 %v4097_v61, %v3246_v60  ;;  %v3224_v11 = vld [vmem:[#allocation10 + $0x30] sm:$0xf0] }
  0xdf   :  { %v481_v21 = vadd.f32 %v4308_v5, %v480_v15  ;;  %v495_v27 = vmul.f32 %v4310_v13, %v494_v20  ;;  %v3299_v15 = vor.u32 %v4107_v57, %v3296_v14  ;;  %v3271_v20 = vor.u32 %v4104_v18, %v3270_v16  ;;  %v3230_v57 = vld [vmem:[#allocation10 + $0x28] sm:$0xf]  ;;  %v4093_v14 = vld [vmem:[#allocation10 + $0x34] sm:$0xf0]  ;;  %v3232_v18 = vld [vmem:[#allocation10 + $0x38] sm:$0xf0] }
  0xe0   :  { %1067 = vmatpush.bf16.msrb.mxu2 %v3295_v6  ;;  %v3231_v16 = vor.u32 %v4093_v14, %v3230_v57 }
  0xe1   :  { %v485_v25 = vsel %vm484_vm9, %v4308_v5, %v481_v21  ;;  %v496_v32 = vadd.f32 %v4310_v13, %v495_v27  ;;  %v3286_v5 = vld [vmem:[#allocation10 + $0xa0] sm:$0xf]  ;;  %v3272_v21 = vld [vmem:[#allocation10 + $0x90] sm:$0xf0]  ;;  %v3280_v27 = vld [vmem:[#allocation10 + $0x98] sm:$0xf0] }
  0xe2   :  { %v490_v28 = vsel %vm487_vm10, %v489_v22, %v485_v25  ;;  %v3287_v9 = vor.u32 %v4108_v7, %v3286_v5  ;;  %1080 = vmatpush.bf16.msrb.mxu3 %v3299_v15  ;;  %v3278_v22 = vld [vmem:[#allocation10 + $0x88] sm:$0xf]  ;;  %v3275_v24 = vor.u32 %v4102_v19, %v3272_v21  ;;  %v3248_v5 = vld [vmem:[#allocation10 + $0x58] sm:$0xf0]  ;;  %v3222_v7 = vld [vmem:[#allocation10 + $0x20] sm:$0xf] }
  0xe3   :  { %v508_v29 = vmul.f32 %v490_v28, %v104_v23  ;;  %v500_v36 = vsel %vm499_vm13, %v4310_v13, %v496_v32  ;;  %v3291_v13 = vor.u32 %v4106_v8, %v3288_v10  ;;  %v4105_v23 = vld [vmem:[#allocation10 + $0x94] sm:$0xf0]  ;;  %v3251_v8 = vor.u32 %v4095_v63, %v3248_v5  ;;  %v4090_v10 = vld [vmem:[#allocation10 + $0x24] sm:$0xf]  ;;  %v4091_v15 = vld [vmem:[#allocation10 + $0x2c] sm:$0xf] }
  0xe4   :  { %v505_v39 = vsel %vm502_vm14, %v504_v37, %v500_v36  ;;  %1041 = vmatpush.bf16.msra.mxu0 %v3287_v9  ;;  %v3279_v25 = vor.u32 %v4105_v23, %v3278_v22  ;;  %v4100_v36 = vld [vmem:[#allocation10 + $0x6c] sm:$0xf0]  ;;  %v3227_v6 = vor.u32 %v4090_v10, %v3224_v11  ;;  %v3206_v19 = vld [vmem:[#allocation10] sm:$0xf]  ;;  %v3235_v22 = vor.u32 %v4091_v15, %v3232_v18  ;;  %v4086_v23 = vld [vmem:[#allocation10 + $0x4] sm:$0xf] }
  0xe5   :  { %v4691_v56 = vadd.f32 %v509_v31, %v508_v29  ;;  %1054 = vmatpush.bf16.msra.mxu1 %v3291_v13  ;;  %v3283_v31 = vor.u32 %v4103_v26, %v3280_v27  ;;  %v3255_v37 = vor.u32 %v4100_v36, %v3254_v35  ;;  %v4092_v9 = vld [vmem:[#allocation10 + $0x2c] sm:$0xf0]  ;;  %v3216_v36 = vld [vmem:[#allocation10 + $0x18] sm:$0xf0] }
  0xe6   :  { %1068 = vmatpush.bf16.msrb.mxu2 %v3279_v25  ;;  %v3223_v13 = vor.u32 %v4092_v9, %v3222_v7 }
  0xe7   :  { %4313 = vtanh.f32 %v4691_v56  ;;  %1081 = vmatpush.bf16.msrb.mxu3 %v3283_v31  ;;  %v4087_v31 = vld [vmem:[#allocation10 + $0xc] sm:$0xf] }
  0xe8   :  { %1042 = vmatpush.bf16.msra.mxu0 %v3271_v20  ;;  %v4088_v20 = vld [vmem:[#allocation10 + $0xc] sm:$0xf0] }
  0xe9   :  { %1055 = vmatpush.bf16.msra.mxu1 %v3275_v24  ;;  %v3208_v24 = vld [vmem:[#allocation10 + $0x10] sm:$0xf0]  ;;  %v3207_v26 = vor.u32 %v4088_v20, %v3206_v19 }
  0xea   :  { %v3211_v27 = vor.u32 %v4086_v23, %v3208_v24  ;;  %v4148_v23 = vld [vmem:[#allocation10 + $0xec] sm:$0xf0]  ;;  %v4146_v24 = vld [vmem:[#allocation10 + $0xe4] sm:$0xf] }
  0xeb   :  { %1082 = vmatpush.bf16.msrb.mxu3 %v3267_v47 }
  0xec   :  { %1043 = vmatpush.bf16.msra.mxu0 %v3255_v37 }
  0xed   :  { %v4314_v38 = vpop.eup %4313 }
  0xee   :  { %v512_v40 = vmul.f32 %v4314_v38, %v505_v39  ;;  %v4098_v38 = vld [vmem:[#allocation10 + $0x64] sm:$0xf]  ;;  %v3256_v39 = vld [vmem:[#allocation10 + $0x70] sm:$0xf0] }
  0xef   :  { %v3259_v43 = vor.u32 %v4098_v38, %v3256_v39  ;;  %1083 = vmatpush.bf16.msrb.mxu3 %v3251_v8 }
  0xf0   :  { %513 = vst [vmem:[#allocation4] sm:$0x1] %v512_v40  ;;  %v514_v41 = vpack.c.bf16 %v512_v40, %v512_v40  ;;  %v3262_v40 = vld [vmem:[#allocation10 + $0x68] sm:$0xf]  ;;  %1044 = vmatpush.bf16.msra.mxu0 %v3239_v58 }
  0xf1   :  { %v3263_v46 = vor.u32 %v4101_v44, %v3262_v40  ;;  %1056 = vmatpush.bf16.msra.mxu1 %v3259_v43  ;;  %v3219_v40 = vor.u32 %v4087_v31, %v3216_v36  ;;  %v3433_v36 = vld [vmem:[#allocation10 + $0xc0] sm:$0xf] }
  0xf2   :  { %715 = vmatmul.bf16.vlgmr.msrb.gmra.mxu0 %v514_v41  ;;  %728 = vmatmul.bf16.vlgmr.msrb.gmra.mxu1 %v514_v41 }
  0xf3   :  { %741 = vmatmul.bf16.vlgmr.msra.gmra.mxu2 %v514_v41  ;;  %754 = vmatmul.bf16.vlgmr.msra.gmra.mxu3 %v514_v41 }
  0xf4   :  { %1069 = vmatpush.bf16.msrb.mxu2 %v3263_v46  ;;  %1045 = vmatpush.bf16.msra.mxu0 %v3223_v13 }
  0xf5   :  { %1057 = vmatpush.bf16.msra.mxu1 %v3243_v59  ;;  %1084 = vmatpush.bf16.msrb.mxu3 %v3235_v22  ;;  %v3449_v22 = vld [vmem:[#allocation10 + $0xe0] sm:$0xf] }
  0xf8   :  { %1070 = vmatpush.bf16.msrb.mxu2 %v3247_v4  ;;  %1046 = vmatpush.bf16.msra.mxu0 %v3207_v26  ;;  %v3451_v26 = vld [vmem:[#allocation10 + $0xf0] sm:$0xf0] }
  0xf9   :  { %1058 = vmatpush.bf16.msra.mxu1 %v3227_v6  ;;  %1085 = vmatpush.bf16.msrb.mxu3 %v3219_v40  ;;  %v3435_v40 = vld [vmem:[#allocation10 + $0xd0] sm:$0xf0] }
  0xfc   :  { %1071 = vmatpush.bf16.msrb.mxu2 %v3231_v16 }
  0xfd   :  { %1059 = vmatpush.bf16.msra.mxu1 %v3211_v27  ;;  %v3457_v27 = vld [vmem:[#allocation10 + $0xe8] sm:$0xf] }
 0x16f   :  { %v716_v28 = vpop.f32.mrf.mxu0  ;;  %v729_v29 = vpop.f32.mrf.mxu1 }
 0x170   :  { %v763_v32 = vrot.slane %v716_v28, 7  ;;  %v764_v34 = vrot.slane %v729_v29, 7  ;;  %v3214_v28 = vld [vmem:[#allocation10 + $0x8] sm:$0xf]  ;;  %v4089_v29 = vld [vmem:[#allocation10 + $0x14] sm:$0xf0] }
 0x171   :  { %v3215_v35 = vor.u32 %v4089_v29, %v3214_v28  ;;  %v4149_v28 = vld [vmem:[#allocation10 + $0xf4] sm:$0xf0]  ;;  %v3454_v29 = vor.u32 %v4146_v24, %v3451_v26  ;;  %v3395_v26 = vld [vmem:[#allocation10 + $0x78] sm:$0xf0] }
 0x172   :  { %v771_v41 = vadd.f32 %v763_v32, %v4660_v30  ;;  %v772_v42 = vadd.f32 %v764_v34, %v4666_v62  ;;  %v3458_v31 = vor.u32 %v4149_v28, %v3457_v27  ;;  %v4133_v24 = vld [vmem:[#allocation10 + $0x74] sm:$0xf0] }
 0x173   :  { %1072 = vmatpush.bf16.msrb.mxu2 %v3215_v35  ;;  %1383 = vmatpush.bf16.msrb.mxu1 %v3454_v29 }
 0x174   :  { %v3201_v48 = vmul.f32 -1.442695, %v771_v41  ;;  %v3202_v49 = vmul.f32 -1.442695, %v772_v42 }
 0x176   :  { %4315 = vpow2.f32 %v3201_v48  ;;  %v742_v54 = vpop.f32.mrf.mxu2  ;;  %v4696_v55 = vpop.f32.mrf.mxu3 }
 0x177   :  { %4317 = vpow2.f32 %v3202_v49  ;;  %v765_v0 = vrot.slane %v742_v54, 7  ;;  %v718_v1 = vpop.f32.mrf.mxu0  ;;  %v731_v3 = vpop.f32.mrf.mxu1  ;;  %v766_v41 = vrot.slane %v4696_v55, 7  ;;  %1396 = vmatpush.bf16.msra.mxu2 %v3458_v31 }
 0x179   :  { %v773_v12 = vadd.f32 %v765_v0, %v4670_v17  ;;  %v774_v45 = vadd.f32 %v766_v41, %v4679_v2  ;;  %v834_v0 = vrot.slane %v4691_v56, 7  ;;  %v3441_v41 = vld [vmem:[#allocation10 + $0xc8] sm:$0xf] }
 0x17b   :  { %v3203_v21 = vmul.f32 -1.442695, %v773_v12 }
 0x17c   :  { %v4316_v25 = vpop.eup %4315 }
 0x17d   :  { %v4318_v32 = vpop.eup %4317  ;;  %v784_v34 = vadd.f32 1.0, %v4316_v25  ;;  %4319 = vpow2.f32 %v3203_v21  ;;  %v3450_v25 = vor.u32 %v4148_v23, %v3449_v22 }
 0x17e   :  { %v785_v37 = vadd.f32 1.0, %v4318_v32  ;;  %v744_v38 = vpop.f32.mrf.mxu2  ;;  %v757_v39 = vpop.f32.mrf.mxu3  ;;  %v4147_v32 = vld [vmem:[#allocation10 + $0xec] sm:$0xf] }
 0x17f   :  { %4321 = vrcp.f32 %v784_v34  ;;  %v798_v50 = vand.u32 2147483648, %v784_v34  ;;  %v796_v53 = vand.u32 2147483647, %v784_v34  ;;  %vm792_vm1 = vweird.f32 %v784_v34  ;;  %1370 = vmatpush.bf16.msrb.mxu0 %v3450_v25  ;;  %v4142_v38 = vld [vmem:[#allocation10 + $0xc4] sm:$0xf] }
 0x180   :  { %4323 = vrcp.f32 %v785_v37  ;;  %v813_v51 = vand.u32 2147483648, %v785_v37  ;;  %v811_v55 = vand.u32 2147483647, %v785_v37  ;;  %vm807_vm2 = vweird.f32 %v785_v37  ;;  %v4131_v25 = vld [vmem:[#allocation10 + $0x6c] sm:$0xf] }
 0x181   :  { %v799_v61 = vor.u32 1.1754944e-38, %v798_v50  ;;  %vm797_vm5 = vcmp.eq.f32.partialorder %v796_v53, 8.507059e+37  ;;  %v4141_v53 = vld [vmem:[#allocation10 + $0xb4] sm:$0xf0]  ;;  %v3398_v28 = vor.u32 %v4131_v25, %v3395_v26 }
 0x182   :  { %v814_v1 = vor.u32 1.1754944e-38, %v813_v51  ;;  %vm812_vm6 = vcmp.eq.f32.partialorder %v811_v55, 8.507059e+37  ;;  %v3419_v51 = vld [vmem:[#allocation10 + $0xb0] sm:$0xf0] }
 0x183   :  { %v4320_v42 = vpop.eup %4319 }
 0x184   :  { %v786_v43 = vadd.f32 1.0, %v4320_v42  ;;  %v4145_v42 = vld [vmem:[#allocation10 + $0xd4] sm:$0xf0] }
 0x185   :  { %v4322_v44 = vpop.eup %4321 }
 0x186   :  { %v4324_v33 = vpop.eup %4323  ;;  %v788_v46 = vmul.f32 %v4322_v44, %v784_v34  ;;  %4325 = vrcp.f32 %v786_v43  ;;  %vm793_vm15 = vweird.f32 %v4322_v44  ;;  %v828_v56 = vand.u32 2147483648, %v786_v43  ;;  %v3459_v34 = vld [vmem:[#allocation10 + $0xf8] sm:$0xf0] }
 0x187   :  { %v803_v47 = vmul.f32 %v4324_v33, %v785_v37  ;;  %4327 = vtanh.f32 %v774_v45  ;;  %vm808_vm0 = vweird.f32 %v4324_v33  ;;  %vm794_vm3 = vmor %vm792_vm1, %vm793_vm15  ;;  %vm822_vm8 = vweird.f32 %v786_v43  ;;  %v4144_v37 = vld [vmem:[#allocation10 + $0xcc] sm:$0xf0]  ;;  %v4143_v45 = vld [vmem:[#allocation10 + $0xcc] sm:$0xf] }
 0x188   :  { %v789_v48 = vsub.f32 1.0, %v788_v46  ;;  %vm809_vm4 = vmor %vm807_vm2, %vm808_vm0  ;;  %v826_v57 = vand.u32 2147483647, %v786_v43  ;;  %v829_v15 = vor.u32 1.1754944e-38, %v828_v56  ;;  %v3462_v35 = vor.u32 %v4147_v32, %v3459_v34  ;;  %v3369_v32 = vld [vmem:[#allocation10 + $0x40] sm:$0xf] }
 0x189   :  { %v804_v49 = vsub.f32 1.0, %v803_v47  ;;  %v3434_v39 = vor.u32 %v4144_v37, %v3433_v36  ;;  %v3417_v47 = vld [vmem:[#allocation10 + $0xa0] sm:$0xf]  ;;  %v4128_v34 = vld [vmem:[#allocation10 + $0x4c] sm:$0xf0] }
 0x18a   :  { %v790_v52 = vmul.f32 %v4322_v44, %v789_v48  ;;  %vm827_vm10 = vcmp.eq.f32.partialorder %v826_v57, 8.507059e+37  ;;  %1409 = vmatpush.bf16.msra.mxu3 %v3462_v35  ;;  %v4140_v48 = vld [vmem:[#allocation10 + $0xac] sm:$0xf0]  ;;  %v4126_v35 = vld [vmem:[#allocation10 + $0x44] sm:$0xf] }
 0x18b   :  { %v805_v54 = vmul.f32 %v4324_v33, %v804_v49  ;;  %1371 = vmatpush.bf16.msrb.mxu0 %v3434_v39  ;;  %v4138_v49 = vld [vmem:[#allocation10 + $0xa4] sm:$0xf]  ;;  %v3418_v50 = vor.u32 %v4140_v48, %v3417_v47  ;;  %v3371_v36 = vld [vmem:[#allocation10 + $0x50] sm:$0xf0]  ;;  %v3370_v39 = vor.u32 %v4128_v34, %v3369_v32  ;;  %v3379_v47 = vld [vmem:[#allocation10 + $0x58] sm:$0xf0] }
 0x18c   :  { %v4326_v58 = vpop.eup %4325  ;;  %v791_v59 = vadd.f32 %v4322_v44, %v790_v52  ;;  %v3425_v52 = vld [vmem:[#allocation10 + $0xa8] sm:$0xf]  ;;  %v3353_v48 = vld [vmem:[#allocation10 + $0x20] sm:$0xf] }
 0x18d   :  { %v818_v60 = vmul.f32 %v4326_v58, %v786_v43  ;;  %v806_v63 = vadd.f32 %v4324_v33, %v805_v54  ;;  %v4328_v4 = vpop.eup %4327  ;;  %vm823_vm7 = vweird.f32 %v4326_v58  ;;  %v3438_v43 = vor.u32 %v4142_v38, %v3435_v40 }
 0x18e   :  { %v795_v3 = vsel %vm794_vm3, %v4322_v44, %v791_v59  ;;  %vm824_vm9 = vmor %vm822_vm8, %vm823_vm7  ;;  %v3442_v44 = vor.u32 %v4145_v42, %v3441_v41  ;;  %v3422_v54 = vor.u32 %v4138_v49, %v3419_v51  ;;  %v3426_v55 = vor.u32 %v4141_v53, %v3425_v52  ;;  %v3427_v59 = vld [vmem:[#allocation10 + $0xb8] sm:$0xf0]  ;;  %v3377_v41 = vld [vmem:[#allocation10 + $0x48] sm:$0xf] }
 0x18f   :  { %v819_v5 = vsub.f32 1.0, %v818_v60  ;;  %v800_v7 = vsel %vm797_vm5, %v799_v61, %v795_v3  ;;  %v810_v8 = vsel %vm809_vm4, %v4324_v33, %v806_v63  ;;  %v3443_v33 = vld [vmem:[#allocation10 + $0xd8] sm:$0xf0]  ;;  %1384 = vmatpush.bf16.msrb.mxu1 %v3438_v43  ;;  %1372 = vmatpush.bf16.msrb.mxu0 %v3418_v50  ;;  %v3401_v61 = vld [vmem:[#allocation10 + $0x80] sm:$0xf]  ;;  %v3374_v40 = vor.u32 %v4126_v35, %v3371_v36 }
 0x190   :  { %v815_v9 = vsel %vm812_vm6, %v814_v1, %v810_v8  ;;  %v837_v10 = vmul.f32 %v4328_v4, %v800_v7  ;;  %v3446_v46 = vor.u32 %v4143_v45, %v3443_v33  ;;  %1397 = vmatpush.bf16.msra.mxu2 %v3442_v44  ;;  %v4136_v63 = vld [vmem:[#allocation10 + $0x8c] sm:$0xf0]  ;;  %v3403_v3 = vld [vmem:[#allocation10 + $0x90] sm:$0xf0]  ;;  %v3409_v4 = vld [vmem:[#allocation10 + $0x88] sm:$0xf] }
 0x191   :  { %v836_v11 = vmul.f32 %v834_v0, %v815_v9  ;;  %v820_v12 = vmul.f32 %v4326_v58, %v819_v5  ;;  %v4134_v0 = vld [vmem:[#allocation10 + $0x84] sm:$0xf]  ;;  %v3402_v1 = vor.u32 %v4136_v63, %v3401_v61  ;;  %v4137_v5 = vld [vmem:[#allocation10 + $0x94] sm:$0xf0]  ;;  %v4135_v9 = vld [vmem:[#allocation10 + $0x8c] sm:$0xf] }
 0x192   :  { %1410 = vmatpush.bf16.msra.mxu3 %v3446_v46  ;;  %v3406_v7 = vor.u32 %v4134_v0, %v3403_v3  ;;  %v3410_v8 = vor.u32 %v4137_v5, %v3409_v4  ;;  %v4129_v42 = vld [vmem:[#allocation10 + $0x54] sm:$0xf0]  ;;  %v4127_v43 = vld [vmem:[#allocation10 + $0x4c] sm:$0xf]  ;;  %v4124_v50 = vld [vmem:[#allocation10 + $0x2c] sm:$0xf0] }
 0x193   :  { %v4702_v13 = vadd.f32 %v837_v10, %v836_v11  ;;  %v821_v6 = vadd.f32 %v4326_v58, %v820_v12  ;;  %1385 = vmatpush.bf16.msrb.mxu1 %v3422_v54  ;;  %v3411_v10 = vld [vmem:[#allocation10 + $0x98] sm:$0xf0]  ;;  %1373 = vmatpush.bf16.msrb.mxu0 %v3402_v1  ;;  %v3378_v46 = vor.u32 %v4129_v42, %v3377_v41  ;;  %v4122_v51 = vld [vmem:[#allocation10 + $0x24] sm:$0xf]  ;;  %v3355_v52 = vld [vmem:[#allocation10 + $0x30] sm:$0xf0] }
 0x194   :  { %1398 = vmatpush.bf16.msra.mxu2 %v3426_v55  ;;  %v3382_v49 = vor.u32 %v4127_v43, %v3379_v47  ;;  %v3354_v54 = vor.u32 %v4124_v50, %v3353_v48  ;;  %v3358_v55 = vor.u32 %v4122_v51, %v3355_v52  ;;  %v3363_v63 = vld [vmem:[#allocation10 + $0x38] sm:$0xf0]  ;;  %v3337_v0 = vld [vmem:[#allocation10] sm:$0xf]  ;;  %v4120_v1 = vld [vmem:[#allocation10 + $0xc] sm:$0xf0] }
 0x195   :  { %4329 = vtanh.f32 %v4702_v13  ;;  %v825_v14 = vsel %vm824_vm9, %v4326_v58, %v821_v6  ;;  %v4139_v58 = vld [vmem:[#allocation10 + $0xac] sm:$0xf]  ;;  %v3414_v6 = vor.u32 %v4135_v9, %v3411_v10  ;;  %v4118_v5 = vld [vmem:[#allocation10 + $0x4] sm:$0xf]  ;;  %v3338_v9 = vor.u32 %v4120_v1, %v3337_v0 }
 0x196   :  { %v830_v18 = vsel %vm827_vm10, %v829_v15, %v825_v14  ;;  %v3430_v60 = vor.u32 %v4139_v58, %v3427_v59  ;;  %v3385_v14 = vld [vmem:[#allocation10 + $0x60] sm:$0xf]  ;;  %v4132_v15 = vld [vmem:[#allocation10 + $0x6c] sm:$0xf0]  ;;  %v3361_v58 = vld [vmem:[#allocation10 + $0x28] sm:$0xf] }
 0x197   :  { %1386 = vmatpush.bf16.msrb.mxu1 %v3406_v7  ;;  %v4125_v59 = vld [vmem:[#allocation10 + $0x34] sm:$0xf0]  ;;  %v3339_v7 = vld [vmem:[#allocation10 + $0x10] sm:$0xf0] }
 0x198   :  { %1411 = vmatpush.bf16.msra.mxu3 %v3430_v60  ;;  %1399 = vmatpush.bf16.msra.mxu2 %v3410_v8  ;;  %v4123_v60 = vld [vmem:[#allocation10 + $0x2c] sm:$0xf]  ;;  %v3362_v61 = vor.u32 %v4125_v59, %v3361_v58  ;;  %v3342_v10 = vor.u32 %v4118_v5, %v3339_v7  ;;  %v4180_v5 = vld [vmem:[#allocation10 + $0xec] sm:$0xf0]  ;;  %v4178_v7 = vld [vmem:[#allocation10 + $0xe4] sm:$0xf] }
 0x199   :  { %v3366_v4 = vor.u32 %v4123_v60, %v3363_v63 }
 0x19b   :  { %v4330_v16 = vpop.eup %4329 }
 0x19c   :  { %v840_v19 = vmul.f32 %v4330_v16, %v830_v18  ;;  %1412 = vmatpush.bf16.msra.mxu3 %v3414_v6  ;;  %v3386_v16 = vor.u32 %v4132_v15, %v3385_v14  ;;  %v4130_v18 = vld [vmem:[#allocation10 + $0x64] sm:$0xf]  ;;  %v4119_v6 = vld [vmem:[#allocation10 + $0xc] sm:$0xf]  ;;  %v3347_v15 = vld [vmem:[#allocation10 + $0x18] sm:$0xf0] }
 0x19e   :  { %841 = vst [vmem:[#allocation4] sm:$0x2] %v840_v19  ;;  %v842_v20 = vpack.c.bf16 %v840_v19, %v840_v19  ;;  %v3387_v19 = vld [vmem:[#allocation10 + $0x70] sm:$0xf0]  ;;  %1374 = vmatpush.bf16.msrb.mxu0 %v3386_v16 }
 0x19f   :  { %v3390_v23 = vor.u32 %v4130_v18, %v3387_v19 }
 0x1a0   :  { %v876_v21 = vshrl.u32 %v842_v20, 16  ;;  %v3393_v20 = vld [vmem:[#allocation10 + $0x68] sm:$0xf]  ;;  %1413 = vmatpush.bf16.msra.mxu3 %v3398_v28 }
 0x1a1   :  { %v3394_v27 = vor.u32 %v4133_v24, %v3393_v20  ;;  %1387 = vmatpush.bf16.msrb.mxu1 %v3390_v23  ;;  %v3350_v20 = vor.u32 %v4119_v6, %v3347_v15  ;;  %v3564_v15 = vld [vmem:[#allocation10 + $0xc0] sm:$0xf] }
 0x1a2   :  { %1047 = vmatmul.bf16.vlgmr.msra.gmra.mxu0 %v876_v21  ;;  %1060 = vmatmul.bf16.vlgmr.msra.gmra.mxu1 %v876_v21 }
 0x1a3   :  { %1073 = vmatmul.bf16.vlgmr.msrb.gmra.mxu2 %v876_v21  ;;  %1086 = vmatmul.bf16.vlgmr.msrb.gmra.mxu3 %v876_v21 }
 0x1a4   :  { %1400 = vmatpush.bf16.msra.mxu2 %v3394_v27  ;;  %1375 = vmatpush.bf16.msrb.mxu0 %v3370_v39 }
 0x1a5   :  { %1388 = vmatpush.bf16.msrb.mxu1 %v3374_v40  ;;  %1414 = vmatpush.bf16.msra.mxu3 %v3382_v49 }
 0x1a8   :  { %1401 = vmatpush.bf16.msra.mxu2 %v3378_v46  ;;  %1376 = vmatpush.bf16.msrb.mxu0 %v3354_v54 }
 0x1a9   :  { %1389 = vmatpush.bf16.msrb.mxu1 %v3358_v55  ;;  %1415 = vmatpush.bf16.msra.mxu3 %v3366_v4  ;;  %v3580_v4 = vld [vmem:[#allocation10 + $0xe0] sm:$0xf] }
 0x1ac   :  { %1402 = vmatpush.bf16.msra.mxu2 %v3362_v61  ;;  %1377 = vmatpush.bf16.msrb.mxu0 %v3338_v9  ;;  %v3582_v9 = vld [vmem:[#allocation10 + $0xf0] sm:$0xf0] }
 0x1ad   :  { %1390 = vmatpush.bf16.msrb.mxu1 %v3342_v10  ;;  %1416 = vmatpush.bf16.msra.mxu3 %v3350_v20  ;;  %v3588_v10 = vld [vmem:[#allocation10 + $0xe8] sm:$0xf]  ;;  %v3566_v20 = vld [vmem:[#allocation10 + $0xd0] sm:$0xf0] }
 0x21f   :  { %v1048_v11 = vpop.f32.mrf.mxu0  ;;  %v1061_v12 = vpop.f32.mrf.mxu1 }
 0x220   :  { %v1095_v56 = vrot.slane %v1048_v11, 6  ;;  %v1096_v57 = vrot.slane %v1061_v12, 6  ;;  %v3345_v11 = vld [vmem:[#allocation10 + $0x8] sm:$0xf]  ;;  %v4121_v12 = vld [vmem:[#allocation10 + $0x14] sm:$0xf0] }
 0x221   :  { %v3346_v14 = vor.u32 %v4121_v12, %v3345_v11  ;;  %v4181_v11 = vld [vmem:[#allocation10 + $0xf4] sm:$0xf0]  ;;  %v3585_v12 = vor.u32 %v4178_v7, %v3582_v9 }
 0x222   :  { %v1103_v21 = vadd.f32 %v1095_v56, %v4660_v30  ;;  %v1104_v22 = vadd.f32 %v1096_v57, %v4666_v62  ;;  %v3589_v6 = vor.u32 %v4181_v11, %v3588_v10  ;;  %v4163_v11 = vld [vmem:[#allocation10 + $0x6c] sm:$0xf] }
 0x223   :  { %1403 = vmatpush.bf16.msra.mxu2 %v3346_v14  ;;  %1716 = vmatpush.bf16.msra.mxu1 %v3585_v12  ;;  %v3526_v12 = vld [vmem:[#allocation10 + $0x78] sm:$0xf0] }
 0x224   :  { %v3332_v29 = vmul.f32 -1.442695, %v1103_v21  ;;  %v3333_v31 = vmul.f32 -1.442695, %v1104_v22 }
 0x226   :  { %4331 = vpow2.f32 %v3332_v29  ;;  %v1074_v37 = vpop.f32.mrf.mxu2  ;;  %v4707_v38 = vpop.f32.mrf.mxu3 }
 0x227   :  { %4333 = vpow2.f32 %v3333_v31  ;;  %v1097_v44 = vrot.slane %v1074_v37, 6  ;;  %v1050_v45 = vpop.f32.mrf.mxu0  ;;  %v1063_v33 = vpop.f32.mrf.mxu1  ;;  %v1098_v21 = vrot.slane %v4707_v38, 6  ;;  %1729 = vmatpush.bf16.msrb.mxu2 %v3589_v6  ;;  %v3500_v6 = vld [vmem:[#allocation10 + $0x40] sm:$0xf] }
 0x229   :  { %v1105_v53 = vadd.f32 %v1097_v44, %v4670_v17  ;;  %v1106_v25 = vadd.f32 %v1098_v21, %v4679_v2  ;;  %v1166_v44 = vrot.slane %v4702_v13, 7  ;;  %v3572_v21 = vld [vmem:[#allocation10 + $0xc8] sm:$0xf] }
 0x22b   :  { %v3334_v3 = vmul.f32 -1.442695, %v1105_v53 }
 0x22c   :  { %v4332_v8 = vpop.eup %4331 }
 0x22d   :  { %v4334_v56 = vpop.eup %4333  ;;  %v1116_v57 = vadd.f32 1.0, %v4332_v8  ;;  %4335 = vpow2.f32 %v3334_v3  ;;  %v3581_v8 = vor.u32 %v4180_v5, %v3580_v4  ;;  %v3524_v4 = vld [vmem:[#allocation10 + $0x68] sm:$0xf]  ;;  %v4165_v5 = vld [vmem:[#allocation10 + $0x74] sm:$0xf0] }
 0x22e   :  { %v1117_v16 = vadd.f32 1.0, %v4334_v56  ;;  %v1076_v18 = vpop.f32.mrf.mxu2  ;;  %v1089_v19 = vpop.f32.mrf.mxu3  ;;  %v4179_v56 = vld [vmem:[#allocation10 + $0xec] sm:$0xf]  ;;  %v3525_v10 = vor.u32 %v4165_v5, %v3524_v4 }
 0x22f   :  { %4337 = vrcp.f32 %v1116_v57  ;;  %v1130_v32 = vand.u32 2147483648, %v1116_v57  ;;  %v1128_v36 = vand.u32 2147483647, %v1116_v57  ;;  %vm1124_vm13 = vweird.f32 %v1116_v57  ;;  %1703 = vmatpush.bf16.msra.mxu0 %v3581_v8  ;;  %v4174_v18 = vld [vmem:[#allocation10 + $0xc4] sm:$0xf] }
 0x230   :  { %4339 = vrcp.f32 %v1117_v16  ;;  %v1145_v34 = vand.u32 2147483648, %v1117_v16  ;;  %v1143_v38 = vand.u32 2147483647, %v1117_v16  ;;  %vm1139_vm14 = vweird.f32 %v1117_v16 }
 0x231   :  { %v1131_v42 = vor.u32 1.1754944e-38, %v1130_v32  ;;  %vm1129_vm1 = vcmp.eq.f32.partialorder %v1128_v36, 8.507059e+37  ;;  %v4173_v36 = vld [vmem:[#allocation10 + $0xb4] sm:$0xf0] }
 0x232   :  { %v1146_v45 = vor.u32 1.1754944e-38, %v1145_v34  ;;  %vm1144_vm2 = vcmp.eq.f32.partialorder %v1143_v38, 8.507059e+37  ;;  %v3550_v34 = vld [vmem:[#allocation10 + $0xb0] sm:$0xf0] }
 0x233   :  { %v4336_v22 = vpop.eup %4335 }
 0x234   :  { %v1118_v23 = vadd.f32 1.0, %v4336_v22  ;;  %v4177_v22 = vld [vmem:[#allocation10 + $0xd4] sm:$0xf0] }
 0x235   :  { %v4338_v24 = vpop.eup %4337 }
 0x236   :  { %v4340_v26 = vpop.eup %4339  ;;  %v1120_v27 = vmul.f32 %v4338_v24, %v1116_v57  ;;  %4341 = vrcp.f32 %v1118_v23  ;;  %vm1125_vm11 = vweird.f32 %v4338_v24  ;;  %v1160_v13 = vand.u32 2147483648, %v1118_v23  ;;  %v3590_v57 = vld [vmem:[#allocation10 + $0xf8] sm:$0xf0] }
 0x237   :  { %v1135_v28 = vmul.f32 %v4340_v26, %v1117_v16  ;;  %4343 = vtanh.f32 %v1106_v25  ;;  %vm1140_vm12 = vweird.f32 %v4340_v26  ;;  %vm1126_vm15 = vmor %vm1124_vm13, %vm1125_vm11  ;;  %vm1154_vm4 = vweird.f32 %v1118_v23  ;;  %v4176_v16 = vld [vmem:[#allocation10 + $0xcc] sm:$0xf0]  ;;  %v4175_v25 = vld [vmem:[#allocation10 + $0xcc] sm:$0xf] }
 0x238   :  { %v1121_v29 = vsub.f32 1.0, %v1120_v27  ;;  %vm1141_vm0 = vmor %vm1139_vm14, %vm1140_vm12  ;;  %v1158_v58 = vand.u32 2147483647, %v1118_v23  ;;  %v1161_v60 = vor.u32 1.1754944e-38, %v1160_v13  ;;  %v3593_v14 = vor.u32 %v4179_v56, %v3590_v57  ;;  %v3542_v13 = vld [vmem:[#allocation10 + $0x98] sm:$0xf0] }
 0x239   :  { %v1136_v31 = vsub.f32 1.0, %v1135_v28  ;;  %v3565_v19 = vor.u32 %v4176_v16, %v3564_v15  ;;  %v3548_v28 = vld [vmem:[#allocation10 + $0xa0] sm:$0xf]  ;;  %v4160_v56 = vld [vmem:[#allocation10 + $0x4c] sm:$0xf0]  ;;  %v3529_v15 = vor.u32 %v4163_v11, %v3526_v12 }
 0x23a   :  { %v1122_v35 = vmul.f32 %v4338_v24, %v1121_v29  ;;  %vm1159_vm6 = vcmp.eq.f32.partialorder %v1158_v58, 8.507059e+37  ;;  %1742 = vmatpush.bf16.msrb.mxu3 %v3593_v14  ;;  %v4172_v29 = vld [vmem:[#allocation10 + $0xac] sm:$0xf0]  ;;  %v3501_v16 = vor.u32 %v4160_v56, %v3500_v6 }
 0x23b   :  { %v1137_v37 = vmul.f32 %v4340_v26, %v1136_v31  ;;  %1704 = vmatpush.bf16.msra.mxu0 %v3565_v19  ;;  %v4170_v31 = vld [vmem:[#allocation10 + $0xa4] sm:$0xf]  ;;  %v3549_v32 = vor.u32 %v4172_v29, %v3548_v28  ;;  %v3502_v19 = vld [vmem:[#allocation10 + $0x50] sm:$0xf0]  ;;  %v3510_v28 = vld [vmem:[#allocation10 + $0x58] sm:$0xf0] }
 0x23c   :  { %v4342_v39 = vpop.eup %4341  ;;  %v1123_v40 = vadd.f32 %v4338_v24, %v1122_v35  ;;  %v3556_v35 = vld [vmem:[#allocation10 + $0xa8] sm:$0xf]  ;;  %v3484_v29 = vld [vmem:[#allocation10 + $0x20] sm:$0xf] }
 0x23d   :  { %v1150_v41 = vmul.f32 %v4342_v39, %v1118_v23  ;;  %v1138_v43 = vadd.f32 %v4340_v26, %v1137_v37  ;;  %v4344_v46 = vpop.eup %4343  ;;  %vm1155_vm3 = vweird.f32 %v4342_v39  ;;  %v3569_v23 = vor.u32 %v4174_v18, %v3566_v20  ;;  %v4158_v18 = vld [vmem:[#allocation10 + $0x44] sm:$0xf]  ;;  %v3508_v20 = vld [vmem:[#allocation10 + $0x48] sm:$0xf] }
 0x23e   :  { %v1127_v33 = vsel %vm1126_vm15, %v4338_v24, %v1123_v40  ;;  %vm1156_vm5 = vmor %vm1154_vm4, %vm1155_vm3  ;;  %v3573_v24 = vor.u32 %v4177_v22, %v3572_v21  ;;  %v3553_v37 = vor.u32 %v4170_v31, %v3550_v34  ;;  %v3557_v38 = vor.u32 %v4173_v36, %v3556_v35  ;;  %v3558_v40 = vld [vmem:[#allocation10 + $0xb8] sm:$0xf0]  ;;  %v4156_v31 = vld [vmem:[#allocation10 + $0x2c] sm:$0xf0] }
 0x23f   :  { %v1151_v47 = vsub.f32 1.0, %v1150_v41  ;;  %v1132_v48 = vsel %vm1129_vm1, %v1131_v42, %v1127_v33  ;;  %v1142_v49 = vsel %vm1141_vm0, %v4340_v26, %v1138_v43  ;;  %v3574_v26 = vld [vmem:[#allocation10 + $0xd8] sm:$0xf0]  ;;  %1717 = vmatpush.bf16.msra.mxu1 %v3569_v23  ;;  %1705 = vmatpush.bf16.msra.mxu0 %v3549_v32  ;;  %v3532_v42 = vld [vmem:[#allocation10 + $0x80] sm:$0xf]  ;;  %v3485_v35 = vor.u32 %v4156_v31, %v3484_v29 }
 0x240   :  { %v1147_v50 = vsel %vm1144_vm2, %v1146_v45, %v1142_v49  ;;  %v1169_v51 = vmul.f32 %v4344_v46, %v1132_v48  ;;  %v3577_v27 = vor.u32 %v4175_v25, %v3574_v26  ;;  %1730 = vmatpush.bf16.msrb.mxu2 %v3573_v24  ;;  %v4168_v43 = vld [vmem:[#allocation10 + $0x8c] sm:$0xf0]  ;;  %v3540_v48 = vld [vmem:[#allocation10 + $0x88] sm:$0xf]  ;;  %v4169_v49 = vld [vmem:[#allocation10 + $0x94] sm:$0xf0]  ;;  %v3505_v24 = vor.u32 %v4158_v18, %v3502_v19 }
 0x241   :  { %v1168_v52 = vmul.f32 %v1166_v44, %v1147_v50  ;;  %v1152_v53 = vmul.f32 %v4342_v39, %v1151_v47  ;;  %v4166_v44 = vld [vmem:[#allocation10 + $0x84] sm:$0xf]  ;;  %v3533_v46 = vor.u32 %v4168_v43, %v3532_v42  ;;  %v3534_v47 = vld [vmem:[#allocation10 + $0x90] sm:$0xf0]  ;;  %v4161_v25 = vld [vmem:[#allocation10 + $0x54] sm:$0xf0] }
 0x242   :  { %1743 = vmatpush.bf16.msrb.mxu3 %v3577_v27  ;;  %v4159_v26 = vld [vmem:[#allocation10 + $0x4c] sm:$0xf]  ;;  %v3509_v27 = vor.u32 %v4161_v25, %v3508_v20  ;;  %v4154_v36 = vld [vmem:[#allocation10 + $0x24] sm:$0xf]  ;;  %v3494_v42 = vld [vmem:[#allocation10 + $0x38] sm:$0xf0] }
 0x243   :  { %v4713_v54 = vadd.f32 %v1169_v51, %v1168_v52  ;;  %v1153_v55 = vadd.f32 %v4342_v39, %v1152_v53  ;;  %1718 = vmatpush.bf16.msra.mxu1 %v3553_v37  ;;  %v3537_v52 = vor.u32 %v4166_v44, %v3534_v47  ;;  %v3541_v53 = vor.u32 %v4169_v49, %v3540_v48  ;;  %v3486_v37 = vld [vmem:[#allocation10 + $0x30] sm:$0xf0]  ;;  %v4150_v48 = vld [vmem:[#allocation10 + $0x4] sm:$0xf] }
 0x244   :  { %1731 = vmatpush.bf16.msrb.mxu2 %v3557_v38  ;;  %1706 = vmatpush.bf16.msra.mxu0 %v3533_v46  ;;  %v3513_v34 = vor.u32 %v4159_v26, %v3510_v28  ;;  %v3492_v38 = vld [vmem:[#allocation10 + $0x28] sm:$0xf]  ;;  %v3470_v49 = vld [vmem:[#allocation10 + $0x10] sm:$0xf0] }
 0x245   :  { %4345 = vtanh.f32 %v4713_v54  ;;  %v1157_v59 = vsel %vm1156_vm5, %v4342_v39, %v1153_v55  ;;  %v4171_v39 = vld [vmem:[#allocation10 + $0xac] sm:$0xf] }
 0x246   :  { %v1162_v63 = vsel %vm1159_vm6, %v1161_v60, %v1157_v59  ;;  %v3561_v41 = vor.u32 %v4171_v39, %v3558_v40  ;;  %v4167_v55 = vld [vmem:[#allocation10 + $0x8c] sm:$0xf]  ;;  %v3489_v39 = vor.u32 %v4154_v36, %v3486_v37  ;;  %v4157_v40 = vld [vmem:[#allocation10 + $0x34] sm:$0xf0] }
 0x247   :  { %v3545_v58 = vor.u32 %v4167_v55, %v3542_v13  ;;  %1719 = vmatpush.bf16.msra.mxu1 %v3537_v52  ;;  %v3493_v44 = vor.u32 %v4157_v40, %v3492_v38  ;;  %v4153_v55 = vld [vmem:[#allocation10 + $0x14] sm:$0xf0] }
 0x248   :  { %1744 = vmatpush.bf16.msrb.mxu3 %v3561_v41  ;;  %1732 = vmatpush.bf16.msrb.mxu2 %v3541_v53  ;;  %v4155_v41 = vld [vmem:[#allocation10 + $0x2c] sm:$0xf] }
 0x249   :  { %v3497_v47 = vor.u32 %v4155_v41, %v3494_v42 }
 0x24b   :  { %v4346_v61 = vpop.eup %4345 }
 0x24c   :  { %v1172_v0 = vmul.f32 %v4346_v61, %v1162_v63  ;;  %v3516_v61 = vld [vmem:[#allocation10 + $0x60] sm:$0xf]  ;;  %v4164_v63 = vld [vmem:[#allocation10 + $0x6c] sm:$0xf0]  ;;  %1745 = vmatpush.bf16.msrb.mxu3 %v3545_v58  ;;  %1733 = vmatpush.bf16.msrb.mxu2 %v3525_v10 }
 0x24e   :  { %1173 = vst [vmem:[#allocation4] sm:$0x4] %v1172_v0  ;;  %v1174_v1 = vpack.c.bf16 %v1172_v0, %v1172_v0  ;;  %v4162_v0 = vld [vmem:[#allocation10 + $0x64] sm:$0xf] }
 0x250   :  { %v1208_v3 = vrot.slane %v1174_v1, 1  ;;  %v3517_v1 = vor.u32 %v4164_v63, %v3516_v61  ;;  %1746 = vmatpush.bf16.msrb.mxu3 %v3529_v15  ;;  %1734 = vmatpush.bf16.msrb.mxu2 %v3509_v27  ;;  %v4151_v63 = vld [vmem:[#allocation10 + $0xc] sm:$0xf] }
 0x252   :  { %1378 = vmatmul.bf16.vlgmr.msrb.gmra.mxu0 %v1208_v3  ;;  %1391 = vmatmul.bf16.vlgmr.msrb.gmra.mxu1 %v1208_v3 }
 0x253   :  { %1404 = vmatmul.bf16.vlgmr.msra.gmra.mxu2 %v1208_v3  ;;  %1417 = vmatmul.bf16.vlgmr.msra.gmra.mxu3 %v1208_v3  ;;  %v3518_v3 = vld [vmem:[#allocation10 + $0x70] sm:$0xf0] }
 0x254   :  { %v3521_v9 = vor.u32 %v4162_v0, %v3518_v3  ;;  %1707 = vmatpush.bf16.msra.mxu0 %v3517_v1  ;;  %1747 = vmatpush.bf16.msrb.mxu3 %v3513_v34  ;;  %v3478_v0 = vld [vmem:[#allocation10 + $0x18] sm:$0xf0] }
 0x255   :  { %1735 = vmatpush.bf16.msrb.mxu2 %v3493_v44  ;;  %v3481_v3 = vor.u32 %v4151_v63, %v3478_v0  ;;  %v4208_v63 = vld [vmem:[#allocation10 + $0xcc] sm:$0xf0]  ;;  %v4206_v0 = vld [vmem:[#allocation10 + $0xc4] sm:$0xf] }
 0x256   :  { %1720 = vmatpush.bf16.msra.mxu1 %v3521_v9 }
 0x258   :  { %1708 = vmatpush.bf16.msra.mxu0 %v3501_v16  ;;  %1748 = vmatpush.bf16.msrb.mxu3 %v3497_v47  ;;  %v3711_v47 = vld [vmem:[#allocation10 + $0xe0] sm:$0xf] }
 0x25a   :  { %1721 = vmatpush.bf16.msra.mxu1 %v3505_v24  ;;  %v1497_v24 = vrot.slane %v4713_v54, 7 }
 0x25c   :  { %1709 = vmatpush.bf16.msra.mxu0 %v3485_v35  ;;  %1749 = vmatpush.bf16.msrb.mxu3 %v3481_v3  ;;  %v3697_v3 = vld [vmem:[#allocation10 + $0xd0] sm:$0xf0] }
 0x25e   :  { %1722 = vmatpush.bf16.msra.mxu1 %v3489_v39 }
 0x2cf   :  { %v1379_v45 = vpop.f32.mrf.mxu0  ;;  %v1392_v33 = vpop.f32.mrf.mxu1 }
 0x2d0   :  { %v1426_v50 = vrot.slane %v1379_v45, 5  ;;  %v1427_v51 = vrot.slane %v1392_v33, 5  ;;  %v3468_v45 = vld [vmem:[#allocation10] sm:$0xf]  ;;  %v4152_v33 = vld [vmem:[#allocation10 + $0xc] sm:$0xf0] }
 0x2d1   :  { %v3469_v53 = vor.u32 %v4152_v33, %v3468_v45 }
 0x2d2   :  { %v1434_v59 = vadd.f32 %v1426_v50, %v4660_v30  ;;  %v1435_v60 = vadd.f32 %v1427_v51, %v4666_v62  ;;  %v3476_v50 = vld [vmem:[#allocation10 + $0x8] sm:$0xf] }
 0x2d3   :  { %v3477_v61 = vor.u32 %v4153_v55, %v3476_v50  ;;  %1710 = vmatpush.bf16.msra.mxu0 %v3469_v53  ;;  %v4213_v53 = vld [vmem:[#allocation10 + $0xf4] sm:$0xf0] }
 0x2d4   :  { %v3463_v7 = vmul.f32 -1.442695, %v1434_v59  ;;  %v3464_v8 = vmul.f32 -1.442695, %v1435_v60  ;;  %v3473_v60 = vor.u32 %v4150_v48, %v3470_v49  ;;  %v4212_v48 = vld [vmem:[#allocation10 + $0xec] sm:$0xf0] }
 0x2d5   :  { %1736 = vmatpush.bf16.msrb.mxu2 %v3477_v61  ;;  %v4210_v49 = vld [vmem:[#allocation10 + $0xe4] sm:$0xf]  ;;  %v3712_v50 = vor.u32 %v4212_v48, %v3711_v47  ;;  %v3695_v61 = vld [vmem:[#allocation10 + $0xc0] sm:$0xf] }
 0x2d6   :  { %4347 = vpow2.f32 %v3463_v7  ;;  %v1405_v57 = vpop.f32.mrf.mxu2  ;;  %v4718_v14 = vpop.f32.mrf.mxu3  ;;  %1723 = vmatpush.bf16.msra.mxu1 %v3473_v60 }
 0x2d7   :  { %4349 = vpow2.f32 %v3464_v8  ;;  %v1428_v21 = vrot.slane %v1405_v57, 5  ;;  %v1381_v22 = vpop.f32.mrf.mxu0  ;;  %v1394_v23 = vpop.f32.mrf.mxu1  ;;  %v1429_v1 = vrot.slane %v4718_v14, 5  ;;  %2034 = vmatpush.bf16.msrb.mxu0 %v3712_v50  ;;  %v4195_v50 = vld [vmem:[#allocation10 + $0x6c] sm:$0xf] }
 0x2d9   :  { %v1436_v32 = vadd.f32 %v1428_v21, %v4670_v17  ;;  %v1437_v8 = vadd.f32 %v1429_v1, %v4679_v2  ;;  %v3696_v1 = vor.u32 %v4208_v63, %v3695_v61  ;;  %v3633_v61 = vld [vmem:[#allocation10 + $0x50] sm:$0xf0] }
 0x2db   :  { %v3465_v43 = vmul.f32 -1.442695, %v1436_v32  ;;  %2035 = vmatpush.bf16.msrb.mxu0 %v3696_v1 }
 0x2dc   :  { %v4348_v46 = vpop.eup %4347 }
 0x2dd   :  { %v4350_v51 = vpop.eup %4349  ;;  %v1447_v52 = vadd.f32 1.0, %v4348_v46  ;;  %4351 = vpow2.f32 %v3465_v43 }
 0x2de   :  { %v1448_v13 = vadd.f32 1.0, %v4350_v51  ;;  %v1407_v58 = vpop.f32.mrf.mxu2  ;;  %v1420_v59 = vpop.f32.mrf.mxu3  ;;  %v3713_v51 = vld [vmem:[#allocation10 + $0xf0] sm:$0xf0] }
 0x2df   :  { %4353 = vrcp.f32 %v1447_v52  ;;  %v1461_v56 = vand.u32 2147483648, %v1447_v52  ;;  %v1459_v15 = vand.u32 2147483647, %v1447_v52  ;;  %vm1455_vm9 = vweird.f32 %v1447_v52  ;;  %v4211_v58 = vld [vmem:[#allocation10 + $0xec] sm:$0xf] }
 0x2e0   :  { %4355 = vrcp.f32 %v1448_v13  ;;  %v1476_v57 = vand.u32 2147483648, %v1448_v13  ;;  %v1474_v18 = vand.u32 2147483647, %v1448_v13  ;;  %vm1470_vm10 = vweird.f32 %v1448_v13  ;;  %v3721_v59 = vld [vmem:[#allocation10 + $0xf8] sm:$0xf0] }
 0x2e1   :  { %v1462_v22 = vor.u32 1.1754944e-38, %v1461_v56  ;;  %vm1460_vm13 = vcmp.eq.f32.partialorder %v1459_v15, 8.507059e+37  ;;  %v3716_v55 = vor.u32 %v4210_v49, %v3713_v51  ;;  %v3724_v60 = vor.u32 %v4211_v58, %v3721_v59  ;;  %v4202_v56 = vld [vmem:[#allocation10 + $0xa4] sm:$0xf]  ;;  %v3687_v15 = vld [vmem:[#allocation10 + $0xa8] sm:$0xf] }
 0x2e2   :  { %v1477_v25 = vor.u32 1.1754944e-38, %v1476_v57  ;;  %vm1475_vm14 = vcmp.eq.f32.partialorder %v1474_v18, 8.507059e+37  ;;  %v4197_v49 = vld [vmem:[#allocation10 + $0x74] sm:$0xf0]  ;;  %v3657_v51 = vld [vmem:[#allocation10 + $0x78] sm:$0xf0] }
 0x2e3   :  { %v4352_v4 = vpop.eup %4351  ;;  %2047 = vmatpush.bf16.msrb.mxu1 %v3716_v55  ;;  %2073 = vmatpush.bf16.msra.mxu3 %v3724_v60  ;;  %v3631_v58 = vld [vmem:[#allocation10 + $0x40] sm:$0xf]  ;;  %v4192_v59 = vld [vmem:[#allocation10 + $0x4c] sm:$0xf0]  ;;  %v4190_v60 = vld [vmem:[#allocation10 + $0x44] sm:$0xf] }
 0x2e4   :  { %v1449_v5 = vadd.f32 1.0, %v4352_v4  ;;  %v3703_v4 = vld [vmem:[#allocation10 + $0xc8] sm:$0xf]  ;;  %v3632_v1 = vor.u32 %v4192_v59, %v3631_v58 }
 0x2e5   :  { %v4354_v7 = vpop.eup %4353 }
 0x2e6   :  { %v4356_v9 = vpop.eup %4355  ;;  %v1451_v10 = vmul.f32 %v4354_v7, %v1447_v52  ;;  %4357 = vrcp.f32 %v1449_v5  ;;  %vm1456_vm7 = vweird.f32 %v4354_v7  ;;  %v1491_v54 = vand.u32 2147483648, %v1449_v5  ;;  %v3719_v52 = vld [vmem:[#allocation10 + $0xe8] sm:$0xf] }
 0x2e7   :  { %v1466_v11 = vmul.f32 %v4356_v9, %v1448_v13  ;;  %4359 = vtanh.f32 %v1437_v8  ;;  %vm1471_vm8 = vweird.f32 %v4356_v9  ;;  %vm1457_vm11 = vmor %vm1455_vm9, %vm1456_vm7  ;;  %vm1485_vm0 = vweird.f32 %v1449_v5 }
 0x2e8   :  { %v1452_v12 = vsub.f32 1.0, %v1451_v10  ;;  %vm1472_vm12 = vmor %vm1470_vm10, %vm1471_vm8  ;;  %v1489_v39 = vand.u32 2147483647, %v1449_v5  ;;  %v1492_v41 = vor.u32 1.1754944e-38, %v1491_v54  ;;  %v3720_v13 = vor.u32 %v4213_v53, %v3719_v52  ;;  %v3705_v10 = vld [vmem:[#allocation10 + $0xd8] sm:$0xf0] }
 0x2e9   :  { %v1467_v6 = vsub.f32 1.0, %v1466_v11  ;;  %v3660_v53 = vor.u32 %v4195_v50, %v3657_v51 }
 0x2ea   :  { %v1453_v14 = vmul.f32 %v4354_v7, %v1452_v12  ;;  %vm1490_vm2 = vcmp.eq.f32.partialorder %v1489_v39, 8.507059e+37  ;;  %2060 = vmatpush.bf16.msra.mxu2 %v3720_v13  ;;  %v3679_v12 = vld [vmem:[#allocation10 + $0xa0] sm:$0xf] }
 0x2eb   :  { %v1468_v16 = vmul.f32 %v4356_v9, %v1467_v6  ;;  %v4204_v6 = vld [vmem:[#allocation10 + $0xac] sm:$0xf0] }
 0x2ec   :  { %v4358_v19 = vpop.eup %4357  ;;  %v1454_v20 = vadd.f32 %v4354_v7, %v1453_v14  ;;  %v3680_v57 = vor.u32 %v4204_v6, %v3679_v12  ;;  %v3681_v14 = vld [vmem:[#allocation10 + $0xb0] sm:$0xf0]  ;;  %v3641_v12 = vld [vmem:[#allocation10 + $0x58] sm:$0xf0]  ;;  %v3615_v6 = vld [vmem:[#allocation10 + $0x20] sm:$0xf] }
 0x2ed   :  { %v1481_v21 = vmul.f32 %v4358_v19, %v1449_v5  ;;  %v1469_v23 = vadd.f32 %v4356_v9, %v1468_v16  ;;  %v4360_v27 = vpop.eup %4359  ;;  %vm1486_vm15 = vweird.f32 %v4358_v19  ;;  %v4209_v5 = vld [vmem:[#allocation10 + $0xd4] sm:$0xf0]  ;;  %v3684_v18 = vor.u32 %v4202_v56, %v3681_v14  ;;  %v4186_v14 = vld [vmem:[#allocation10 + $0x24] sm:$0xf] }
 0x2ee   :  { %v1458_v26 = vsel %vm1457_vm11, %v4354_v7, %v1454_v20  ;;  %vm1487_vm1 = vmor %vm1485_vm0, %vm1486_vm15  ;;  %v3700_v7 = vor.u32 %v4206_v0, %v3697_v3  ;;  %v3704_v8 = vor.u32 %v4209_v5, %v3703_v4  ;;  %v4205_v16 = vld [vmem:[#allocation10 + $0xb4] sm:$0xf0]  ;;  %v4203_v20 = vld [vmem:[#allocation10 + $0xac] sm:$0xf]  ;;  %2036 = vmatpush.bf16.msrb.mxu0 %v3680_v57  ;;  %v3636_v3 = vor.u32 %v4190_v60, %v3633_v61 }
 0x2ef   :  { %v1482_v28 = vsub.f32 1.0, %v1481_v21  ;;  %v1463_v29 = vsel %vm1460_vm13, %v1462_v22, %v1458_v26  ;;  %v1473_v31 = vsel %vm1472_vm12, %v4356_v9, %v1469_v23  ;;  %v4207_v9 = vld [vmem:[#allocation10 + $0xcc] sm:$0xf]  ;;  %v3689_v21 = vld [vmem:[#allocation10 + $0xb8] sm:$0xf0] }
 0x2f0   :  { %v1478_v32 = vsel %vm1475_vm14, %v1477_v25, %v1473_v31  ;;  %v1500_v34 = vmul.f32 %v4360_v27, %v1463_v29  ;;  %v3708_v11 = vor.u32 %v4207_v9, %v3705_v10  ;;  %2048 = vmatpush.bf16.msrb.mxu1 %v3700_v7  ;;  %2061 = vmatpush.bf16.msra.mxu2 %v3704_v8  ;;  %v3663_v23 = vld [vmem:[#allocation10 + $0x80] sm:$0xf]  ;;  %v4198_v25 = vld [vmem:[#allocation10 + $0x84] sm:$0xf]  ;;  %v3665_v27 = vld [vmem:[#allocation10 + $0x90] sm:$0xf0] }
 0x2f1   :  { %v1499_v35 = vmul.f32 %v1497_v24, %v1478_v32  ;;  %v1483_v36 = vmul.f32 %v4358_v19, %v1482_v28  ;;  %v3692_v22 = vor.u32 %v4203_v20, %v3689_v21  ;;  %v4200_v24 = vld [vmem:[#allocation10 + $0x8c] sm:$0xf0]  ;;  %v3671_v28 = vld [vmem:[#allocation10 + $0x88] sm:$0xf]  ;;  %v4201_v29 = vld [vmem:[#allocation10 + $0x94] sm:$0xf0]  ;;  %v3668_v31 = vor.u32 %v4198_v25, %v3665_v27 }
 0x2f2   :  { %2074 = vmatpush.bf16.msra.mxu3 %v3708_v11  ;;  %v3664_v26 = vor.u32 %v4200_v24, %v3663_v23  ;;  %v3672_v32 = vor.u32 %v4201_v29, %v3671_v28  ;;  %v3639_v4 = vld [vmem:[#allocation10 + $0x48] sm:$0xf]  ;;  %v4193_v5 = vld [vmem:[#allocation10 + $0x54] sm:$0xf0]  ;;  %v4191_v7 = vld [vmem:[#allocation10 + $0x4c] sm:$0xf] }
 0x2f3   :  { %v4724_v37 = vadd.f32 %v1500_v34, %v1499_v35  ;;  %v1484_v38 = vadd.f32 %v4358_v19, %v1483_v36  ;;  %v4199_v34 = vld [vmem:[#allocation10 + $0x8c] sm:$0xf]  ;;  %v3673_v35 = vld [vmem:[#allocation10 + $0x98] sm:$0xf0]  ;;  %v3640_v11 = vor.u32 %v4193_v5, %v3639_v4  ;;  %v3644_v56 = vor.u32 %v4191_v7, %v3641_v12  ;;  %v4188_v57 = vld [vmem:[#allocation10 + $0x2c] sm:$0xf0] }
 0x2f4   :  { %2049 = vmatpush.bf16.msrb.mxu1 %v3684_v18  ;;  %2037 = vmatpush.bf16.msrb.mxu0 %v3664_v26  ;;  %v3676_v54 = vor.u32 %v4199_v34, %v3673_v35  ;;  %v3616_v18 = vor.u32 %v4188_v57, %v3615_v6  ;;  %v3623_v20 = vld [vmem:[#allocation10 + $0x28] sm:$0xf]  ;;  %v4189_v21 = vld [vmem:[#allocation10 + $0x34] sm:$0xf0]  ;;  %v3625_v24 = vld [vmem:[#allocation10 + $0x38] sm:$0xf0] }
 0x2f5   :  { %4361 = vtanh.f32 %v4724_v37  ;;  %v1488_v40 = vsel %vm1487_vm1, %v4358_v19, %v1484_v38  ;;  %v3688_v19 = vor.u32 %v4205_v16, %v3687_v15  ;;  %v3617_v15 = vld [vmem:[#allocation10 + $0x30] sm:$0xf0]  ;;  %v3624_v23 = vor.u32 %v4189_v21, %v3623_v20  ;;  %v3599_v25 = vld [vmem:[#allocation10] sm:$0xf]  ;;  %v4184_v26 = vld [vmem:[#allocation10 + $0xc] sm:$0xf0] }
 0x2f6   :  { %v1493_v43 = vsel %vm1490_vm2, %v1492_v41, %v1488_v40  ;;  %2075 = vmatpush.bf16.msra.mxu3 %v3692_v22  ;;  %v3647_v41 = vld [vmem:[#allocation10 + $0x60] sm:$0xf]  ;;  %v4187_v22 = vld [vmem:[#allocation10 + $0x2c] sm:$0xf]  ;;  %v4182_v29 = vld [vmem:[#allocation10 + $0x4] sm:$0xf]  ;;  %v3600_v34 = vor.u32 %v4184_v26, %v3599_v25 }
 0x2f7   :  { %2062 = vmatpush.bf16.msra.mxu2 %v3688_v19  ;;  %v3620_v19 = vor.u32 %v4186_v14, %v3617_v15  ;;  %v3628_v28 = vor.u32 %v4187_v22, %v3625_v24 }
 0x2f8   :  { %2050 = vmatpush.bf16.msrb.mxu1 %v3668_v31  ;;  %v3601_v31 = vld [vmem:[#allocation10 + $0x10] sm:$0xf0] }
 0x2f9   :  { %v3604_v35 = vor.u32 %v4182_v29, %v3601_v31  ;;  %v4244_v29 = vld [vmem:[#allocation10 + $0xec] sm:$0xf0]  ;;  %v4242_v31 = vld [vmem:[#allocation10 + $0xe4] sm:$0xf] }
 0x2fa   :  { %2076 = vmatpush.bf16.msra.mxu3 %v3676_v54  ;;  %v4183_v54 = vld [vmem:[#allocation10 + $0xc] sm:$0xf] }
 0x2fb   :  { %v4362_v42 = vpop.eup %4361  ;;  %2063 = vmatpush.bf16.msra.mxu2 %v3672_v32 }
 0x2fc   :  { %v1503_v44 = vmul.f32 %v4362_v42, %v1493_v43  ;;  %v4196_v42 = vld [vmem:[#allocation10 + $0x6c] sm:$0xf0] }
 0x2fd   :  { %v3648_v43 = vor.u32 %v4196_v42, %v3647_v41  ;;  %v3609_v42 = vld [vmem:[#allocation10 + $0x18] sm:$0xf0] }
 0x2fe   :  { %1504 = vst [vmem:[#allocation4] sm:$0x8] %v1503_v44  ;;  %v1505_v45 = vpack.c.bf16 %v1503_v44, %v1503_v44  ;;  %v4194_v44 = vld [vmem:[#allocation10 + $0x64] sm:$0xf]  ;;  %2077 = vmatpush.bf16.msra.mxu3 %v3660_v53 }
 0x2ff   :  { %2038 = vmatpush.bf16.msrb.mxu0 %v3648_v43 }
 0x300   :  { %v1539_v33 = vshrl.u32 %v1505_v45, 16  ;;  %v3649_v45 = vld [vmem:[#allocation10 + $0x70] sm:$0xf0] }
 0x301   :  { %v3652_v48 = vor.u32 %v4194_v44, %v3649_v45 }
 0x302   :  { %v1541_v46 = vrot.slane %v1539_v33, 1  ;;  %v3655_v33 = vld [vmem:[#allocation10 + $0x68] sm:$0xf]  ;;  %2078 = vmatpush.bf16.msra.mxu3 %v3644_v56 }
 0x303   :  { %v3656_v52 = vor.u32 %v4197_v49, %v3655_v33  ;;  %2051 = vmatpush.bf16.msrb.mxu1 %v3652_v48  ;;  %2039 = vmatpush.bf16.msrb.mxu0 %v3632_v1  ;;  %v3612_v33 = vor.u32 %v4183_v54, %v3609_v42  ;;  %v3826_v42 = vld [vmem:[#allocation10 + $0xc0] sm:$0xf] }
 0x304   :  { %1711 = vmatmul.bf16.vlgmr.msra.gmra.mxu0 %v1541_v46  ;;  %1724 = vmatmul.bf16.vlgmr.msra.gmra.mxu1 %v1541_v46 }
 0x305   :  { %1737 = vmatmul.bf16.vlgmr.msrb.gmra.mxu2 %v1541_v46  ;;  %1750 = vmatmul.bf16.vlgmr.msrb.gmra.mxu3 %v1541_v46 }
 0x306   :  { %2064 = vmatpush.bf16.msra.mxu2 %v3656_v52  ;;  %2079 = vmatpush.bf16.msra.mxu3 %v3628_v28  ;;  %v3842_v28 = vld [vmem:[#allocation10 + $0xe0] sm:$0xf] }
 0x307   :  { %2052 = vmatpush.bf16.msrb.mxu1 %v3636_v3  ;;  %2040 = vmatpush.bf16.msrb.mxu0 %v3616_v18 }
 0x30a   :  { %2065 = vmatpush.bf16.msra.mxu2 %v3640_v11  ;;  %2080 = vmatpush.bf16.msra.mxu3 %v3612_v33  ;;  %v3828_v33 = vld [vmem:[#allocation10 + $0xd0] sm:$0xf0] }
 0x30b   :  { %2053 = vmatpush.bf16.msrb.mxu1 %v3620_v19  ;;  %2041 = vmatpush.bf16.msrb.mxu0 %v3600_v34  ;;  %v3844_v34 = vld [vmem:[#allocation10 + $0xf0] sm:$0xf0] }
 0x30e   :  { %2066 = vmatpush.bf16.msra.mxu2 %v3624_v23 }
 0x30f   :  { %2054 = vmatpush.bf16.msrb.mxu1 %v3604_v35  ;;  %v3850_v35 = vld [vmem:[#allocation10 + $0xe8] sm:$0xf] }
 0x381   :  { %v1712_v36 = vpop.f32.mrf.mxu0  ;;  %v1725_v38 = vpop.f32.mrf.mxu1 }
 0x382   :  { %v1759_v39 = vrot.slane %v1712_v36, 4  ;;  %v1760_v40 = vrot.slane %v1725_v38, 4  ;;  %v3607_v36 = vld [vmem:[#allocation10 + $0x8] sm:$0xf]  ;;  %v4185_v38 = vld [vmem:[#allocation10 + $0x14] sm:$0xf0] }
 0x383   :  { %v3608_v41 = vor.u32 %v4185_v38, %v3607_v36  ;;  %v4245_v36 = vld [vmem:[#allocation10 + $0xf4] sm:$0xf0]  ;;  %v3847_v38 = vor.u32 %v4242_v31, %v3844_v34 }
 0x384   :  { %v1767_v46 = vadd.f32 %v1759_v39, %v4660_v30  ;;  %v1768_v47 = vadd.f32 %v1760_v40, %v4666_v62  ;;  %v3851_v54 = vor.u32 %v4245_v36, %v3850_v35  ;;  %v4227_v36 = vld [vmem:[#allocation10 + $0x6c] sm:$0xf] }
 0x385   :  { %2067 = vmatpush.bf16.msra.mxu2 %v3608_v41  ;;  %2380 = vmatpush.bf16.msra.mxu1 %v3847_v38  ;;  %v3788_v38 = vld [vmem:[#allocation10 + $0x78] sm:$0xf0] }
 0x386   :  { %v3594_v55 = vmul.f32 -1.442695, %v1767_v46  ;;  %v3595_v13 = vmul.f32 -1.442695, %v1768_v47 }
 0x388   :  { %4363 = vpow2.f32 %v3594_v55  ;;  %v1738_v63 = vpop.f32.mrf.mxu2  ;;  %v4729_v0 = vpop.f32.mrf.mxu3 }
 0x389   :  { %4365 = vpow2.f32 %v3595_v13  ;;  %v1761_v8 = vrot.slane %v1738_v63, 4  ;;  %v1714_v9 = vpop.f32.mrf.mxu0  ;;  %v1727_v10 = vpop.f32.mrf.mxu1  ;;  %v1762_v46 = vrot.slane %v4729_v0, 4  ;;  %2393 = vmatpush.bf16.msrb.mxu2 %v3851_v54  ;;  %v3762_v54 = vld [vmem:[#allocation10 + $0x40] sm:$0xf] }
 0x38b   :  { %v1769_v16 = vadd.f32 %v1761_v8, %v4670_v17  ;;  %v1770_v50 = vadd.f32 %v1762_v46, %v4679_v2  ;;  %v1830_v8 = vrot.slane %v4724_v37, 7  ;;  %v3834_v46 = vld [vmem:[#allocation10 + $0xc8] sm:$0xf] }
 0x38d   :  { %v3596_v27 = vmul.f32 -1.442695, %v1769_v16 }
 0x38e   :  { %v4364_v32 = vpop.eup %4363 }
 0x38f   :  { %v4366_v39 = vpop.eup %4365  ;;  %v1780_v40 = vadd.f32 1.0, %v4364_v32  ;;  %4367 = vpow2.f32 %v3596_v27  ;;  %v3843_v32 = vor.u32 %v4244_v29, %v3842_v28  ;;  %v3786_v28 = vld [vmem:[#allocation10 + $0x68] sm:$0xf]  ;;  %v4229_v29 = vld [vmem:[#allocation10 + $0x74] sm:$0xf0] }
 0x390   :  { %v1781_v43 = vadd.f32 1.0, %v4366_v39  ;;  %v1740_v44 = vpop.f32.mrf.mxu2  ;;  %v1753_v45 = vpop.f32.mrf.mxu3  ;;  %v4243_v39 = vld [vmem:[#allocation10 + $0xec] sm:$0xf]  ;;  %v3787_v35 = vor.u32 %v4229_v29, %v3786_v28 }
 0x391   :  { %4369 = vrcp.f32 %v1780_v40  ;;  %v1794_v58 = vand.u32 2147483648, %v1780_v40  ;;  %v1792_v61 = vand.u32 2147483647, %v1780_v40  ;;  %vm1788_vm5 = vweird.f32 %v1780_v40  ;;  %2367 = vmatpush.bf16.msra.mxu0 %v3843_v32  ;;  %v4238_v44 = vld [vmem:[#allocation10 + $0xc4] sm:$0xf] }
 0x392   :  { %4371 = vrcp.f32 %v1781_v43  ;;  %v1809_v59 = vand.u32 2147483648, %v1781_v43  ;;  %v1807_v0 = vand.u32 2147483647, %v1781_v43  ;;  %vm1803_vm6 = vweird.f32 %v1781_v43 }
 0x393   :  { %v1795_v5 = vor.u32 1.1754944e-38, %v1794_v58  ;;  %vm1793_vm9 = vcmp.eq.f32.partialorder %v1792_v61, 8.507059e+37  ;;  %v4237_v61 = vld [vmem:[#allocation10 + $0xb4] sm:$0xf0] }
 0x394   :  { %v1810_v9 = vor.u32 1.1754944e-38, %v1809_v59  ;;  %vm1808_vm10 = vcmp.eq.f32.partialorder %v1807_v0, 8.507059e+37  ;;  %v3812_v59 = vld [vmem:[#allocation10 + $0xb0] sm:$0xf0] }
 0x395   :  { %v4368_v47 = vpop.eup %4367 }
 0x396   :  { %v1782_v48 = vadd.f32 1.0, %v4368_v47  ;;  %v4241_v47 = vld [vmem:[#allocation10 + $0xd4] sm:$0xf0] }
 0x397   :  { %v4370_v49 = vpop.eup %4369 }
 0x398   :  { %v4372_v51 = vpop.eup %4371  ;;  %v1784_v52 = vmul.f32 %v4370_v49, %v1780_v40  ;;  %4373 = vrcp.f32 %v1782_v48  ;;  %vm1789_vm3 = vweird.f32 %v4370_v49  ;;  %v1824_v37 = vand.u32 2147483648, %v1782_v48  ;;  %v3852_v40 = vld [vmem:[#allocation10 + $0xf8] sm:$0xf0] }
 0x399   :  { %v1799_v53 = vmul.f32 %v4372_v51, %v1781_v43  ;;  %4375 = vtanh.f32 %v1770_v50  ;;  %vm1804_vm4 = vweird.f32 %v4372_v51  ;;  %vm1790_vm7 = vmor %vm1788_vm5, %vm1789_vm3  ;;  %vm1818_vm12 = vweird.f32 %v1782_v48  ;;  %v4240_v43 = vld [vmem:[#allocation10 + $0xcc] sm:$0xf0]  ;;  %v4239_v50 = vld [vmem:[#allocation10 + $0xcc] sm:$0xf] }
 0x39a   :  { %v1785_v55 = vsub.f32 1.0, %v1784_v52  ;;  %vm1805_vm8 = vmor %vm1803_vm6, %vm1804_vm4  ;;  %v1822_v20 = vand.u32 2147483647, %v1782_v48  ;;  %v1825_v22 = vor.u32 1.1754944e-38, %v1824_v37  ;;  %v3855_v41 = vor.u32 %v4243_v39, %v3852_v40  ;;  %v3804_v37 = vld [vmem:[#allocation10 + $0x98] sm:$0xf0] }
 0x39b   :  { %v1800_v13 = vsub.f32 1.0, %v1799_v53  ;;  %v3827_v45 = vor.u32 %v4240_v43, %v3826_v42  ;;  %v3810_v53 = vld [vmem:[#allocation10 + $0xa0] sm:$0xf]  ;;  %v4224_v39 = vld [vmem:[#allocation10 + $0x4c] sm:$0xf0]  ;;  %v3791_v42 = vor.u32 %v4227_v36, %v3788_v38 }
 0x39c   :  { %v1786_v60 = vmul.f32 %v4370_v49, %v1785_v55  ;;  %vm1823_vm14 = vcmp.eq.f32.partialorder %v1822_v20, 8.507059e+37  ;;  %2406 = vmatpush.bf16.msrb.mxu3 %v3855_v41  ;;  %v4236_v55 = vld [vmem:[#allocation10 + $0xac] sm:$0xf0]  ;;  %v3763_v43 = vor.u32 %v4224_v39, %v3762_v54 }
 0x39d   :  { %v1801_v63 = vmul.f32 %v4372_v51, %v1800_v13  ;;  %2368 = vmatpush.bf16.msra.mxu0 %v3827_v45  ;;  %v4234_v13 = vld [vmem:[#allocation10 + $0xa4] sm:$0xf]  ;;  %v3811_v58 = vor.u32 %v4236_v55, %v3810_v53  ;;  %v3764_v45 = vld [vmem:[#allocation10 + $0x50] sm:$0xf0]  ;;  %v3772_v53 = vld [vmem:[#allocation10 + $0x58] sm:$0xf0] }
 0x39e   :  { %v4374_v1 = vpop.eup %4373  ;;  %v1787_v3 = vadd.f32 %v4370_v49, %v1786_v60  ;;  %v3818_v60 = vld [vmem:[#allocation10 + $0xa8] sm:$0xf]  ;;  %v3746_v55 = vld [vmem:[#allocation10 + $0x20] sm:$0xf] }
 0x39f   :  { %v1814_v4 = vmul.f32 %v4374_v1, %v1782_v48  ;;  %v1802_v7 = vadd.f32 %v4372_v51, %v1801_v63  ;;  %v4376_v11 = vpop.eup %4375  ;;  %vm1819_vm11 = vweird.f32 %v4374_v1  ;;  %v3831_v48 = vor.u32 %v4238_v44, %v3828_v33  ;;  %v4222_v44 = vld [vmem:[#allocation10 + $0x44] sm:$0xf]  ;;  %v3770_v33 = vld [vmem:[#allocation10 + $0x48] sm:$0xf] }
 0x3a0   :  { %v1791_v10 = vsel %vm1790_vm7, %v4370_v49, %v1787_v3  ;;  %vm1820_vm13 = vmor %vm1818_vm12, %vm1819_vm11  ;;  %v3835_v49 = vor.u32 %v4241_v47, %v3834_v46  ;;  %v3815_v63 = vor.u32 %v4234_v13, %v3812_v59  ;;  %v3819_v0 = vor.u32 %v4237_v61, %v3818_v60  ;;  %v3820_v3 = vld [vmem:[#allocation10 + $0xb8] sm:$0xf0]  ;;  %v4220_v13 = vld [vmem:[#allocation10 + $0x2c] sm:$0xf0] }
 0x3a1   :  { %v1815_v12 = vsub.f32 1.0, %v1814_v4  ;;  %v1796_v6 = vsel %vm1793_vm9, %v1795_v5, %v1791_v10  ;;  %v1806_v56 = vsel %vm1805_vm8, %v4372_v51, %v1802_v7  ;;  %v3836_v51 = vld [vmem:[#allocation10 + $0xd8] sm:$0xf0]  ;;  %2381 = vmatpush.bf16.msra.mxu1 %v3831_v48  ;;  %2369 = vmatpush.bf16.msra.mxu0 %v3811_v58  ;;  %v3794_v5 = vld [vmem:[#allocation10 + $0x80] sm:$0xf]  ;;  %v3747_v60 = vor.u32 %v4220_v13, %v3746_v55 }
 0x3a2   :  { %v1811_v57 = vsel %vm1808_vm10, %v1810_v9, %v1806_v56  ;;  %v1833_v14 = vmul.f32 %v4376_v11, %v1796_v6  ;;  %v3839_v52 = vor.u32 %v4239_v50, %v3836_v51  ;;  %2394 = vmatpush.bf16.msrb.mxu2 %v3835_v49  ;;  %v4232_v7 = vld [vmem:[#allocation10 + $0x8c] sm:$0xf0]  ;;  %v3802_v6 = vld [vmem:[#allocation10 + $0x88] sm:$0xf]  ;;  %v4233_v56 = vld [vmem:[#allocation10 + $0x94] sm:$0xf0]  ;;  %v3767_v49 = vor.u32 %v4222_v44, %v3764_v45 }
 0x3a3   :  { %v1832_v15 = vmul.f32 %v1830_v8, %v1811_v57  ;;  %v1816_v16 = vmul.f32 %v4374_v1, %v1815_v12  ;;  %v4230_v8 = vld [vmem:[#allocation10 + $0x84] sm:$0xf]  ;;  %v3795_v11 = vor.u32 %v4232_v7, %v3794_v5  ;;  %v3796_v12 = vld [vmem:[#allocation10 + $0x90] sm:$0xf0]  ;;  %v4225_v50 = vld [vmem:[#allocation10 + $0x54] sm:$0xf0] }
 0x3a4   :  { %2407 = vmatpush.bf16.msrb.mxu3 %v3839_v52  ;;  %v4223_v51 = vld [vmem:[#allocation10 + $0x4c] sm:$0xf]  ;;  %v3771_v52 = vor.u32 %v4225_v50, %v3770_v33  ;;  %v4218_v61 = vld [vmem:[#allocation10 + $0x24] sm:$0xf]  ;;  %v3756_v5 = vld [vmem:[#allocation10 + $0x38] sm:$0xf0] }
 0x3a5   :  { %v4735_v18 = vadd.f32 %v1833_v14, %v1832_v15  ;;  %v1817_v19 = vadd.f32 %v4374_v1, %v1816_v16  ;;  %2382 = vmatpush.bf16.msra.mxu1 %v3815_v63  ;;  %v3799_v15 = vor.u32 %v4230_v8, %v3796_v12  ;;  %v3803_v16 = vor.u32 %v4233_v56, %v3802_v6  ;;  %v3748_v63 = vld [vmem:[#allocation10 + $0x30] sm:$0xf0]  ;;  %v4214_v6 = vld [vmem:[#allocation10 + $0x4] sm:$0xf] }
 0x3a6   :  { %2395 = vmatpush.bf16.msrb.mxu2 %v3819_v0  ;;  %2370 = vmatpush.bf16.msra.mxu0 %v3795_v11  ;;  %v3775_v59 = vor.u32 %v4223_v51, %v3772_v53  ;;  %v3754_v0 = vld [vmem:[#allocation10 + $0x28] sm:$0xf]  ;;  %v3732_v56 = vld [vmem:[#allocation10 + $0x10] sm:$0xf0] }
 0x3a7   :  { %4377 = vtanh.f32 %v4735_v18  ;;  %v1821_v21 = vsel %vm1820_vm13, %v4374_v1, %v1817_v19  ;;  %v4235_v1 = vld [vmem:[#allocation10 + $0xac] sm:$0xf] }
 0x3a8   :  { %v1826_v24 = vsel %vm1823_vm14, %v1825_v22, %v1821_v21  ;;  %v3823_v4 = vor.u32 %v4235_v1, %v3820_v3  ;;  %v4231_v19 = vld [vmem:[#allocation10 + $0x8c] sm:$0xf]  ;;  %v3751_v1 = vor.u32 %v4218_v61, %v3748_v63  ;;  %v4221_v3 = vld [vmem:[#allocation10 + $0x34] sm:$0xf0] }
 0x3a9   :  { %v3807_v20 = vor.u32 %v4231_v19, %v3804_v37  ;;  %2383 = vmatpush.bf16.msra.mxu1 %v3799_v15  ;;  %v3755_v8 = vor.u32 %v4221_v3, %v3754_v0  ;;  %v4217_v19 = vld [vmem:[#allocation10 + $0x14] sm:$0xf0] }
 0x3aa   :  { %2408 = vmatpush.bf16.msrb.mxu3 %v3823_v4  ;;  %2396 = vmatpush.bf16.msrb.mxu2 %v3803_v16  ;;  %v4219_v4 = vld [vmem:[#allocation10 + $0x2c] sm:$0xf] }
 0x3ab   :  { %v3759_v12 = vor.u32 %v4219_v4, %v3756_v5 }
 0x3ad   :  { %v4378_v23 = vpop.eup %4377 }
 0x3ae   :  { %v1836_v25 = vmul.f32 %v4378_v23, %v1826_v24  ;;  %v3778_v23 = vld [vmem:[#allocation10 + $0x60] sm:$0xf]  ;;  %v4228_v24 = vld [vmem:[#allocation10 + $0x6c] sm:$0xf0]  ;;  %2409 = vmatpush.bf16.msrb.mxu3 %v3807_v20  ;;  %2397 = vmatpush.bf16.msrb.mxu2 %v3787_v35 }
 0x3b0   :  { %1837 = vst [vmem:[#allocation4] sm:$0x10] %v1836_v25  ;;  %v1838_v26 = vpack.c.bf16 %v1836_v25, %v1836_v25  ;;  %v4226_v25 = vld [vmem:[#allocation10 + $0x64] sm:$0xf] }
 0x3b2   :  { %v1872_v27 = vrot.slane %v1838_v26, 2  ;;  %v3779_v26 = vor.u32 %v4228_v24, %v3778_v23  ;;  %2410 = vmatpush.bf16.msrb.mxu3 %v3791_v42  ;;  %2398 = vmatpush.bf16.msrb.mxu2 %v3771_v52  ;;  %v4215_v24 = vld [vmem:[#allocation10 + $0xc] sm:$0xf] }
 0x3b4   :  { %2042 = vmatmul.bf16.vlgmr.msrb.gmra.mxu0 %v1872_v27  ;;  %2055 = vmatmul.bf16.vlgmr.msrb.gmra.mxu1 %v1872_v27 }
 0x3b5   :  { %2068 = vmatmul.bf16.vlgmr.msra.gmra.mxu2 %v1872_v27  ;;  %2081 = vmatmul.bf16.vlgmr.msra.gmra.mxu3 %v1872_v27  ;;  %v3780_v27 = vld [vmem:[#allocation10 + $0x70] sm:$0xf0] }
 0x3b6   :  { %v3783_v34 = vor.u32 %v4226_v25, %v3780_v27  ;;  %2371 = vmatpush.bf16.msra.mxu0 %v3779_v26  ;;  %2411 = vmatpush.bf16.msrb.mxu3 %v3775_v59  ;;  %v3740_v25 = vld [vmem:[#allocation10 + $0x18] sm:$0xf0] }
 0x3b7   :  { %2399 = vmatpush.bf16.msrb.mxu2 %v3755_v8  ;;  %v3743_v27 = vor.u32 %v4215_v24, %v3740_v25  ;;  %v4272_v24 = vld [vmem:[#allocation10 + $0xcc] sm:$0xf0]  ;;  %v4270_v25 = vld [vmem:[#allocation10 + $0xc4] sm:$0xf] }
 0x3b8   :  { %2384 = vmatpush.bf16.msra.mxu1 %v3783_v34 }
 0x3ba   :  { %2372 = vmatpush.bf16.msra.mxu0 %v3763_v43  ;;  %2412 = vmatpush.bf16.msrb.mxu3 %v3759_v12  ;;  %v3973_v12 = vld [vmem:[#allocation10 + $0xe0] sm:$0xf] }
 0x3bc   :  { %2385 = vmatpush.bf16.msra.mxu1 %v3767_v49  ;;  %v2161_v49 = vrot.slane %v4735_v18, 7 }
 0x3be   :  { %2373 = vmatpush.bf16.msra.mxu0 %v3747_v60  ;;  %2413 = vmatpush.bf16.msrb.mxu3 %v3743_v27  ;;  %v3959_v27 = vld [vmem:[#allocation10 + $0xd0] sm:$0xf0] }
 0x3c0   :  { %2386 = vmatpush.bf16.msra.mxu1 %v3751_v1 }
 0x431   :  { %v2043_v9 = vpop.f32.mrf.mxu0  ;;  %v2056_v10 = vpop.f32.mrf.mxu1 }
 0x432   :  { %v2090_v57 = vrot.slane %v2043_v9, 3  ;;  %v2091_v14 = vrot.slane %v2056_v10, 3  ;;  %v3730_v9 = vld [vmem:[#allocation10] sm:$0xf]  ;;  %v4216_v10 = vld [vmem:[#allocation10 + $0xc] sm:$0xf0] }
 0x433   :  { %v3731_v16 = vor.u32 %v4216_v10, %v3730_v9 }
 0x434   :  { %v2098_v21 = vadd.f32 %v2090_v57, %v4660_v30  ;;  %v2099_v22 = vadd.f32 %v2091_v14, %v4666_v62  ;;  %v3738_v57 = vld [vmem:[#allocation10 + $0x8] sm:$0xf] }
 0x435   :  { %v3739_v23 = vor.u32 %v4217_v19, %v3738_v57  ;;  %2374 = vmatpush.bf16.msra.mxu0 %v3731_v16  ;;  %v4277_v16 = vld [vmem:[#allocation10 + $0xf4] sm:$0xf0] }
 0x436   :  { %v3725_v31 = vmul.f32 -1.442695, %v2098_v21  ;;  %v3726_v32 = vmul.f32 -1.442695, %v2099_v22  ;;  %v3735_v22 = vor.u32 %v4214_v6, %v3732_v56  ;;  %v4276_v6 = vld [vmem:[#allocation10 + $0xec] sm:$0xf0] }
 0x437   :  { %2400 = vmatpush.bf16.msrb.mxu2 %v3739_v23  ;;  %v4274_v56 = vld [vmem:[#allocation10 + $0xe4] sm:$0xf]  ;;  %v3974_v57 = vor.u32 %v4276_v6, %v3973_v12  ;;  %v3957_v23 = vld [vmem:[#allocation10 + $0xc0] sm:$0xf] }
 0x438   :  { %4379 = vpow2.f32 %v3725_v31  ;;  %v2069_v40 = vpop.f32.mrf.mxu2  ;;  %v4740_v41 = vpop.f32.mrf.mxu3  ;;  %2387 = vmatpush.bf16.msra.mxu1 %v3735_v22 }
 0x439   :  { %4381 = vpow2.f32 %v3726_v32  ;;  %v2092_v46 = vrot.slane %v2069_v40, 3  ;;  %v2045_v47 = vpop.f32.mrf.mxu0  ;;  %v2058_v48 = vpop.f32.mrf.mxu1  ;;  %v2093_v26 = vrot.slane %v4740_v41, 3  ;;  %2698 = vmatpush.bf16.msrb.mxu0 %v3974_v57  ;;  %v4259_v57 = vld [vmem:[#allocation10 + $0x6c] sm:$0xf] }
 0x43b   :  { %v2100_v58 = vadd.f32 %v2092_v46, %v4670_v17  ;;  %v2101_v32 = vadd.f32 %v2093_v26, %v4679_v2  ;;  %v3958_v26 = vor.u32 %v4272_v24, %v3957_v23  ;;  %v3895_v23 = vld [vmem:[#allocation10 + $0x50] sm:$0xf0] }
 0x43d   :  { %v3727_v7 = vmul.f32 -1.442695, %v2100_v58  ;;  %2699 = vmatpush.bf16.msrb.mxu0 %v3958_v26 }
 0x43e   :  { %v4380_v11 = vpop.eup %4379 }
 0x43f   :  { %v4382_v14 = vpop.eup %4381  ;;  %v2111_v15 = vadd.f32 1.0, %v4380_v11  ;;  %4383 = vpow2.f32 %v3727_v7 }
 0x440   :  { %v2112_v37 = vadd.f32 1.0, %v4382_v14  ;;  %v2071_v20 = vpop.f32.mrf.mxu2  ;;  %v2084_v21 = vpop.f32.mrf.mxu3  ;;  %v3975_v14 = vld [vmem:[#allocation10 + $0xf0] sm:$0xf0] }
 0x441   :  { %4385 = vrcp.f32 %v2111_v15  ;;  %v2125_v39 = vand.u32 2147483648, %v2111_v15  ;;  %v2123_v42 = vand.u32 2147483647, %v2111_v15  ;;  %vm2119_vm1 = vweird.f32 %v2111_v15  ;;  %v4275_v20 = vld [vmem:[#allocation10 + $0xec] sm:$0xf] }
 0x442   :  { %4387 = vrcp.f32 %v2112_v37  ;;  %v2140_v40 = vand.u32 2147483648, %v2112_v37  ;;  %v2138_v44 = vand.u32 2147483647, %v2112_v37  ;;  %vm2134_vm2 = vweird.f32 %v2112_v37  ;;  %v3983_v21 = vld [vmem:[#allocation10 + $0xf8] sm:$0xf0] }
 0x443   :  { %v2126_v47 = vor.u32 1.1754944e-38, %v2125_v39  ;;  %vm2124_vm5 = vcmp.eq.f32.partialorder %v2123_v42, 8.507059e+37  ;;  %v3978_v19 = vor.u32 %v4274_v56, %v3975_v14  ;;  %v3986_v22 = vor.u32 %v4275_v20, %v3983_v21  ;;  %v4266_v39 = vld [vmem:[#allocation10 + $0xa4] sm:$0xf]  ;;  %v3949_v42 = vld [vmem:[#allocation10 + $0xa8] sm:$0xf] }
 0x444   :  { %v2141_v50 = vor.u32 1.1754944e-38, %v2140_v40  ;;  %vm2139_vm6 = vcmp.eq.f32.partialorder %v2138_v44, 8.507059e+37  ;;  %v4261_v56 = vld [vmem:[#allocation10 + $0x74] sm:$0xf0]  ;;  %v3919_v14 = vld [vmem:[#allocation10 + $0x78] sm:$0xf0] }
 0x445   :  { %v4384_v28 = vpop.eup %4383  ;;  %2711 = vmatpush.bf16.msrb.mxu1 %v3978_v19  ;;  %2737 = vmatpush.bf16.msra.mxu3 %v3986_v22  ;;  %v3893_v20 = vld [vmem:[#allocation10 + $0x40] sm:$0xf]  ;;  %v4256_v21 = vld [vmem:[#allocation10 + $0x4c] sm:$0xf0]  ;;  %v4254_v22 = vld [vmem:[#allocation10 + $0x44] sm:$0xf] }
 0x446   :  { %v2113_v29 = vadd.f32 1.0, %v4384_v28  ;;  %v3965_v28 = vld [vmem:[#allocation10 + $0xc8] sm:$0xf]  ;;  %v3894_v26 = vor.u32 %v4256_v21, %v3893_v20 }
 0x447   :  { %v4386_v31 = vpop.eup %4385 }
 0x448   :  { %v4388_v34 = vpop.eup %4387  ;;  %v2115_v35 = vmul.f32 %v4386_v31, %v2111_v15  ;;  %4389 = vrcp.f32 %v2113_v29  ;;  %vm2120_vm15 = vweird.f32 %v4386_v31  ;;  %v2155_v18 = vand.u32 2147483648, %v2113_v29  ;;  %v3981_v15 = vld [vmem:[#allocation10 + $0xe8] sm:$0xf] }
 0x449   :  { %v2130_v36 = vmul.f32 %v4388_v34, %v2112_v37  ;;  %4391 = vtanh.f32 %v2101_v32  ;;  %vm2135_vm0 = vweird.f32 %v4388_v34  ;;  %vm2121_vm3 = vmor %vm2119_vm1, %vm2120_vm15  ;;  %vm2149_vm8 = vweird.f32 %v2113_v29 }
 0x44a   :  { %v2116_v38 = vsub.f32 1.0, %v2115_v35  ;;  %vm2136_vm4 = vmor %vm2134_vm2, %vm2135_vm0  ;;  %v2153_v1 = vand.u32 2147483647, %v2113_v29  ;;  %v2156_v4 = vor.u32 1.1754944e-38, %v2155_v18  ;;  %v3982_v37 = vor.u32 %v4277_v16, %v3981_v15  ;;  %v3967_v35 = vld [vmem:[#allocation10 + $0xd8] sm:$0xf0] }
 0x44b   :  { %v2131_v54 = vsub.f32 1.0, %v2130_v36  ;;  %v3922_v16 = vor.u32 %v4259_v57, %v3919_v14 }
 0x44c   :  { %v2117_v41 = vmul.f32 %v4386_v31, %v2116_v38  ;;  %vm2154_vm10 = vcmp.eq.f32.partialorder %v2153_v1, 8.507059e+37  ;;  %2724 = vmatpush.bf16.msra.mxu2 %v3982_v37  ;;  %v3941_v38 = vld [vmem:[#allocation10 + $0xa0] sm:$0xf] }
 0x44d   :  { %v2132_v43 = vmul.f32 %v4388_v34, %v2131_v54  ;;  %v4268_v54 = vld [vmem:[#allocation10 + $0xac] sm:$0xf0] }
 0x44e   :  { %v4390_v45 = vpop.eup %4389  ;;  %v2118_v33 = vadd.f32 %v4386_v31, %v2117_v41  ;;  %v3942_v40 = vor.u32 %v4268_v54, %v3941_v38  ;;  %v3943_v41 = vld [vmem:[#allocation10 + $0xb0] sm:$0xf0]  ;;  %v3903_v38 = vld [vmem:[#allocation10 + $0x58] sm:$0xf0]  ;;  %v3877_v54 = vld [vmem:[#allocation10 + $0x20] sm:$0xf] }
 0x44f   :  { %v2145_v46 = vmul.f32 %v4390_v45, %v2113_v29  ;;  %v2133_v48 = vadd.f32 %v4388_v34, %v2132_v43  ;;  %v4392_v52 = vpop.eup %4391  ;;  %vm2150_vm7 = vweird.f32 %v4390_v45  ;;  %v4273_v29 = vld [vmem:[#allocation10 + $0xd4] sm:$0xf0]  ;;  %v3946_v44 = vor.u32 %v4266_v39, %v3943_v41  ;;  %v4250_v41 = vld [vmem:[#allocation10 + $0x24] sm:$0xf] }
 0x450   :  { %v2122_v51 = vsel %vm2121_vm3, %v4386_v31, %v2118_v33  ;;  %vm2151_vm9 = vmor %vm2149_vm8, %vm2150_vm7  ;;  %v3962_v31 = vor.u32 %v4270_v25, %v3959_v27  ;;  %v3966_v32 = vor.u32 %v4273_v29, %v3965_v28  ;;  %v4269_v43 = vld [vmem:[#allocation10 + $0xb4] sm:$0xf0]  ;;  %v4267_v33 = vld [vmem:[#allocation10 + $0xac] sm:$0xf]  ;;  %2700 = vmatpush.bf16.msrb.mxu0 %v3942_v40  ;;  %v3898_v27 = vor.u32 %v4254_v22, %v3895_v23 }
 0x451   :  { %v2146_v53 = vsub.f32 1.0, %v2145_v46  ;;  %v2127_v55 = vsel %vm2124_vm5, %v2126_v47, %v2122_v51  ;;  %v2137_v13 = vsel %vm2136_vm4, %v4388_v34, %v2133_v48  ;;  %v4271_v34 = vld [vmem:[#allocation10 + $0xcc] sm:$0xf]  ;;  %v3951_v46 = vld [vmem:[#allocation10 + $0xb8] sm:$0xf0] }
 0x452   :  { %v2142_v58 = vsel %vm2139_vm6, %v2141_v50, %v2137_v13  ;;  %v2164_v59 = vmul.f32 %v4392_v52, %v2127_v55  ;;  %v3970_v36 = vor.u32 %v4271_v34, %v3967_v35  ;;  %2712 = vmatpush.bf16.msrb.mxu1 %v3962_v31  ;;  %2725 = vmatpush.bf16.msra.mxu2 %v3966_v32  ;;  %v3925_v48 = vld [vmem:[#allocation10 + $0x80] sm:$0xf]  ;;  %v4262_v50 = vld [vmem:[#allocation10 + $0x84] sm:$0xf]  ;;  %v3927_v52 = vld [vmem:[#allocation10 + $0x90] sm:$0xf0] }
 0x453   :  { %v2163_v60 = vmul.f32 %v2161_v49, %v2142_v58  ;;  %v2147_v61 = vmul.f32 %v4390_v45, %v2146_v53  ;;  %v3954_v47 = vor.u32 %v4267_v33, %v3951_v46  ;;  %v4264_v49 = vld [vmem:[#allocation10 + $0x8c] sm:$0xf0]  ;;  %v3933_v53 = vld [vmem:[#allocation10 + $0x88] sm:$0xf]  ;;  %v4265_v55 = vld [vmem:[#allocation10 + $0x94] sm:$0xf0]  ;;  %v3930_v13 = vor.u32 %v4262_v50, %v3927_v52 }
 0x454   :  { %2738 = vmatpush.bf16.msra.mxu3 %v3970_v36  ;;  %v3926_v51 = vor.u32 %v4264_v49, %v3925_v48  ;;  %v3934_v58 = vor.u32 %v4265_v55, %v3933_v53  ;;  %v3901_v28 = vld [vmem:[#allocation10 + $0x48] sm:$0xf]  ;;  %v4257_v29 = vld [vmem:[#allocation10 + $0x54] sm:$0xf0]  ;;  %v4255_v31 = vld [vmem:[#allocation10 + $0x4c] sm:$0xf] }
 0x455   :  { %v4746_v63 = vadd.f32 %v2164_v59, %v2163_v60  ;;  %v2148_v0 = vadd.f32 %v4390_v45, %v2147_v61  ;;  %v4263_v59 = vld [vmem:[#allocation10 + $0x8c] sm:$0xf]  ;;  %v3935_v60 = vld [vmem:[#allocation10 + $0x98] sm:$0xf0]  ;;  %v3902_v36 = vor.u32 %v4257_v29, %v3901_v28  ;;  %v3906_v39 = vor.u32 %v4255_v31, %v3903_v38  ;;  %v4252_v40 = vld [vmem:[#allocation10 + $0x2c] sm:$0xf0] }
 0x456   :  { %2713 = vmatpush.bf16.msrb.mxu1 %v3946_v44  ;;  %2701 = vmatpush.bf16.msrb.mxu0 %v3926_v51  ;;  %v3938_v18 = vor.u32 %v4263_v59, %v3935_v60  ;;  %v3878_v44 = vor.u32 %v4252_v40, %v3877_v54  ;;  %v3885_v33 = vld [vmem:[#allocation10 + $0x28] sm:$0xf]  ;;  %v4253_v46 = vld [vmem:[#allocation10 + $0x34] sm:$0xf0]  ;;  %v3887_v49 = vld [vmem:[#allocation10 + $0x38] sm:$0xf0] }
 0x457   :  { %4393 = vtanh.f32 %v4746_v63  ;;  %v2152_v3 = vsel %vm2151_vm9, %v4390_v45, %v2148_v0  ;;  %v3950_v45 = vor.u32 %v4269_v43, %v3949_v42  ;;  %v3879_v42 = vld [vmem:[#allocation10 + $0x30] sm:$0xf0]  ;;  %v3886_v48 = vor.u32 %v4253_v46, %v3885_v33  ;;  %v3861_v50 = vld [vmem:[#allocation10] sm:$0xf]  ;;  %v4248_v51 = vld [vmem:[#allocation10 + $0xc] sm:$0xf0] }
 0x458   :  { %v2157_v7 = vsel %vm2154_vm10, %v2156_v4, %v2152_v3  ;;  %2739 = vmatpush.bf16.msra.mxu3 %v3954_v47  ;;  %v3909_v4 = vld [vmem:[#allocation10 + $0x60] sm:$0xf]  ;;  %v4251_v47 = vld [vmem:[#allocation10 + $0x2c] sm:$0xf]  ;;  %v4246_v55 = vld [vmem:[#allocation10 + $0x4] sm:$0xf]  ;;  %v3862_v59 = vor.u32 %v4248_v51, %v3861_v50 }
 0x459   :  { %2726 = vmatpush.bf16.msra.mxu2 %v3950_v45  ;;  %v3882_v45 = vor.u32 %v4250_v41, %v3879_v42  ;;  %v3890_v53 = vor.u32 %v4251_v47, %v3887_v49 }
 0x45a   :  { %2714 = vmatpush.bf16.msrb.mxu1 %v3930_v13  ;;  %v3863_v13 = vld [vmem:[#allocation10 + $0x10] sm:$0xf0] }
 0x45b   :  { %v3866_v60 = vor.u32 %v4246_v55, %v3863_v13  ;;  %v4284_v55 = vld [vmem:[#allocation13 + $0x30] sm:$0xff] }
 0x45c   :  { %2740 = vmatpush.bf16.msra.mxu3 %v3938_v18  ;;  %v4247_v18 = vld [vmem:[#allocation10 + $0xc] sm:$0xf] }
 0x45d   :  { %v4394_v5 = vpop.eup %4393  ;;  %2727 = vmatpush.bf16.msra.mxu2 %v3934_v58 }
 0x45e   :  { %v2167_v8 = vmul.f32 %v4394_v5, %v2157_v7  ;;  %v4260_v5 = vld [vmem:[#allocation10 + $0x6c] sm:$0xf0] }
 0x45f   :  { %v3910_v7 = vor.u32 %v4260_v5, %v3909_v4  ;;  %v3871_v5 = vld [vmem:[#allocation10 + $0x18] sm:$0xf0] }
 0x460   :  { %2168 = vst [vmem:[#allocation4] sm:$0x20] %v2167_v8  ;;  %v2169_v9 = vpack.c.bf16 %v2167_v8, %v2167_v8  ;;  %v4258_v8 = vld [vmem:[#allocation10 + $0x64] sm:$0xf]  ;;  %2741 = vmatpush.bf16.msra.mxu3 %v3922_v16 }
 0x461   :  { %2702 = vmatpush.bf16.msrb.mxu0 %v3910_v7 }
 0x462   :  { %v2203_v10 = vshrl.u32 %v2169_v9, 16  ;;  %v3911_v9 = vld [vmem:[#allocation10 + $0x70] sm:$0xf0] }
 0x463   :  { %v3914_v6 = vor.u32 %v4258_v8, %v3911_v9 }
 0x464   :  { %v2205_v11 = vrot.slane %v2203_v10, 2  ;;  %v3917_v10 = vld [vmem:[#allocation10 + $0x68] sm:$0xf]  ;;  %2742 = vmatpush.bf16.msra.mxu3 %v3906_v39 }
 0x465   :  { %v3918_v15 = vor.u32 %v4261_v56, %v3917_v10  ;;  %2715 = vmatpush.bf16.msrb.mxu1 %v3914_v6  ;;  %2703 = vmatpush.bf16.msrb.mxu0 %v3894_v26  ;;  %v3874_v10 = vor.u32 %v4247_v18, %v3871_v5 }
 0x466   :  { %2375 = vmatmul.bf16.vlgmr.msra.gmra.mxu0 %v2205_v11  ;;  %2388 = vmatmul.bf16.vlgmr.msra.gmra.mxu1 %v2205_v11 }
 0x467   :  { %2401 = vmatmul.bf16.vlgmr.msrb.gmra.mxu2 %v2205_v11  ;;  %2414 = vmatmul.bf16.vlgmr.msrb.gmra.mxu3 %v2205_v11 }
 0x468   :  { %2728 = vmatpush.bf16.msra.mxu2 %v3918_v15  ;;  %2743 = vmatpush.bf16.msra.mxu3 %v3890_v53  ;;  %v4285_v53 = vld [vmem:[#allocation13 + $0x38] sm:$0xff] }
 0x469   :  { %2716 = vmatpush.bf16.msrb.mxu1 %v3898_v27  ;;  %2704 = vmatpush.bf16.msrb.mxu0 %v3878_v44 }
 0x46c   :  { %2729 = vmatpush.bf16.msra.mxu2 %v3902_v36  ;;  %2744 = vmatpush.bf16.msra.mxu3 %v3874_v10 }
 0x46d   :  { %2717 = vmatpush.bf16.msrb.mxu1 %v3882_v45  ;;  %2705 = vmatpush.bf16.msrb.mxu0 %v3862_v59 }
 0x470   :  { %2730 = vmatpush.bf16.msra.mxu2 %v3886_v48 }
 0x471   :  { %2718 = vmatpush.bf16.msrb.mxu1 %v3866_v60  ;;  %2903 = vmatpush.bf16.msra.mxu0 %v4285_v53 }
 0x475   :  { %2904 = vmatpush.bf16.msra.mxu0 %v4284_v55 }
 0x4e3   :  { %v2376_v61 = vpop.f32.mrf.mxu0  ;;  %v2389_v0 = vpop.f32.mrf.mxu1 }
 0x4e4   :  { %v2423_v1 = vrot.slane %v2376_v61, 2  ;;  %v2424_v3 = vrot.slane %v2389_v0, 2  ;;  %v3869_v61 = vld [vmem:[#allocation10 + $0x8] sm:$0xf]  ;;  %v4249_v0 = vld [vmem:[#allocation10 + $0x14] sm:$0xf0] }
 0x4e5   :  { %v3870_v4 = vor.u32 %v4249_v0, %v3869_v61  ;;  %v4283_v61 = vld [vmem:[#allocation13 + $0x28] sm:$0xff] }
 0x4e6   :  { %v2431_v11 = vadd.f32 %v2423_v1, %v4660_v30  ;;  %v2432_v12 = vadd.f32 %v2424_v3, %v4666_v62  ;;  %2905 = vmatpush.bf16.msra.mxu0 %v4283_v61 }
 0x4e7   :  { %2731 = vmatpush.bf16.msra.mxu2 %v3870_v4  ;;  %v4282_v4 = vld [vmem:[#allocation13 + $0x20] sm:$0xff] }
 0x4e8   :  { %v3856_v19 = vmul.f32 -1.442695, %v2431_v11  ;;  %v3857_v37 = vmul.f32 -1.442695, %v2432_v12 }
 0x4ea   :  { %4395 = vpow2.f32 %v3856_v19  ;;  %v2402_v24 = vpop.f32.mrf.mxu2  ;;  %v4751_v25 = vpop.f32.mrf.mxu3  ;;  %2906 = vmatpush.bf16.msra.mxu0 %v4282_v4 }
 0x4eb   :  { %4397 = vpow2.f32 %v3857_v37  ;;  %v2425_v32 = vrot.slane %v2402_v24, 2  ;;  %v2378_v34 = vpop.f32.mrf.mxu0  ;;  %v2391_v35 = vpop.f32.mrf.mxu1  ;;  %v2426_v11 = vrot.slane %v4751_v25, 2 }
 0x4ed   :  { %v2433_v43 = vadd.f32 %v2425_v32, %v4670_v17  ;;  %v2434_v57 = vadd.f32 %v2426_v11, %v4679_v2  ;;  %v2494_v32 = vrot.slane %v4746_v63, 7  ;;  %v4281_v11 = vld [vmem:[#allocation13 + $0x18] sm:$0xff] }
 0x4ee   :  { %2907 = vmatpush.bf16.msra.mxu0 %v4281_v11 }
 0x4ef   :  { %v3858_v52 = vmul.f32 -1.442695, %v2433_v43 }
 0x4f0   :  { %v4396_v58 = vpop.eup %4395 }
 0x4f1   :  { %v4398_v1 = vpop.eup %4397  ;;  %v2444_v3 = vadd.f32 1.0, %v4396_v58  ;;  %4399 = vpow2.f32 %v3858_v52 }
 0x4f2   :  { %v2445_v7 = vadd.f32 1.0, %v4398_v1  ;;  %v2404_v8 = vpop.f32.mrf.mxu2  ;;  %v2417_v9 = vpop.f32.mrf.mxu3 }
 0x4f3   :  { %4401 = vrcp.f32 %v2444_v3  ;;  %v2458_v20 = vand.u32 2147483648, %v2444_v3  ;;  %v2456_v23 = vand.u32 2147483647, %v2444_v3  ;;  %vm2452_vm13 = vweird.f32 %v2444_v3 }
 0x4f4   :  { %4403 = vrcp.f32 %v2445_v7  ;;  %v2473_v21 = vand.u32 2147483648, %v2445_v7  ;;  %v2471_v25 = vand.u32 2147483647, %v2445_v7  ;;  %vm2467_vm14 = vweird.f32 %v2445_v7 }
 0x4f5   :  { %v2459_v29 = vor.u32 1.1754944e-38, %v2458_v20  ;;  %vm2457_vm1 = vcmp.eq.f32.partialorder %v2456_v23, 8.507059e+37  ;;  %v4278_v20 = vld [vmem:[#allocation13] sm:$0xff] }
 0x4f6   :  { %v2474_v34 = vor.u32 1.1754944e-38, %v2473_v21  ;;  %vm2472_vm2 = vcmp.eq.f32.partialorder %v2471_v25, 8.507059e+37 }
 0x4f7   :  { %v4400_v12 = vpop.eup %4399 }
 0x4f8   :  { %v2446_v6 = vadd.f32 1.0, %v4400_v12 }
 0x4f9   :  { %v4402_v56 = vpop.eup %4401 }
 0x4fa   :  { %v4404_v14 = vpop.eup %4403  ;;  %v2448_v15 = vmul.f32 %v4402_v56, %v2444_v3  ;;  %4405 = vrcp.f32 %v2446_v6  ;;  %vm2453_vm11 = vweird.f32 %v4402_v56  ;;  %v2488_v63 = vand.u32 2147483648, %v2446_v6 }
 0x4fb   :  { %v2463_v16 = vmul.f32 %v4404_v14, %v2445_v7  ;;  %4407 = vtanh.f32 %v2434_v57  ;;  %vm2468_vm12 = vweird.f32 %v4404_v14  ;;  %vm2454_vm15 = vmor %vm2452_vm13, %vm2453_vm11  ;;  %vm2482_vm4 = vweird.f32 %v2446_v6 }
 0x4fc   :  { %v2449_v19 = vsub.f32 1.0, %v2448_v15  ;;  %vm2469_vm0 = vmor %vm2467_vm14, %vm2468_vm12  ;;  %v2486_v33 = vand.u32 2147483647, %v2446_v6  ;;  %v2489_v47 = vor.u32 1.1754944e-38, %v2488_v63 }
 0x4fd   :  { %v2464_v37 = vsub.f32 1.0, %v2463_v16 }
 0x4fe   :  { %v2450_v22 = vmul.f32 %v4402_v56, %v2449_v19  ;;  %vm2487_vm6 = vcmp.eq.f32.partialorder %v2486_v33, 8.507059e+37  ;;  %v4279_v19 = vld [vmem:[#allocation13 + $0x8] sm:$0xff] }
 0x4ff   :  { %v2465_v24 = vmul.f32 %v4404_v14, %v2464_v37 }
 0x500   :  { %v4406_v26 = vpop.eup %4405  ;;  %v2451_v27 = vadd.f32 %v4402_v56, %v2450_v22 }
 0x501   :  { %v2478_v28 = vmul.f32 %v4406_v26, %v2446_v6  ;;  %v2466_v31 = vadd.f32 %v4404_v14, %v2465_v24  ;;  %v4408_v36 = vpop.eup %4407  ;;  %vm2483_vm3 = vweird.f32 %v4406_v26 }
 0x502   :  { %v2455_v35 = vsel %vm2454_vm15, %v4402_v56, %v2451_v27  ;;  %vm2484_vm5 = vmor %vm2482_vm4, %vm2483_vm3  ;;  %v4280_v56 = vld [vmem:[#allocation13 + $0x10] sm:$0xff] }
 0x503   :  { %v2479_v38 = vsub.f32 1.0, %v2478_v28  ;;  %v2460_v54 = vsel %vm2457_vm1, %v2459_v29, %v2455_v35  ;;  %v2470_v39 = vsel %vm2469_vm0, %v4404_v14, %v2466_v31  ;;  %2908 = vmatpush.bf16.msra.mxu0 %v4280_v56 }
 0x504   :  { %v2475_v40 = vsel %vm2472_vm2, %v2474_v34, %v2470_v39  ;;  %v2497_v41 = vmul.f32 %v4408_v36, %v2460_v54 }
 0x505   :  { %v2496_v42 = vmul.f32 %v2494_v32, %v2475_v40  ;;  %v2480_v43 = vmul.f32 %v4406_v26, %v2479_v38 }
 0x507   :  { %v4757_v44 = vadd.f32 %v2497_v41, %v2496_v42  ;;  %v2481_v45 = vadd.f32 %v4406_v26, %v2480_v43  ;;  %2909 = vmatpush.bf16.msra.mxu0 %v4279_v19 }
 0x509   :  { %4409 = vtanh.f32 %v4757_v44  ;;  %v2485_v46 = vsel %vm2484_vm5, %v4406_v26, %v2481_v45  ;;  %v2825_v41 = vrot.slane %v4757_v44, 7 }
 0x50a   :  { %v2490_v49 = vsel %vm2487_vm6, %v2489_v47, %v2485_v46 }
 0x50b   :  { %2910 = vmatpush.bf16.msra.mxu0 %v4278_v20 }
 0x50f   :  { %v4410_v48 = vpop.eup %4409 }
 0x510   :  { %v2500_v50 = vmul.f32 %v4410_v48, %v2490_v49 }
 0x512   :  { %2501 = vst [vmem:[#allocation4] sm:$0x40] %v2500_v50  ;;  %v2502_v51 = vpack.c.bf16 %v2500_v50, %v2500_v50 }
 0x514   :  { %v2536_v52 = vrot.slane %v2502_v51, 3 }
 0x516   :  { %2706 = vmatmul.bf16.vlgmr.msrb.gmra.mxu0 %v2536_v52  ;;  %2719 = vmatmul.bf16.vlgmr.msrb.gmra.mxu1 %v2536_v52 }
 0x517   :  { %2732 = vmatmul.bf16.vlgmr.msra.gmra.mxu2 %v2536_v52  ;;  %2745 = vmatmul.bf16.vlgmr.msra.gmra.mxu3 %v2536_v52 }
 0x593   :  { %v2707_v13 = vpop.f32.mrf.mxu0  ;;  %v2720_v58 = vpop.f32.mrf.mxu1 }
 0x594   :  { %v2754_v59 = vrot.slane %v2707_v13, 1  ;;  %v2755_v60 = vrot.slane %v2720_v58, 1 }
 0x596   :  { %v2762_v0 = vadd.f32 %v2754_v59, %v4660_v30  ;;  %v2763_v18 = vadd.f32 %v2755_v60, %v4666_v62 }
 0x598   :  { %v3987_v1 = vmul.f32 -1.442695, %v2762_v0  ;;  %v3988_v3 = vmul.f32 -1.442695, %v2763_v18  ;;  %v4298_v18 = vld [vmem:[%s4776_s5] ss:$0 sm:$0xff] }
 0x59a   :  { %4411 = vpow2.f32 %v3987_v1  ;;  %v2733_v5 = vpop.f32.mrf.mxu2  ;;  %v2746_v7 = vpop.f32.mrf.mxu3 }
 0x59b   :  { %4413 = vpow2.f32 %v3988_v3  ;;  %v2756_v8 = vrot.slane %v2733_v5, 1  ;;  %v2709_v9 = vpop.f32.mrf.mxu0  ;;  %v2722_v10 = vpop.f32.mrf.mxu1  ;;  %v2757_v37 = vrot.slane %v2746_v7, 1 }
 0x59d   :  { %v2764_v12 = vadd.f32 %v2756_v8, %v4670_v17  ;;  %v2765_v23 = vadd.f32 %v2757_v37, %v4679_v2 }
 0x59f   :  { %v3989_v6 = vmul.f32 -1.442695, %v2764_v12 }
 0x5a0   :  { %v4412_v30 = vpop.eup %4411 }
 0x5a1   :  { %v4414_v62 = vpop.eup %4413  ;;  %v2775_v57 = vadd.f32 1.0, %v4412_v30  ;;  %4415 = vpow2.f32 %v3989_v6 }
 0x5a2   :  { %v2776_v14 = vadd.f32 1.0, %v4414_v62  ;;  %v2735_v15 = vpop.f32.mrf.mxu2  ;;  %v2748_v16 = vpop.f32.mrf.mxu3 }
 0x5a3   :  { %4417 = vrcp.f32 %v2775_v57  ;;  %v2789_v29 = vand.u32 2147483648, %v2775_v57  ;;  %v2787_v34 = vand.u32 2147483647, %v2775_v57  ;;  %vm2783_vm9 = vweird.f32 %v2775_v57 }
 0x5a4   :  { %4419 = vrcp.f32 %v2776_v14  ;;  %v2804_v31 = vand.u32 2147483648, %v2776_v14  ;;  %v2802_v36 = vand.u32 2147483647, %v2776_v14  ;;  %vm2798_vm10 = vweird.f32 %v2776_v14 }
 0x5a5   :  { %v2790_v39 = vor.u32 1.1754944e-38, %v2789_v29  ;;  %vm2788_vm13 = vcmp.eq.f32.partialorder %v2787_v34, 8.507059e+37 }
 0x5a6   :  { %v2805_v42 = vor.u32 1.1754944e-38, %v2804_v31  ;;  %vm2803_vm14 = vcmp.eq.f32.partialorder %v2802_v36, 8.507059e+37 }
 0x5a7   :  { %v4416_v21 = vpop.eup %4415 }
 0x5a8   :  { %v2777_v22 = vadd.f32 1.0, %v4416_v21 }
 0x5a9   :  { %v4418_v17 = vpop.eup %4417 }
 0x5aa   :  { %v4420_v24 = vpop.eup %4419  ;;  %v2779_v25 = vmul.f32 %v4418_v17, %v2775_v57  ;;  %4421 = vrcp.f32 %v2777_v22  ;;  %vm2784_vm7 = vweird.f32 %v4418_v17  ;;  %v2819_v53 = vand.u32 2147483648, %v2777_v22 }
 0x5ab   :  { %v2794_v26 = vmul.f32 %v4420_v24, %v2776_v14  ;;  %4423 = vtanh.f32 %v2765_v23  ;;  %vm2799_vm8 = vweird.f32 %v4420_v24  ;;  %vm2785_vm11 = vmor %vm2783_vm9, %vm2784_vm7  ;;  %vm2813_vm0 = vweird.f32 %v2777_v22 }
 0x5ac   :  { %v2780_v27 = vsub.f32 1.0, %v2779_v25  ;;  %vm2800_vm12 = vmor %vm2798_vm10, %vm2799_vm8  ;;  %v2817_v44 = vand.u32 2147483647, %v2777_v22  ;;  %v2820_v13 = vor.u32 1.1754944e-38, %v2819_v53 }
 0x5ad   :  { %v2795_v28 = vsub.f32 1.0, %v2794_v26 }
 0x5ae   :  { %v2781_v32 = vmul.f32 %v4418_v17, %v2780_v27  ;;  %vm2818_vm2 = vcmp.eq.f32.partialorder %v2817_v44, 8.507059e+37 }
 0x5af   :  { %v2796_v35 = vmul.f32 %v4420_v24, %v2795_v28 }
 0x5b0   :  { %v4422_v38 = vpop.eup %4421  ;;  %v2782_v54 = vadd.f32 %v4418_v17, %v2781_v32 }
 0x5b1   :  { %v2809_v2 = vmul.f32 %v4422_v38, %v2777_v22  ;;  %v2797_v40 = vadd.f32 %v4420_v24, %v2796_v35  ;;  %v4424_v45 = vpop.eup %4423  ;;  %vm2814_vm15 = vweird.f32 %v4422_v38 }
 0x5b2   :  { %v2786_v43 = vsel %vm2785_vm11, %v4418_v17, %v2782_v54  ;;  %vm2815_vm1 = vmor %vm2813_vm0, %vm2814_vm15 }
 0x5b3   :  { %v2810_v63 = vsub.f32 1.0, %v2809_v2  ;;  %v2791_v33 = vsel %vm2788_vm13, %v2790_v39, %v2786_v43  ;;  %v2801_v46 = vsel %vm2800_vm12, %v4420_v24, %v2797_v40 }
 0x5b4   :  { %v2806_v47 = vsel %vm2803_vm14, %v2805_v42, %v2801_v46  ;;  %v2828_v48 = vmul.f32 %v4424_v45, %v2791_v33 }
 0x5b5   :  { %v2811_v49 = vmul.f32 %v4422_v38, %v2810_v63  ;;  %v2827_v50 = vmul.f32 %v2825_v41, %v2806_v47 }
 0x5b7   :  { %v2829_v51 = vadd.f32 %v2828_v48, %v2827_v50  ;;  %v2812_v52 = vadd.f32 %v4422_v38, %v2811_v49 }
 0x5b9   :  { %4425 = vtanh.f32 %v2829_v51  ;;  %2918 = vst [vmem:[#allocation3 - $0x7] sm:$0x80] %v2829_v51  ;;  %v2816_v55 = vsel %vm2815_vm1, %v4422_v38, %v2812_v52 }
 0x5ba   :  { %v2821_v59 = vsel %vm2818_vm2, %v2820_v13, %v2816_v55 }
 0x5bf   :  { %v4426_v58 = vpop.eup %4425 }
 0x5c0   :  { %v2831_v60 = vmul.f32 %v4426_v58, %v2821_v59 }
 0x5c2   :  { %2832 = vst [vmem:[#allocation4] sm:$0x80] %v2831_v60 }
 0x5c3   :  { %2917 = vst [vmem:[#allocation2 - $0x7] sm:$0x80] %v2831_v60 }
 0x5c9   :  { %v2833_v61 = vld [vmem:[#allocation4] sm:$0xff] }
 0x5ca   :  { %v2834_v0 = vpack.c.bf16 %v2833_v61, %v2833_v61 }
 0x5cc   :  { %2911 = vmatmul.bf16.vlgmr.msra.gmra.mxu0 %v2834_v0 }
 0x649   :  { %v2912_v1 = vpop.f32.mrf.mxu0 }
 0x64a   :  { %v2913_v3 = vadd.f32 %v4298_v18, %v2912_v1 }
 0x64c   :  { %2916 = vst [vmem:[#allocation14] sm:$0xff] %v2913_v3 }
 0x64d   :  { %2929 = dma.vmem_to_hbm [thread:$0]  %s2925_s24, 128, %s2927_s27, [#allocation7]  }
 0x651   :  { %v2914_v4 = vpop.f32.mrf.mxu0 }
 0x652   :  { %4577 = dma.done.wait [#allocation7], 128  }
 0x653   :  { %4578 = vsyncadd [#allocation7], 4294967168 }
 0x654   :  { %2934 = vsyncpa [#allocation6], 1 }
 0x655   :  { %2935 = vsyncpa [#allocation9], 1 }
 0x656   :  { %2936 = vsyncpa [#allocation12], 1 }
 0x657   :  { %2937 = vsyncpa [#allocation7], 1 }

</bundles_post_ra>
